<compile_context>
chip_gen: v7x
topology: tpu7x:2x2x1
jax: 0.10.0
libtpu: 0.0.40
codegen_flags: <defaults>
</compile_context>

<pallas_src>
import functools

import jax
import jax.numpy as jnp
from jax.experimental import pallas as pl
from jax.experimental.pallas import tpu as pltpu


# ----------------------------------------------------------------------------
# In-kernel helpers (traced inside Pallas kernels)
# ----------------------------------------------------------------------------

def _ln(x, g, b, eps=1e-5):
    """LayerNorm over the last axis (PyTorch default eps)."""
    mu = jnp.mean(x, axis=-1, keepdims=True)
    var = jnp.mean(jnp.square(x - mu), axis=-1, keepdims=True)
    return (x - mu) * jax.lax.rsqrt(var + eps) * g + b


def _bf16(x):
    """Cast an MXU operand to bf16 (f32 accumulation kept via preferred_element_type)."""
    return x.astype(jnp.bfloat16)


# ----------------------------------------------------------------------------
# Pallas kernels
# ----------------------------------------------------------------------------

def _patch_embed_kernel(x_ref, g1_ref, b1_ref, w_ref, bw_ref, g2_ref, b2_ref,
                        pos_ref, o_ref):
    """patch_to_emb: LN -> Linear -> LN -> +pos_embedding on a flat (B*P, .) slab."""
    t = _ln(x_ref[...], g1_ref[...], b1_ref[...])
    t = jnp.dot(_bf16(t), w_ref[...], preferred_element_type=jnp.float32) + bw_ref[...]
    t = _ln(t, g2_ref[...], b2_ref[...])
    o_ref[...] = t + pos_ref[...]


def _transformer_stack_kernel(x_ref, ag_ref, ab_ref, wq_ref, wk_ref, wv_ref,
                              wo_ref, bo_ref, fg_ref, fb_ref, w1_ref, b1_ref,
                              w2_ref, b2_ref, o_ref, *, batch, seq, heads, dim_head):
    """grid=(depth,): one pre-norm transformer layer per grid step.

    The activation is the grid-resident output block (same block index every
    step); layer-l weights are streamed per step (double-buffered by Pallas).
    """
    @pl.when(pl.program_id(0) == 0)
    def _():
        o_ref[...] = x_ref[...]

    x = o_ref[...]                                        # (B*N, D) f32
    dim = x.shape[-1]
    scale = dim_head ** -0.5

    # --- attention sublayer (+ residual) ---
    xn = _ln(x, ag_ref[...], ab_ref[...])
    xb = _bf16(xn)
    attn = jnp.zeros((batch * seq, dim), jnp.float32)
    for h in range(heads):   # head-major weight slabs: no lane slicing, no concat
        q = jnp.dot(xb, wq_ref[h],
                    preferred_element_type=jnp.float32).reshape(batch, seq, dim_head)
        k = jnp.dot(xb, wk_ref[h],
                    preferred_element_type=jnp.float32).reshape(batch, seq, dim_head)
        v = jnp.dot(xb, wv_ref[h],
                    preferred_element_type=jnp.float32).reshape(batch, seq, dim_head)
        s = jnp.einsum('bqd,bkd->bqk', q, k,
                       preferred_element_type=jnp.float32) * scale
        m = jnp.max(s, axis=-1, keepdims=True)
        e = jnp.exp(s - m)
        p = e * pl.reciprocal(jnp.sum(e, axis=-1, keepdims=True), approx=True)
        o = jnp.einsum('bqk,bkd->bqd', p, v, preferred_element_type=jnp.float32)
        attn = attn + jnp.dot(_bf16(o.reshape(batch * seq, dim_head)), wo_ref[h],
                              preferred_element_type=jnp.float32)
    x = x + attn + bo_ref[...]

    # --- feedforward sublayer (+ residual) ---
    xn = _ln(x, fg_ref[...], fb_ref[...])
    hdn = jnp.dot(_bf16(xn), w1_ref[...], preferred_element_type=jnp.float32) + b1_ref[...]
    # TODO(synk): PyTorch nn.GELU default is exact erf; tanh approximation used here.
    hdn = jax.nn.gelu(hdn, approximate=True)
    x = x + jnp.dot(_bf16(hdn), w2_ref[...], preferred_element_type=jnp.float32) + b2_ref[...]

    o_ref[...] = x


def _ln_linear_add_kernel(x_ref, g_ref, b_ref, w_ref, bw_ref, add_ref, o_ref):
    """encoder final LN -> enc_to_dec Linear -> + decoder_pos_emb[unmasked] (fused)."""
    xn = _ln(x_ref[...], g_ref[...], b_ref[...])
    o_ref[...] = (jnp.dot(_bf16(xn), w_ref[...], preferred_element_type=jnp.float32)
                  + bw_ref[...] + add_ref[...])


def _ln_sigmoid_linear_kernel(x_ref, g_ref, b_ref, w_ref, bw_ref, o_ref):
    """decoder final LN -> sigmoid -> to_pixels Linear (fused)."""
    xn = jax.nn.sigmoid(_ln(x_ref[...], g_ref[...], b_ref[...]))
    o_ref[...] = (jnp.dot(_bf16(xn), w_ref[...], preferred_element_type=jnp.float32)
                  + bw_ref[...])


# ----------------------------------------------------------------------------
# pallas_call wrappers
# ----------------------------------------------------------------------------

def _full_spec(shape):
    nd = len(shape)
    return pl.BlockSpec(tuple(shape), lambda i: (0,) * nd)


def _single_call(kernel, out_shape, *arrays):
    """One-shot whole-slab call (tiny operands, everything resident in VMEM)."""
    return pl.pallas_call(
        kernel,
        out_shape=jax.ShapeDtypeStruct(out_shape, jnp.float32),
        grid=(1,),
        in_specs=[_full_spec(a.shape) for a in arrays],
        out_specs=_full_spec(out_shape),
        compiler_params=pltpu.CompilerParams(dimension_semantics=("arbitrary",)),
    )(*arrays)


def transformer_stack(x, p, heads, dim_head):
    """Whole transformer stack in ONE pallas_call with grid=(depth,)."""
    B, N, D = x.shape
    depth = p["wq"].shape[0]
    mlp = p["w1"].shape[-1]

    def layer_spec(per_layer_shape):
        nd = len(per_layer_shape)
        # Leading depth axis squeezed; index_map selects layer l's slab.
        return pl.BlockSpec((None,) + tuple(per_layer_shape),
                            lambda l: (l,) + (0,) * nd)

    act_spec = pl.BlockSpec((B * N, D), lambda l: (0, 0))

    kernel = functools.partial(_transformer_stack_kernel,
                               batch=B, seq=N, heads=heads, dim_head=dim_head)
    y = pl.pallas_call(
        kernel,
        out_shape=jax.ShapeDtypeStruct((B * N, D), jnp.float32),
        grid=(depth,),
        in_specs=[act_spec,
                  layer_spec((1, D)), layer_spec((1, D)),            # attn LN g, b
                  layer_spec((heads, D, dim_head)),                  # wq
                  layer_spec((heads, D, dim_head)),                  # wk
                  layer_spec((heads, D, dim_head)),                  # wv
                  layer_spec((heads, dim_head, D)),                  # wo (per head)
                  layer_spec((1, D)),                                # bo
                  layer_spec((1, D)), layer_spec((1, D)),            # ff LN g, b
                  layer_spec((D, mlp)), layer_spec((1, mlp)),        # w1, b1
                  layer_spec((mlp, D)), layer_spec((1, D))],         # w2, b2
        out_specs=act_spec,
        compiler_params=pltpu.CompilerParams(dimension_semantics=("arbitrary",)),
    )(x.reshape(B * N, D),
      p["ag"], p["ab"], p["wq"], p["wk"], p["wv"], p["wo"], p["bo"],
      p["fg"], p["fb"], p["w1"], p["b1"], p["w2"], p["b2"])
    return y.reshape(B, N, D)


# ----------------------------------------------------------------------------
# Deterministic parameter init (synthetic weights; shapes follow the module)
# ----------------------------------------------------------------------------

def _lin_init(key, din, dout):
    kw, kb = jax.random.split(key)
    w = jax.random.normal(kw, (din, dout), jnp.float32) * 0.02
    b = jax.random.normal(kb, (dout,), jnp.float32) * 0.02
    return w, b


def init_transformer_stack(key, depth, dim, heads, dim_head, mlp_dim):
    """Stacked per-layer weights (leading depth axis), head-major q/k/v/o layouts."""
    inner = heads * dim_head
    keys = jax.random.split(key, depth)
    names = ("ag", "ab", "wq", "wk", "wv", "wo", "bo", "fg", "fb", "w1", "b1", "w2", "b2")
    per = {k: [] for k in names}
    for i in range(depth):
        k1, k2, k3, k4 = jax.random.split(keys[i], 4)
        wqkv, _ = _lin_init(k1, dim, 3 * inner)          # to_qkv has bias=False
        wo, bo = _lin_init(k2, inner, dim)
        w1, b1 = _lin_init(k3, dim, mlp_dim)
        w2, b2 = _lin_init(k4, mlp_dim, dim)
        per["ag"].append(jnp.ones((1, dim), jnp.float32))
        per["ab"].append(jnp.zeros((1, dim), jnp.float32))
        # qkv column order is (head, dim_head) head-major -> head-batched slabs
        per["wq"].append(wqkv[:, 0 * inner:1 * inner].reshape(dim, heads, dim_head).transpose(1, 0, 2))
        per["wk"].append(wqkv[:, 1 * inner:2 * inner].reshape(dim, heads, dim_head).transpose(1, 0, 2))
        per["wv"].append(wqkv[:, 2 * inner:3 * inner].reshape(dim, heads, dim_head).transpose(1, 0, 2))
        per["wo"].append(wo.reshape(heads, dim_head, dim))
        per["bo"].append(bo.reshape(1, dim))
        per["fg"].append(jnp.ones((1, dim), jnp.float32))
        per["fb"].append(jnp.zeros((1, dim), jnp.float32))
        per["w1"].append(w1)
        per["b1"].append(b1.reshape(1, mlp_dim))
        per["w2"].append(w2)
        per["b2"].append(b2.reshape(1, dim))
    stacked = {k: jnp.stack(v) for k, v in per.items()}
    for k in ("wq", "wk", "wv", "wo", "w1", "w2"):       # bf16 MXU operands in HBM
        stacked[k] = stacked[k].astype(jnp.bfloat16)
    stacked["final_g"] = jnp.ones((1, dim), jnp.float32)
    stacked["final_b"] = jnp.zeros((1, dim), jnp.float32)
    return stacked


CFG = dict(
    batch=2, channels=4, image=16, patch=4,          # -> 16 patches, patch_dim=64
    enc_dim=32, enc_depth=1, enc_heads=4, enc_dim_head=8, enc_mlp=64,
    dec_dim=48, dec_depth=1, dec_heads=4, dec_dim_head=16,
    masking_ratio=0.75,
)
CFG["num_patches"] = (CFG["image"] // CFG["patch"]) ** 2
CFG["patch_dim"] = CFG["patch"] ** 2 * CFG["channels"]


def init_mae_params(key, cfg):
    keys = jax.random.split(key, 8)
    pd, ed, dd = cfg["patch_dim"], cfg["enc_dim"], cfg["dec_dim"]
    pe_w, pe_b = _lin_init(keys[0], pd, ed)
    pos_embedding = jax.random.normal(
        keys[1], (1, cfg["num_patches"] + 1, ed), jnp.float32) * 0.02
    enc_tr = init_transformer_stack(keys[2], cfg["enc_depth"], ed,
                                    cfg["enc_heads"], cfg["enc_dim_head"], cfg["enc_mlp"])
    e2d_w, e2d_b = _lin_init(keys[3], ed, dd)
    mask_token = jax.random.normal(keys[4], (dd,), jnp.float32)
    dec_tr = init_transformer_stack(keys[5], cfg["dec_depth"], dd,
                                    cfg["dec_heads"], cfg["dec_dim_head"], dd * 4)
    dec_pos_emb = jax.random.normal(keys[6], (cfg["num_patches"], dd), jnp.float32) * 0.02
    px_w, px_b = _lin_init(keys[7], dd, pd)
    return {
        "pe_ln1_g": jnp.ones((1, pd), jnp.float32),
        "pe_ln1_b": jnp.zeros((1, pd), jnp.float32),
        "pe_w": pe_w.astype(jnp.bfloat16), "pe_b": pe_b.reshape(1, ed),
        "pe_ln2_g": jnp.ones((1, ed), jnp.float32),
        "pe_ln2_b": jnp.zeros((1, ed), jnp.float32),
        "pos_embedding": pos_embedding,
        "enc_tr": enc_tr,
        "e2d_w": e2d_w.astype(jnp.bfloat16), "e2d_b": e2d_b.reshape(1, dd),
        "mask_token": mask_token,
        "dec_tr": dec_tr,
        "dec_pos_emb": dec_pos_emb,
        "px_w": px_w.astype(jnp.bfloat16), "px_b": px_b.reshape(1, pd),
    }


# ----------------------------------------------------------------------------
# MAE forward (mirrors the PyTorch forward())
# ----------------------------------------------------------------------------

def mae_forward(params, img, mask_key, cfg):
    B, C, H, W = img.shape
    p = cfg["patch"]
    h, w = H // p, W // p
    P = h * w
    patch_dim = p * p * C
    enc_dim = cfg["enc_dim"]
    dec_dim = cfg["dec_dim"]

    # to_patch: 'b c (h p1) (w p2) -> b (h w) (p1 p2 c)'   (layout glue only)
    x = img.reshape(B, C, h, p, w, p).transpose(0, 2, 4, 3, 5, 1)
    patches = x.reshape(B * P, patch_dim).astype(jnp.float32)

    pos = params["pos_embedding"][0, 1:P + 1]                         # (P, enc_dim)
    pos_flat = jnp.broadcast_to(pos[None], (B, P, enc_dim)).reshape(B * P, enc_dim)

    # fused patch_to_emb: LN -> Linear -> LN -> +pos_embedding (flat slab, no batch loop)
    tokens = _single_call(
        _patch_embed_kernel, (B * P, enc_dim),
        patches,
        params["pe_ln1_g"], params["pe_ln1_b"],
        params["pe_w"], params["pe_b"],
        params["pe_ln2_g"], params["pe_ln2_b"],
        pos_flat).reshape(B, P, enc_dim)

    # random masking (argsort of uniform noise) — plain-JAX glue
    num_masked = int(cfg["masking_ratio"] * P)
    rand_indices = jnp.argsort(jax.random.uniform(mask_key, (B, P)), axis=-1)
    masked_indices = rand_indices[:, :num_masked]
    unmasked_indices = rand_indices[:, num_masked:]
    batch_range = jnp.arange(B)[:, None]
    # TODO(synk): fold this gather into the encoder stack via PrefetchScalarGridSpec
    # + pl.Element row index maps instead of an XLA gather.
    tokens = tokens[batch_range, unmasked_indices]                    # (B, Nun, enc_dim)
    Nun = tokens.shape[1]

    # encoder transformer: ONE pallas_call for the whole stack
    enc = transformer_stack(tokens, params["enc_tr"], cfg["enc_heads"], cfg["enc_dim_head"])

    # fused: encoder final LN -> enc_to_dec Linear -> + decoder_pos_emb[unmasked]
    dec_pos = params["dec_pos_emb"]
    pos_unmasked = dec_pos[unmasked_indices].reshape(B * Nun, dec_dim)
    unmasked_decoder_tokens = _single_call(
        _ln_linear_add_kernel, (B * Nun, dec_dim),
        enc.reshape(B * Nun, enc_dim),
        params["enc_tr"]["final_g"], params["enc_tr"]["final_b"],
        params["e2d_w"], params["e2d_b"],
        pos_unmasked).reshape(B, Nun, dec_dim)

    # assemble full decoder sequence (scatter — plain-JAX glue)
    # TODO(synk): could be fused via input_output_aliases + scalar-prefetch scatter.
    mask_tokens = params["mask_token"][None, None, :] + dec_pos[masked_indices]
    full = jnp.zeros((B, P, dec_dim), jnp.float32)
    full = full.at[batch_range, unmasked_indices].set(unmasked_decoder_tokens)
    full = full.at[batch_range, masked_indices].set(mask_tokens)

    # decoder transformer: ONE pallas_call for the whole stack
    dec = transformer_stack(full, params["dec_tr"], cfg["dec_heads"], cfg["dec_dim_head"])

    # fused: decoder final LN -> sigmoid -> to_pixels Linear
    recons_image = _single_call(
        _ln_sigmoid_linear_kernel, (B * P, patch_dim),
        dec.reshape(B * P, dec_dim),
        params["dec_tr"]["final_g"], params["dec_tr"]["final_b"],
        params["px_w"], params["px_b"]).reshape(B, P, patch_dim)

    # pred_pixel_values = to_pixels(sigmoid(decoder(x))[masked]) == masked rows of
    # recons_image (same linear on the same rows — deduplicated).
    pred_pixel_values = recons_image[batch_range, masked_indices]
    return recons_image, pred_pixel_values, masked_indices


# ----------------------------------------------------------------------------
# Main
# ----------------------------------------------------------------------------

if __name__ == "__main__":
    key = jax.random.PRNGKey(0)
    k_params, k_img, k_mask = jax.random.split(key, 3)

    params = init_mae_params(k_params, CFG)
    img = jax.random.normal(
        k_img, (CFG["batch"], CFG["channels"], CFG["image"], CFG["image"]), jnp.float32)

    fwd = jax.jit(functools.partial(mae_forward, cfg=CFG))
    recons_image, pred_pixel_values, masked_indices = fwd(params, img, k_mask)
    jax.block_until_ready((recons_image, pred_pixel_values, masked_indices))

    assert recons_image.shape == (CFG["batch"], CFG["num_patches"], CFG["patch_dim"])
    assert pred_pixel_values.shape == (
        CFG["batch"], int(CFG["masking_ratio"] * CFG["num_patches"]), CFG["patch_dim"])
    assert masked_indices.shape == (
        CFG["batch"], int(CFG["masking_ratio"] * CFG["num_patches"]))
    assert bool(jnp.all(jnp.isfinite(recons_image)))
    print("KERNEL_OK")
</pallas_src>

<mosaic_0001>
module attributes {stable_mosaic.version = 11 : i64} {
  func.func @_patch_embed_kernel(%arg0: i32, %arg1: memref<32x64xf32, #tpu.memory_space<vmem>>, %arg2: memref<1x64xf32, #tpu.memory_space<vmem>>, %arg3: memref<1x64xf32, #tpu.memory_space<vmem>>, %arg4: memref<64x32xbf16, #tpu.memory_space<vmem>>, %arg5: memref<1x32xf32, #tpu.memory_space<vmem>>, %arg6: memref<1x32xf32, #tpu.memory_space<vmem>>, %arg7: memref<1x32xf32, #tpu.memory_space<vmem>>, %arg8: memref<32x32xf32, #tpu.memory_space<vmem>>, %arg9: memref<32x32xf32, #tpu.memory_space<vmem>>) attributes {dimension_semantics = [#tpu.dimension_semantics<arbitrary>], iteration_bounds = array<i64: 1>, scalar_prefetch = 0 : i64, scratch_operands = 0 : i64, tpu.core_type = #tpu.core_type<tc>, window_params = [{pipeline_mode = #tpu.pipeline_mode<synchronous>, transform_indices = @transform_0, window_bounds = array<i64: 32, 64>}, {pipeline_mode = #tpu.pipeline_mode<synchronous>, transform_indices = @transform_1, window_bounds = array<i64: 1, 64>}, {pipeline_mode = #tpu.pipeline_mode<synchronous>, transform_indices = @transform_2, window_bounds = array<i64: 1, 64>}, {pipeline_mode = #tpu.pipeline_mode<synchronous>, transform_indices = @transform_3, window_bounds = array<i64: 64, 32>}, {pipeline_mode = #tpu.pipeline_mode<synchronous>, transform_indices = @transform_4, window_bounds = array<i64: 1, 32>}, {pipeline_mode = #tpu.pipeline_mode<synchronous>, transform_indices = @transform_5, window_bounds = array<i64: 1, 32>}, {pipeline_mode = #tpu.pipeline_mode<synchronous>, transform_indices = @transform_6, window_bounds = array<i64: 1, 32>}, {pipeline_mode = #tpu.pipeline_mode<synchronous>, transform_indices = @transform_7, window_bounds = array<i64: 32, 32>}, {pipeline_mode = #tpu.pipeline_mode<synchronous>, transform_indices = @transform_8, window_bounds = array<i64: 32, 32>}]} {
    %c0 = arith.constant 0 : index
    %c0_0 = arith.constant 0 : index
    %0 = vector.load %arg1[%c0, %c0_0] : memref<32x64xf32, #tpu.memory_space<vmem>>, vector<32x64xf32>
    %c0_1 = arith.constant 0 : index
    %c0_2 = arith.constant 0 : index
    %1 = vector.load %arg2[%c0_1, %c0_2] : memref<1x64xf32, #tpu.memory_space<vmem>>, vector<1x64xf32>
    %c0_3 = arith.constant 0 : index
    %c0_4 = arith.constant 0 : index
    %2 = vector.load %arg3[%c0_3, %c0_4] : memref<1x64xf32, #tpu.memory_space<vmem>>, vector<1x64xf32>
    %cst = arith.constant dense<0.000000e+00> : vector<32xf32>
    %3 = vector.multi_reduction <add>, %0, %cst [1] : vector<32x64xf32> to vector<32xf32>
    %4 = vector.shape_cast %3 : vector<32xf32> to vector<32x1xf32>
    %cst_5 = arith.constant 6.400000e+01 : f32
    %5 = vector.broadcast %cst_5 : f32 to vector<32x1xf32>
    %6 = arith.divf %4, %5 : vector<32x1xf32>
    %7 = vector.broadcast %6 : vector<32x1xf32> to vector<32x64xf32>
    %8 = arith.subf %0, %7 : vector<32x64xf32>
    %9 = arith.mulf %8, %8 : vector<32x64xf32>
    %cst_6 = arith.constant dense<0.000000e+00> : vector<32xf32>
    %10 = vector.multi_reduction <add>, %9, %cst_6 [1] : vector<32x64xf32> to vector<32xf32>
    %11 = vector.shape_cast %10 : vector<32xf32> to vector<32x1xf32>
    %cst_7 = arith.constant 6.400000e+01 : f32
    %12 = vector.broadcast %cst_7 : f32 to vector<32x1xf32>
    %13 = arith.divf %11, %12 : vector<32x1xf32>
    %14 = vector.broadcast %6 : vector<32x1xf32> to vector<32x64xf32>
    %15 = arith.subf %0, %14 : vector<32x64xf32>
    %cst_8 = arith.constant 9.99999974E-6 : f32
    %16 = vector.broadcast %cst_8 : f32 to vector<32x1xf32>
    %17 = arith.addf %13, %16 : vector<32x1xf32>
    %18 = math.rsqrt %17 : vector<32x1xf32>
    %19 = vector.broadcast %18 : vector<32x1xf32> to vector<32x64xf32>
    %20 = arith.mulf %15, %19 : vector<32x64xf32>
    %21 = vector.broadcast %1 : vector<1x64xf32> to vector<32x64xf32>
    %22 = arith.mulf %20, %21 : vector<32x64xf32>
    %23 = vector.broadcast %2 : vector<1x64xf32> to vector<32x64xf32>
    %24 = arith.addf %22, %23 : vector<32x64xf32>
    %25 = arith.truncf %24 : vector<32x64xf32> to vector<32x64xbf16>
    %c0_9 = arith.constant 0 : index
    %c0_10 = arith.constant 0 : index
    %26 = vector.load %arg4[%c0_9, %c0_10] : memref<64x32xbf16, #tpu.memory_space<vmem>>, vector<64x32xbf16>
    %cst_11 = arith.constant dense<0.000000e+00> : vector<32x32xf32>
    %27 = tpu.matmul %25, %26, %cst_11 {dimension_numbers = #tpu.dot_dimension_numbers<[1], [0], [0], [1], [0, 0, 1, 1], [], []>} : vector<32x64xbf16>, vector<64x32xbf16>, vector<32x32xf32> -> vector<32x32xf32>
    %c0_12 = arith.constant 0 : index
    %c0_13 = arith.constant 0 : index
    %28 = vector.load %arg5[%c0_12, %c0_13] : memref<1x32xf32, #tpu.memory_space<vmem>>, vector<1x32xf32>
    %29 = vector.broadcast %28 : vector<1x32xf32> to vector<32x32xf32>
    %30 = arith.addf %27, %29 : vector<32x32xf32>
    %c0_14 = arith.constant 0 : index
    %c0_15 = arith.constant 0 : index
    %31 = vector.load %arg6[%c0_14, %c0_15] : memref<1x32xf32, #tpu.memory_space<vmem>>, vector<1x32xf32>
    %c0_16 = arith.constant 0 : index
    %c0_17 = arith.constant 0 : index
    %32 = vector.load %arg7[%c0_16, %c0_17] : memref<1x32xf32, #tpu.memory_space<vmem>>, vector<1x32xf32>
    %cst_18 = arith.constant dense<0.000000e+00> : vector<32xf32>
    %33 = vector.multi_reduction <add>, %30, %cst_18 [1] : vector<32x32xf32> to vector<32xf32>
    %34 = vector.shape_cast %33 : vector<32xf32> to vector<32x1xf32>
    %cst_19 = arith.constant 3.200000e+01 : f32
    %35 = vector.broadcast %cst_19 : f32 to vector<32x1xf32>
    %36 = arith.divf %34, %35 : vector<32x1xf32>
    %37 = vector.broadcast %36 : vector<32x1xf32> to vector<32x32xf32>
    %38 = arith.subf %30, %37 : vector<32x32xf32>
    %39 = arith.mulf %38, %38 : vector<32x32xf32>
    %cst_20 = arith.constant dense<0.000000e+00> : vector<32xf32>
    %40 = vector.multi_reduction <add>, %39, %cst_20 [1] : vector<32x32xf32> to vector<32xf32>
    %41 = vector.shape_cast %40 : vector<32xf32> to vector<32x1xf32>
    %cst_21 = arith.constant 3.200000e+01 : f32
    %42 = vector.broadcast %cst_21 : f32 to vector<32x1xf32>
    %43 = arith.divf %41, %42 : vector<32x1xf32>
    %44 = vector.broadcast %36 : vector<32x1xf32> to vector<32x32xf32>
    %45 = arith.subf %30, %44 : vector<32x32xf32>
    %cst_22 = arith.constant 9.99999974E-6 : f32
    %46 = vector.broadcast %cst_22 : f32 to vector<32x1xf32>
    %47 = arith.addf %43, %46 : vector<32x1xf32>
    %48 = math.rsqrt %47 : vector<32x1xf32>
    %49 = vector.broadcast %48 : vector<32x1xf32> to vector<32x32xf32>
    %50 = arith.mulf %45, %49 : vector<32x32xf32>
    %51 = vector.broadcast %31 : vector<1x32xf32> to vector<32x32xf32>
    %52 = arith.mulf %50, %51 : vector<32x32xf32>
    %53 = vector.broadcast %32 : vector<1x32xf32> to vector<32x32xf32>
    %54 = arith.addf %52, %53 : vector<32x32xf32>
    %c0_23 = arith.constant 0 : index
    %c0_24 = arith.constant 0 : index
    %55 = vector.load %arg8[%c0_23, %c0_24] : memref<32x32xf32, #tpu.memory_space<vmem>>, vector<32x32xf32>
    %56 = arith.addf %54, %55 : vector<32x32xf32>
    %c0_25 = arith.constant 0 : index
    %c0_26 = arith.constant 0 : index
    %57 = vector.load %arg9[%c0_25, %c0_26] : memref<32x32xf32, #tpu.memory_space<vmem>>, vector<32x32xf32>
    tpu.vector_store %arg9[%c0_25, %c0_26], %56 {strides = array<i32>} : memref<32x32xf32, #tpu.memory_space<vmem>>, vector<32x32xf32>,
    return
  }
  func.func @transform_0(%arg0: i32) -> (i32, i32) {
    %c0_i32 = arith.constant 0 : i32
    %c0_i32_0 = arith.constant 0 : i32
    %c0_i32_1 = arith.constant 0 : i32
    return %c0_i32, %c0_i32_0 : i32, i32
  }
  func.func @transform_1(%arg0: i32) -> (i32, i32) {
    %c0_i32 = arith.constant 0 : i32
    %c0_i32_0 = arith.constant 0 : i32
    %c0_i32_1 = arith.constant 0 : i32
    return %c0_i32, %c0_i32_0 : i32, i32
  }
  func.func @transform_2(%arg0: i32) -> (i32, i32) {
    %c0_i32 = arith.constant 0 : i32
    %c0_i32_0 = arith.constant 0 : i32
    %c0_i32_1 = arith.constant 0 : i32
    return %c0_i32, %c0_i32_0 : i32, i32
  }
  func.func @transform_3(%arg0: i32) -> (i32, i32) {
    %c0_i32 = arith.constant 0 : i32
    %c0_i32_0 = arith.constant 0 : i32
    %c0_i32_1 = arith.constant 0 : i32
    return %c0_i32, %c0_i32_0 : i32, i32
  }
  func.func @transform_4(%arg0: i32) -> (i32, i32) {
    %c0_i32 = arith.constant 0 : i32
    %c0_i32_0 = arith.constant 0 : i32
    %c0_i32_1 = arith.constant 0 : i32
    return %c0_i32, %c0_i32_0 : i32, i32
  }
  func.func @transform_5(%arg0: i32) -> (i32, i32) {
    %c0_i32 = arith.constant 0 : i32
    %c0_i32_0 = arith.constant 0 : i32
    %c0_i32_1 = arith.constant 0 : i32
    return %c0_i32, %c0_i32_0 : i32, i32
  }
  func.func @transform_6(%arg0: i32) -> (i32, i32) {
    %c0_i32 = arith.constant 0 : i32
    %c0_i32_0 = arith.constant 0 : i32
    %c0_i32_1 = arith.constant 0 : i32
    return %c0_i32, %c0_i32_0 : i32, i32
  }
  func.func @transform_7(%arg0: i32) -> (i32, i32) {
    %c0_i32 = arith.constant 0 : i32
    %c0_i32_0 = arith.constant 0 : i32
    %c0_i32_1 = arith.constant 0 : i32
    return %c0_i32, %c0_i32_0 : i32, i32
  }
  func.func @transform_8(%arg0: i32) -> (i32, i32) {
    %c0_i32 = arith.constant 0 : i32
    %c0_i32_0 = arith.constant 0 : i32
    %c0_i32_1 = arith.constant 0 : i32
    return %c0_i32, %c0_i32_0 : i32, i32
  }
}

module attributes {stable_mosaic.version = 11 : i64} {
  func.func @_transformer_stack_kernel(%arg0: i32, %arg1: memref<8x32xf32, #tpu.memory_space<vmem>>, %arg2: memref<1x1x32xf32, #tpu.memory_space<vmem>>, %arg3: memref<1x1x32xf32, #tpu.memory_space<vmem>>, %arg4: memref<1x4x32x8xbf16, #tpu.memory_space<vmem>>, %arg5: memref<1x4x32x8xbf16, #tpu.memory_space<vmem>>, %arg6: memref<1x4x32x8xbf16, #tpu.memory_space<vmem>>, %arg7: memref<1x4x8x32xbf16, #tpu.memory_space<vmem>>, %arg8: memref<1x1x32xf32, #tpu.memory_space<vmem>>, %arg9: memref<1x1x32xf32, #tpu.memory_space<vmem>>, %arg10: memref<1x1x32xf32, #tpu.memory_space<vmem>>, %arg11: memref<1x32x64xbf16, #tpu.memory_space<vmem>>, %arg12: memref<1x1x64xf32, #tpu.memory_space<vmem>>, %arg13: memref<1x64x32xbf16, #tpu.memory_space<vmem>>, %arg14: memref<1x1x32xf32, #tpu.memory_space<vmem>>, %arg15: memref<8x32xf32, #tpu.memory_space<vmem>>) attributes {dimension_semantics = [#tpu.dimension_semantics<arbitrary>], iteration_bounds = array<i64: 1>, scalar_prefetch = 0 : i64, scratch_operands = 0 : i64, tpu.core_type = #tpu.core_type<tc>, window_params = [{pipeline_mode = #tpu.pipeline_mode<synchronous>, transform_indices = @transform_0, window_bounds = array<i64: 8, 32>}, {transform_indices = @transform_1, window_bounds = array<i64: 1, 1, 32>}, {transform_indices = @transform_2, window_bounds = array<i64: 1, 1, 32>}, {transform_indices = @transform_3, window_bounds = array<i64: 1, 4, 32, 8>}, {transform_indices = @transform_4, window_bounds = array<i64: 1, 4, 32, 8>}, {transform_indices = @transform_5, window_bounds = array<i64: 1, 4, 32, 8>}, {transform_indices = @transform_6, window_bounds = array<i64: 1, 4, 8, 32>}, {transform_indices = @transform_7, window_bounds = array<i64: 1, 1, 32>}, {transform_indices = @transform_8, window_bounds = array<i64: 1, 1, 32>}, {transform_indices = @transform_9, window_bounds = array<i64: 1, 1, 32>}, {transform_indices = @transform_10, window_bounds = array<i64: 1, 32, 64>}, {transform_indices = @transform_11, window_bounds = array<i64: 1, 1, 64>}, {transform_indices = @transform_12, window_bounds = array<i64: 1, 64, 32>}, {transform_indices = @transform_13, window_bounds = array<i64: 1, 1, 32>}, {pipeline_mode = #tpu.pipeline_mode<synchronous>, transform_indices = @transform_14, window_bounds = array<i64: 8, 32>}]} {
    %c0_i32 = arith.constant 0 : i32
    %0 = arith.cmpi eq, %arg0, %c0_i32 : i32
    %1 = arith.extui %0 : i1 to i32
    %c0_i32_0 = arith.constant 0 : i32
    %2 = arith.cmpi ne, %1, %c0_i32_0 : i32
    scf.if %2 {
      %c0_144 = arith.constant 0 : index
      %c0_145 = arith.constant 0 : index
      %222 = vector.load %arg1[%c0_144, %c0_145] : memref<8x32xf32, #tpu.memory_space<vmem>>, vector<8x32xf32>
      %c0_146 = arith.constant 0 : index
      %c0_147 = arith.constant 0 : index
      %223 = vector.load %arg15[%c0_146, %c0_147] : memref<8x32xf32, #tpu.memory_space<vmem>>, vector<8x32xf32>
      tpu.vector_store %arg15[%c0_146, %c0_147], %222 {strides = array<i32>} : memref<8x32xf32, #tpu.memory_space<vmem>>, vector<8x32xf32>,
    } else {
    }
    %c0 = arith.constant 0 : index
    %c0_1 = arith.constant 0 : index
    %3 = vector.load %arg15[%c0, %c0_1] : memref<8x32xf32, #tpu.memory_space<vmem>>, vector<8x32xf32>
    %c0_2 = arith.constant 0 : index
    %c0_3 = arith.constant 0 : index
    %c0_4 = arith.constant 0 : index
    %4 = vector.load %arg2[%c0_2, %c0_3, %c0_4] : memref<1x1x32xf32, #tpu.memory_space<vmem>>, vector<1x1x32xf32>
    %5 = vector.shape_cast %4 : vector<1x1x32xf32> to vector<1x32xf32>
    %c0_5 = arith.constant 0 : index
    %c0_6 = arith.constant 0 : index
    %c0_7 = arith.constant 0 : index
    %6 = vector.load %arg3[%c0_5, %c0_6, %c0_7] : memref<1x1x32xf32, #tpu.memory_space<vmem>>, vector<1x1x32xf32>
    %7 = vector.shape_cast %6 : vector<1x1x32xf32> to vector<1x32xf32>
    %cst = arith.constant dense<0.000000e+00> : vector<8xf32>
    %8 = vector.multi_reduction <add>, %3, %cst [1] : vector<8x32xf32> to vector<8xf32>
    %9 = vector.shape_cast %8 : vector<8xf32> to vector<8x1xf32>
    %cst_8 = arith.constant 3.200000e+01 : f32
    %10 = vector.broadcast %cst_8 : f32 to vector<8x1xf32>
    %11 = arith.divf %9, %10 : vector<8x1xf32>
    %12 = vector.broadcast %11 : vector<8x1xf32> to vector<8x32xf32>
    %13 = arith.subf %3, %12 : vector<8x32xf32>
    %14 = arith.mulf %13, %13 : vector<8x32xf32>
    %cst_9 = arith.constant dense<0.000000e+00> : vector<8xf32>
    %15 = vector.multi_reduction <add>, %14, %cst_9 [1] : vector<8x32xf32> to vector<8xf32>
    %16 = vector.shape_cast %15 : vector<8xf32> to vector<8x1xf32>
    %cst_10 = arith.constant 3.200000e+01 : f32
    %17 = vector.broadcast %cst_10 : f32 to vector<8x1xf32>
    %18 = arith.divf %16, %17 : vector<8x1xf32>
    %19 = vector.broadcast %11 : vector<8x1xf32> to vector<8x32xf32>
    %20 = arith.subf %3, %19 : vector<8x32xf32>
    %cst_11 = arith.constant 9.99999974E-6 : f32
    %21 = vector.broadcast %cst_11 : f32 to vector<8x1xf32>
    %22 = arith.addf %18, %21 : vector<8x1xf32>
    %23 = math.rsqrt %22 : vector<8x1xf32>
    %24 = vector.broadcast %23 : vector<8x1xf32> to vector<8x32xf32>
    %25 = arith.mulf %20, %24 : vector<8x32xf32>
    %26 = vector.broadcast %5 : vector<1x32xf32> to vector<8x32xf32>
    %27 = arith.mulf %25, %26 : vector<8x32xf32>
    %28 = vector.broadcast %7 : vector<1x32xf32> to vector<8x32xf32>
    %29 = arith.addf %27, %28 : vector<8x32xf32>
    %30 = arith.truncf %29 : vector<8x32xf32> to vector<8x32xbf16>
    %cst_12 = arith.constant 0.000000e+00 : f32
    %31 = vector.broadcast %cst_12 : f32 to vector<8x32xf32>
    %c0_13 = arith.constant 0 : index
    %c0_14 = arith.constant 0 : index
    %c0_15 = arith.constant 0 : index
    %c0_16 = arith.constant 0 : index
    %32 = vector.load %arg4[%c0_13, %c0_14, %c0_15, %c0_16] : memref<1x4x32x8xbf16, #tpu.memory_space<vmem>>, vector<1x1x32x8xbf16>
    %33 = vector.shape_cast %32 : vector<1x1x32x8xbf16> to vector<32x8xbf16>
    %cst_17 = arith.constant dense<0.000000e+00> : vector<8x8xf32>
    %34 = tpu.matmul %30, %33, %cst_17 {dimension_numbers = #tpu.dot_dimension_numbers<[1], [0], [0], [1], [0, 0, 1, 1], [], []>} : vector<8x32xbf16>, vector<32x8xbf16>, vector<8x8xf32> -> vector<8x8xf32>
    %35 = vector.shape_cast %34 : vector<8x8xf32> to vector<2x4x8xf32>
    %c0_18 = arith.constant 0 : index
    %c0_19 = arith.constant 0 : index
    %c0_20 = arith.constant 0 : index
    %c0_21 = arith.constant 0 : index
    %36 = vector.load %arg5[%c0_18, %c0_19, %c0_20, %c0_21] : memref<1x4x32x8xbf16, #tpu.memory_space<vmem>>, vector<1x1x32x8xbf16>
    %37 = vector.shape_cast %36 : vector<1x1x32x8xbf16> to vector<32x8xbf16>
    %cst_22 = arith.constant dense<0.000000e+00> : vector<8x8xf32>
    %38 = tpu.matmul %30, %37, %cst_22 {dimension_numbers = #tpu.dot_dimension_numbers<[1], [0], [0], [1], [0, 0, 1, 1], [], []>} : vector<8x32xbf16>, vector<32x8xbf16>, vector<8x8xf32> -> vector<8x8xf32>
    %39 = vector.shape_cast %38 : vector<8x8xf32> to vector<2x4x8xf32>
    %c0_23 = arith.constant 0 : index
    %c0_24 = arith.constant 0 : index
    %c0_25 = arith.constant 0 : index
    %c0_26 = arith.constant 0 : index
    %40 = vector.load %arg6[%c0_23, %c0_24, %c0_25, %c0_26] : memref<1x4x32x8xbf16, #tpu.memory_space<vmem>>, vector<1x1x32x8xbf16>
    %41 = vector.shape_cast %40 : vector<1x1x32x8xbf16> to vector<32x8xbf16>
    %cst_27 = arith.constant dense<0.000000e+00> : vector<8x8xf32>
    %42 = tpu.matmul %30, %41, %cst_27 {dimension_numbers = #tpu.dot_dimension_numbers<[1], [0], [0], [1], [0, 0, 1, 1], [], []>} : vector<8x32xbf16>, vector<32x8xbf16>, vector<8x8xf32> -> vector<8x8xf32>
    %43 = vector.shape_cast %42 : vector<8x8xf32> to vector<2x4x8xf32>
    "tpu.trace_start"() <{level = 10 : i32, message = "bqd,bkd->bqk"}> : () -> ()
    %cst_28 = arith.constant dense<0.000000e+00> : vector<2x4x4xf32>
    %44 = tpu.matmul %35, %39, %cst_28 {dimension_numbers = #tpu.dot_dimension_numbers<[2], [2], [1], [1], [0, 0, 0, 1, 1, 1], [0], [0]>} : vector<2x4x8xf32>, vector<2x4x8xf32>, vector<2x4x4xf32> -> vector<2x4x4xf32>
    "tpu.trace_stop"() : () -> ()
    %cst_29 = arith.constant 0.353553385 : f32
    %45 = vector.broadcast %cst_29 : f32 to vector<2x4x4xf32>
    %46 = arith.mulf %44, %45 : vector<2x4x4xf32>
    %cst_30 = arith.constant dense<0xFF800000> : vector<2x4xf32>
    %47 = vector.multi_reduction <maximumf>, %46, %cst_30 [2] : vector<2x4x4xf32> to vector<2x4xf32>
    %48 = vector.shape_cast %47 : vector<2x4xf32> to vector<2x4x1xf32>
    %49 = vector.broadcast %48 : vector<2x4x1xf32> to vector<2x4x4xf32>
    %50 = arith.subf %46, %49 : vector<2x4x4xf32>
    %51 = math.exp %50 : vector<2x4x4xf32>
    %cst_31 = arith.constant dense<0.000000e+00> : vector<2x4xf32>
    %52 = vector.multi_reduction <add>, %51, %cst_31 [2] : vector<2x4x4xf32> to vector<2x4xf32>
    %53 = vector.shape_cast %52 : vector<2x4xf32> to vector<2x4x1xf32>
    %54 = tpu.reciprocal %53 {approx = true} : vector<2x4x1xf32> -> vector<2x4x1xf32>
    %55 = vector.broadcast %54 : vector<2x4x1xf32> to vector<2x4x4xf32>
    %56 = arith.mulf %51, %55 : vector<2x4x4xf32>
    "tpu.trace_start"() <{level = 10 : i32, message = "bqk,bkd->bqd"}> : () -> ()
    %cst_32 = arith.constant dense<0.000000e+00> : vector<2x4x8xf32>
    %57 = tpu.matmul %56, %43, %cst_32 {dimension_numbers = #tpu.dot_dimension_numbers<[2], [1], [1], [2], [0, 0, 0, 1, 1, 2], [0], [0]>} : vector<2x4x4xf32>, vector<2x4x8xf32>, vector<2x4x8xf32> -> vector<2x4x8xf32>
    "tpu.trace_stop"() : () -> ()
    %58 = vector.shape_cast %57 : vector<2x4x8xf32> to vector<8x8xf32>
    %59 = arith.truncf %58 : vector<8x8xf32> to vector<8x8xbf16>
    %c0_33 = arith.constant 0 : index
    %c0_34 = arith.constant 0 : index
    %c0_35 = arith.constant 0 : index
    %c0_36 = arith.constant 0 : index
    %60 = vector.load %arg7[%c0_33, %c0_34, %c0_35, %c0_36] : memref<1x4x8x32xbf16, #tpu.memory_space<vmem>>, vector<1x1x8x32xbf16>
    %61 = vector.shape_cast %60 : vector<1x1x8x32xbf16> to vector<8x32xbf16>
    %cst_37 = arith.constant dense<0.000000e+00> : vector<8x32xf32>
    %62 = tpu.matmul %59, %61, %cst_37 {dimension_numbers = #tpu.dot_dimension_numbers<[1], [0], [0], [1], [0, 0, 1, 1], [], []>} : vector<8x8xbf16>, vector<8x32xbf16>, vector<8x32xf32> -> vector<8x32xf32>
    %63 = arith.addf %31, %62 : vector<8x32xf32>
    %c0_38 = arith.constant 0 : index
    %c1 = arith.constant 1 : index
    %c0_39 = arith.constant 0 : index
    %c0_40 = arith.constant 0 : index
    %64 = vector.load %arg4[%c0_38, %c1, %c0_39, %c0_40] : memref<1x4x32x8xbf16, #tpu.memory_space<vmem>>, vector<1x1x32x8xbf16>
    %65 = vector.shape_cast %64 : vector<1x1x32x8xbf16> to vector<32x8xbf16>
    %cst_41 = arith.constant dense<0.000000e+00> : vector<8x8xf32>
    %66 = tpu.matmul %30, %65, %cst_41 {dimension_numbers = #tpu.dot_dimension_numbers<[1], [0], [0], [1], [0, 0, 1, 1], [], []>} : vector<8x32xbf16>, vector<32x8xbf16>, vector<8x8xf32> -> vector<8x8xf32>
    %67 = vector.shape_cast %66 : vector<8x8xf32> to vector<2x4x8xf32>
    %c0_42 = arith.constant 0 : index
    %c1_43 = arith.constant 1 : index
    %c0_44 = arith.constant 0 : index
    %c0_45 = arith.constant 0 : index
    %68 = vector.load %arg5[%c0_42, %c1_43, %c0_44, %c0_45] : memref<1x4x32x8xbf16, #tpu.memory_space<vmem>>, vector<1x1x32x8xbf16>
    %69 = vector.shape_cast %68 : vector<1x1x32x8xbf16> to vector<32x8xbf16>
    %cst_46 = arith.constant dense<0.000000e+00> : vector<8x8xf32>
    %70 = tpu.matmul %30, %69, %cst_46 {dimension_numbers = #tpu.dot_dimension_numbers<[1], [0], [0], [1], [0, 0, 1, 1], [], []>} : vector<8x32xbf16>, vector<32x8xbf16>, vector<8x8xf32> -> vector<8x8xf32>
    %71 = vector.shape_cast %70 : vector<8x8xf32> to vector<2x4x8xf32>
    %c0_47 = arith.constant 0 : index
    %c1_48 = arith.constant 1 : index
    %c0_49 = arith.constant 0 : index
    %c0_50 = arith.constant 0 : index
    %72 = vector.load %arg6[%c0_47, %c1_48, %c0_49, %c0_50] : memref<1x4x32x8xbf16, #tpu.memory_space<vmem>>, vector<1x1x32x8xbf16>
    %73 = vector.shape_cast %72 : vector<1x1x32x8xbf16> to vector<32x8xbf16>
    %cst_51 = arith.constant dense<0.000000e+00> : vector<8x8xf32>
    %74 = tpu.matmul %30, %73, %cst_51 {dimension_numbers = #tpu.dot_dimension_numbers<[1], [0], [0], [1], [0, 0, 1, 1], [], []>} : vector<8x32xbf16>, vector<32x8xbf16>, vector<8x8xf32> -> vector<8x8xf32>
    %75 = vector.shape_cast %74 : vector<8x8xf32> to vector<2x4x8xf32>
    "tpu.trace_start"() <{level = 10 : i32, message = "bqd,bkd->bqk"}> : () -> ()
    %cst_52 = arith.constant dense<0.000000e+00> : vector<2x4x4xf32>
    %76 = tpu.matmul %67, %71, %cst_52 {dimension_numbers = #tpu.dot_dimension_numbers<[2], [2], [1], [1], [0, 0, 0, 1, 1, 1], [0], [0]>} : vector<2x4x8xf32>, vector<2x4x8xf32>, vector<2x4x4xf32> -> vector<2x4x4xf32>
    "tpu.trace_stop"() : () -> ()
    %cst_53 = arith.constant 0.353553385 : f32
    %77 = vector.broadcast %cst_53 : f32 to vector<2x4x4xf32>
    %78 = arith.mulf %76, %77 : vector<2x4x4xf32>
    %cst_54 = arith.constant dense<0xFF800000> : vector<2x4xf32>
    %79 = vector.multi_reduction <maximumf>, %78, %cst_54 [2] : vector<2x4x4xf32> to vector<2x4xf32>
    %80 = vector.shape_cast %79 : vector<2x4xf32> to vector<2x4x1xf32>
    %81 = vector.broadcast %80 : vector<2x4x1xf32> to vector<2x4x4xf32>
    %82 = arith.subf %78, %81 : vector<2x4x4xf32>
    %83 = math.exp %82 : vector<2x4x4xf32>
    %cst_55 = arith.constant dense<0.000000e+00> : vector<2x4xf32>
    %84 = vector.multi_reduction <add>, %83, %cst_55 [2] : vector<2x4x4xf32> to vector<2x4xf32>
    %85 = vector.shape_cast %84 : vector<2x4xf32> to vector<2x4x1xf32>
    %86 = tpu.reciprocal %85 {approx = true} : vector<2x4x1xf32> -> vector<2x4x1xf32>
    %87 = vector.broadcast %86 : vector<2x4x1xf32> to vector<2x4x4xf32>
    %88 = arith.mulf %83, %87 : vector<2x4x4xf32>
    "tpu.trace_start"() <{level = 10 : i32, message = "bqk,bkd->bqd"}> : () -> ()
    %cst_56 = arith.constant dense<0.000000e+00> : vector<2x4x8xf32>
    %89 = tpu.matmul %88, %75, %cst_56 {dimension_numbers = #tpu.dot_dimension_numbers<[2], [1], [1], [2], [0, 0, 0, 1, 1, 2], [0], [0]>} : vector<2x4x4xf32>, vector<2x4x8xf32>, vector<2x4x8xf32> -> vector<2x4x8xf32>
    "tpu.trace_stop"() : () -> ()
    %90 = vector.shape_cast %89 : vector<2x4x8xf32> to vector<8x8xf32>
    %91 = arith.truncf %90 : vector<8x8xf32> to vector<8x8xbf16>
    %c0_57 = arith.constant 0 : index
    %c1_58 = arith.constant 1 : index
    %c0_59 = arith.constant 0 : index
    %c0_60 = arith.constant 0 : index
    %92 = vector.load %arg7[%c0_57, %c1_58, %c0_59, %c0_60] : memref<1x4x8x32xbf16, #tpu.memory_space<vmem>>, vector<1x1x8x32xbf16>
    %93 = vector.shape_cast %92 : vector<1x1x8x32xbf16> to vector<8x32xbf16>
    %cst_61 = arith.constant dense<0.000000e+00> : vector<8x32xf32>
    %94 = tpu.matmul %91, %93, %cst_61 {dimension_numbers = #tpu.dot_dimension_numbers<[1], [0], [0], [1], [0, 0, 1, 1], [], []>} : vector<8x8xbf16>, vector<8x32xbf16>, vector<8x32xf32> -> vector<8x32xf32>
    %95 = arith.addf %63, %94 : vector<8x32xf32>
    %c0_62 = arith.constant 0 : index
    %c2 = arith.constant 2 : index
    %c0_63 = arith.constant 0 : index
    %c0_64 = arith.constant 0 : index
    %96 = vector.load %arg4[%c0_62, %c2, %c0_63, %c0_64] : memref<1x4x32x8xbf16, #tpu.memory_space<vmem>>, vector<1x1x32x8xbf16>
    %97 = vector.shape_cast %96 : vector<1x1x32x8xbf16> to vector<32x8xbf16>
    %cst_65 = arith.constant dense<0.000000e+00> : vector<8x8xf32>
    %98 = tpu.matmul %30, %97, %cst_65 {dimension_numbers = #tpu.dot_dimension_numbers<[1], [0], [0], [1], [0, 0, 1, 1], [], []>} : vector<8x32xbf16>, vector<32x8xbf16>, vector<8x8xf32> -> vector<8x8xf32>
    %99 = vector.shape_cast %98 : vector<8x8xf32> to vector<2x4x8xf32>
    %c0_66 = arith.constant 0 : index
    %c2_67 = arith.constant 2 : index
    %c0_68 = arith.constant 0 : index
    %c0_69 = arith.constant 0 : index
    %100 = vector.load %arg5[%c0_66, %c2_67, %c0_68, %c0_69] : memref<1x4x32x8xbf16, #tpu.memory_space<vmem>>, vector<1x1x32x8xbf16>
    %101 = vector.shape_cast %100 : vector<1x1x32x8xbf16> to vector<32x8xbf16>
    %cst_70 = arith.constant dense<0.000000e+00> : vector<8x8xf32>
    %102 = tpu.matmul %30, %101, %cst_70 {dimension_numbers = #tpu.dot_dimension_numbers<[1], [0], [0], [1], [0, 0, 1, 1], [], []>} : vector<8x32xbf16>, vector<32x8xbf16>, vector<8x8xf32> -> vector<8x8xf32>
    %103 = vector.shape_cast %102 : vector<8x8xf32> to vector<2x4x8xf32>
    %c0_71 = arith.constant 0 : index
    %c2_72 = arith.constant 2 : index
    %c0_73 = arith.constant 0 : index
    %c0_74 = arith.constant 0 : index
    %104 = vector.load %arg6[%c0_71, %c2_72, %c0_73, %c0_74] : memref<1x4x32x8xbf16, #tpu.memory_space<vmem>>, vector<1x1x32x8xbf16>
    %105 = vector.shape_cast %104 : vector<1x1x32x8xbf16> to vector<32x8xbf16>
    %cst_75 = arith.constant dense<0.000000e+00> : vector<8x8xf32>
    %106 = tpu.matmul %30, %105, %cst_75 {dimension_numbers = #tpu.dot_dimension_numbers<[1], [0], [0], [1], [0, 0, 1, 1], [], []>} : vector<8x32xbf16>, vector<32x8xbf16>, vector<8x8xf32> -> vector<8x8xf32>
    %107 = vector.shape_cast %106 : vector<8x8xf32> to vector<2x4x8xf32>
    "tpu.trace_start"() <{level = 10 : i32, message = "bqd,bkd->bqk"}> : () -> ()
    %cst_76 = arith.constant dense<0.000000e+00> : vector<2x4x4xf32>
    %108 = tpu.matmul %99, %103, %cst_76 {dimension_numbers = #tpu.dot_dimension_numbers<[2], [2], [1], [1], [0, 0, 0, 1, 1, 1], [0], [0]>} : vector<2x4x8xf32>, vector<2x4x8xf32>, vector<2x4x4xf32> -> vector<2x4x4xf32>
    "tpu.trace_stop"() : () -> ()
    %cst_77 = arith.constant 0.353553385 : f32
    %109 = vector.broadcast %cst_77 : f32 to vector<2x4x4xf32>
    %110 = arith.mulf %108, %109 : vector<2x4x4xf32>
    %cst_78 = arith.constant dense<0xFF800000> : vector<2x4xf32>
    %111 = vector.multi_reduction <maximumf>, %110, %cst_78 [2] : vector<2x4x4xf32> to vector<2x4xf32>
    %112 = vector.shape_cast %111 : vector<2x4xf32> to vector<2x4x1xf32>
    %113 = vector.broadcast %112 : vector<2x4x1xf32> to vector<2x4x4xf32>
    %114 = arith.subf %110, %113 : vector<2x4x4xf32>
    %115 = math.exp %114 : vector<2x4x4xf32>
    %cst_79 = arith.constant dense<0.000000e+00> : vector<2x4xf32>
    %116 = vector.multi_reduction <add>, %115, %cst_79 [2] : vector<2x4x4xf32> to vector<2x4xf32>
    %117 = vector.shape_cast %116 : vector<2x4xf32> to vector<2x4x1xf32>
    %118 = tpu.reciprocal %117 {approx = true} : vector<2x4x1xf32> -> vector<2x4x1xf32>
    %119 = vector.broadcast %118 : vector<2x4x1xf32> to vector<2x4x4xf32>
    %120 = arith.mulf %115, %119 : vector<2x4x4xf32>
    "tpu.trace_start"() <{level = 10 : i32, message = "bqk,bkd->bqd"}> : () -> ()
    %cst_80 = arith.constant dense<0.000000e+00> : vector<2x4x8xf32>
    %121 = tpu.matmul %120, %107, %cst_80 {dimension_numbers = #tpu.dot_dimension_numbers<[2], [1], [1], [2], [0, 0, 0, 1, 1, 2], [0], [0]>} : vector<2x4x4xf32>, vector<2x4x8xf32>, vector<2x4x8xf32> -> vector<2x4x8xf32>
    "tpu.trace_stop"() : () -> ()
    %122 = vector.shape_cast %121 : vector<2x4x8xf32> to vector<8x8xf32>
    %123 = arith.truncf %122 : vector<8x8xf32> to vector<8x8xbf16>
    %c0_81 = arith.constant 0 : index
    %c2_82 = arith.constant 2 : index
    %c0_83 = arith.constant 0 : index
    %c0_84 = arith.constant 0 : index
    %124 = vector.load %arg7[%c0_81, %c2_82, %c0_83, %c0_84] : memref<1x4x8x32xbf16, #tpu.memory_space<vmem>>, vector<1x1x8x32xbf16>
    %125 = vector.shape_cast %124 : vector<1x1x8x32xbf16> to vector<8x32xbf16>
    %cst_85 = arith.constant dense<0.000000e+00> : vector<8x32xf32>
    %126 = tpu.matmul %123, %125, %cst_85 {dimension_numbers = #tpu.dot_dimension_numbers<[1], [0], [0], [1], [0, 0, 1, 1], [], []>} : vector<8x8xbf16>, vector<8x32xbf16>, vector<8x32xf32> -> vector<8x32xf32>
    %127 = arith.addf %95, %126 : vector<8x32xf32>
    %c0_86 = arith.constant 0 : index
    %c3 = arith.constant 3 : index
    %c0_87 = arith.constant 0 : index
    %c0_88 = arith.constant 0 : index
    %128 = vector.load %arg4[%c0_86, %c3, %c0_87, %c0_88] : memref<1x4x32x8xbf16, #tpu.memory_space<vmem>>, vector<1x1x32x8xbf16>
    %129 = vector.shape_cast %128 : vector<1x1x32x8xbf16> to vector<32x8xbf16>
    %cst_89 = arith.constant dense<0.000000e+00> : vector<8x8xf32>
    %130 = tpu.matmul %30, %129, %cst_89 {dimension_numbers = #tpu.dot_dimension_numbers<[1], [0], [0], [1], [0, 0, 1, 1], [], []>} : vector<8x32xbf16>, vector<32x8xbf16>, vector<8x8xf32> -> vector<8x8xf32>
    %131 = vector.shape_cast %130 : vector<8x8xf32> to vector<2x4x8xf32>
    %c0_90 = arith.constant 0 : index
    %c3_91 = arith.constant 3 : index
    %c0_92 = arith.constant 0 : index
    %c0_93 = arith.constant 0 : index
    %132 = vector.load %arg5[%c0_90, %c3_91, %c0_92, %c0_93] : memref<1x4x32x8xbf16, #tpu.memory_space<vmem>>, vector<1x1x32x8xbf16>
    %133 = vector.shape_cast %132 : vector<1x1x32x8xbf16> to vector<32x8xbf16>
    %cst_94 = arith.constant dense<0.000000e+00> : vector<8x8xf32>
    %134 = tpu.matmul %30, %133, %cst_94 {dimension_numbers = #tpu.dot_dimension_numbers<[1], [0], [0], [1], [0, 0, 1, 1], [], []>} : vector<8x32xbf16>, vector<32x8xbf16>, vector<8x8xf32> -> vector<8x8xf32>
    %135 = vector.shape_cast %134 : vector<8x8xf32> to vector<2x4x8xf32>
    %c0_95 = arith.constant 0 : index
    %c3_96 = arith.constant 3 : index
    %c0_97 = arith.constant 0 : index
    %c0_98 = arith.constant 0 : index
    %136 = vector.load %arg6[%c0_95, %c3_96, %c0_97, %c0_98] : memref<1x4x32x8xbf16, #tpu.memory_space<vmem>>, vector<1x1x32x8xbf16>
    %137 = vector.shape_cast %136 : vector<1x1x32x8xbf16> to vector<32x8xbf16>
    %cst_99 = arith.constant dense<0.000000e+00> : vector<8x8xf32>
    %138 = tpu.matmul %30, %137, %cst_99 {dimension_numbers = #tpu.dot_dimension_numbers<[1], [0], [0], [1], [0, 0, 1, 1], [], []>} : vector<8x32xbf16>, vector<32x8xbf16>, vector<8x8xf32> -> vector<8x8xf32>
    %139 = vector.shape_cast %138 : vector<8x8xf32> to vector<2x4x8xf32>
    "tpu.trace_start"() <{level = 10 : i32, message = "bqd,bkd->bqk"}> : () -> ()
    %cst_100 = arith.constant dense<0.000000e+00> : vector<2x4x4xf32>
    %140 = tpu.matmul %131, %135, %cst_100 {dimension_numbers = #tpu.dot_dimension_numbers<[2], [2], [1], [1], [0, 0, 0, 1, 1, 1], [0], [0]>} : vector<2x4x8xf32>, vector<2x4x8xf32>, vector<2x4x4xf32> -> vector<2x4x4xf32>
    "tpu.trace_stop"() : () -> ()
    %cst_101 = arith.constant 0.353553385 : f32
    %141 = vector.broadcast %cst_101 : f32 to vector<2x4x4xf32>
    %142 = arith.mulf %140, %141 : vector<2x4x4xf32>
    %cst_102 = arith.constant dense<0xFF800000> : vector<2x4xf32>
    %143 = vector.multi_reduction <maximumf>, %142, %cst_102 [2] : vector<2x4x4xf32> to vector<2x4xf32>
    %144 = vector.shape_cast %143 : vector<2x4xf32> to vector<2x4x1xf32>
    %145 = vector.broadcast %144 : vector<2x4x1xf32> to vector<2x4x4xf32>
    %146 = arith.subf %142, %145 : vector<2x4x4xf32>
    %147 = math.exp %146 : vector<2x4x4xf32>
    %cst_103 = arith.constant dense<0.000000e+00> : vector<2x4xf32>
    %148 = vector.multi_reduction <add>, %147, %cst_103 [2] : vector<2x4x4xf32> to vector<2x4xf32>
    %149 = vector.shape_cast %148 : vector<2x4xf32> to vector<2x4x1xf32>
    %150 = tpu.reciprocal %149 {approx = true} : vector<2x4x1xf32> -> vector<2x4x1xf32>
    %151 = vector.broadcast %150 : vector<2x4x1xf32> to vector<2x4x4xf32>
    %152 = arith.mulf %147, %151 : vector<2x4x4xf32>
    "tpu.trace_start"() <{level = 10 : i32, message = "bqk,bkd->bqd"}> : () -> ()
    %cst_104 = arith.constant dense<0.000000e+00> : vector<2x4x8xf32>
    %153 = tpu.matmul %152, %139, %cst_104 {dimension_numbers = #tpu.dot_dimension_numbers<[2], [1], [1], [2], [0, 0, 0, 1, 1, 2], [0], [0]>} : vector<2x4x4xf32>, vector<2x4x8xf32>, vector<2x4x8xf32> -> vector<2x4x8xf32>
    "tpu.trace_stop"() : () -> ()
    %154 = vector.shape_cast %153 : vector<2x4x8xf32> to vector<8x8xf32>
    %155 = arith.truncf %154 : vector<8x8xf32> to vector<8x8xbf16>
    %c0_105 = arith.constant 0 : index
    %c3_106 = arith.constant 3 : index
    %c0_107 = arith.constant 0 : index
    %c0_108 = arith.constant 0 : index
    %156 = vector.load %arg7[%c0_105, %c3_106, %c0_107, %c0_108] : memref<1x4x8x32xbf16, #tpu.memory_space<vmem>>, vector<1x1x8x32xbf16>
    %157 = vector.shape_cast %156 : vector<1x1x8x32xbf16> to vector<8x32xbf16>
    %cst_109 = arith.constant dense<0.000000e+00> : vector<8x32xf32>
    %158 = tpu.matmul %155, %157, %cst_109 {dimension_numbers = #tpu.dot_dimension_numbers<[1], [0], [0], [1], [0, 0, 1, 1], [], []>} : vector<8x8xbf16>, vector<8x32xbf16>, vector<8x32xf32> -> vector<8x32xf32>
    %159 = arith.addf %127, %158 : vector<8x32xf32>
    %160 = arith.addf %3, %159 : vector<8x32xf32>
    %c0_110 = arith.constant 0 : index
    %c0_111 = arith.constant 0 : index
    %c0_112 = arith.constant 0 : index
    %161 = vector.load %arg8[%c0_110, %c0_111, %c0_112] : memref<1x1x32xf32, #tpu.memory_space<vmem>>, vector<1x1x32xf32>
    %162 = vector.shape_cast %161 : vector<1x1x32xf32> to vector<1x32xf32>
    %163 = vector.broadcast %162 : vector<1x32xf32> to vector<8x32xf32>
    %164 = arith.addf %160, %163 : vector<8x32xf32>
    %c0_113 = arith.constant 0 : index
    %c0_114 = arith.constant 0 : index
    %c0_115 = arith.constant 0 : index
    %165 = vector.load %arg9[%c0_113, %c0_114, %c0_115] : memref<1x1x32xf32, #tpu.memory_space<vmem>>, vector<1x1x32xf32>
    %166 = vector.shape_cast %165 : vector<1x1x32xf32> to vector<1x32xf32>
    %c0_116 = arith.constant 0 : index
    %c0_117 = arith.constant 0 : index
    %c0_118 = arith.constant 0 : index
    %167 = vector.load %arg10[%c0_116, %c0_117, %c0_118] : memref<1x1x32xf32, #tpu.memory_space<vmem>>, vector<1x1x32xf32>
    %168 = vector.shape_cast %167 : vector<1x1x32xf32> to vector<1x32xf32>
    %cst_119 = arith.constant dense<0.000000e+00> : vector<8xf32>
    %169 = vector.multi_reduction <add>, %164, %cst_119 [1] : vector<8x32xf32> to vector<8xf32>
    %170 = vector.shape_cast %169 : vector<8xf32> to vector<8x1xf32>
    %cst_120 = arith.constant 3.200000e+01 : f32
    %171 = vector.broadcast %cst_120 : f32 to vector<8x1xf32>
    %172 = arith.divf %170, %171 : vector<8x1xf32>
    %173 = vector.broadcast %172 : vector<8x1xf32> to vector<8x32xf32>
    %174 = arith.subf %164, %173 : vector<8x32xf32>
    %175 = arith.mulf %174, %174 : vector<8x32xf32>
    %cst_121 = arith.constant dense<0.000000e+00> : vector<8xf32>
    %176 = vector.multi_reduction <add>, %175, %cst_121 [1] : vector<8x32xf32> to vector<8xf32>
    %177 = vector.shape_cast %176 : vector<8xf32> to vector<8x1xf32>
    %cst_122 = arith.constant 3.200000e+01 : f32
    %178 = vector.broadcast %cst_122 : f32 to vector<8x1xf32>
    %179 = arith.divf %177, %178 : vector<8x1xf32>
    %180 = vector.broadcast %172 : vector<8x1xf32> to vector<8x32xf32>
    %181 = arith.subf %164, %180 : vector<8x32xf32>
    %cst_123 = arith.constant 9.99999974E-6 : f32
    %182 = vector.broadcast %cst_123 : f32 to vector<8x1xf32>
    %183 = arith.addf %179, %182 : vector<8x1xf32>
    %184 = math.rsqrt %183 : vector<8x1xf32>
    %185 = vector.broadcast %184 : vector<8x1xf32> to vector<8x32xf32>
    %186 = arith.mulf %181, %185 : vector<8x32xf32>
    %187 = vector.broadcast %166 : vector<1x32xf32> to vector<8x32xf32>
    %188 = arith.mulf %186, %187 : vector<8x32xf32>
    %189 = vector.broadcast %168 : vector<1x32xf32> to vector<8x32xf32>
    %190 = arith.addf %188, %189 : vector<8x32xf32>
    %191 = arith.truncf %190 : vector<8x32xf32> to vector<8x32xbf16>
    %c0_124 = arith.constant 0 : index
    %c0_125 = arith.constant 0 : index
    %c0_126 = arith.constant 0 : index
    %192 = vector.load %arg11[%c0_124, %c0_125, %c0_126] : memref<1x32x64xbf16, #tpu.memory_space<vmem>>, vector<1x32x64xbf16>
    %193 = vector.shape_cast %192 : vector<1x32x64xbf16> to vector<32x64xbf16>
    %cst_127 = arith.constant dense<0.000000e+00> : vector<8x64xf32>
    %194 = tpu.matmul %191, %193, %cst_127 {dimension_numbers = #tpu.dot_dimension_numbers<[1], [0], [0], [1], [0, 0, 1, 1], [], []>} : vector<8x32xbf16>, vector<32x64xbf16>, vector<8x64xf32> -> vector<8x64xf32>
    %c0_128 = arith.constant 0 : index
    %c0_129 = arith.constant 0 : index
    %c0_130 = arith.constant 0 : index
    %195 = vector.load %arg12[%c0_128, %c0_129, %c0_130] : memref<1x1x64xf32, #tpu.memory_space<vmem>>, vector<1x1x64xf32>
    %196 = vector.shape_cast %195 : vector<1x1x64xf32> to vector<1x64xf32>
    %197 = vector.broadcast %196 : vector<1x64xf32> to vector<8x64xf32>
    %198 = arith.addf %194, %197 : vector<8x64xf32>
    %199 = arith.mulf %198, %198 : vector<8x64xf32>
    %200 = arith.mulf %198, %199 : vector<8x64xf32>
    %cst_131 = arith.constant 4.471500e-02 : f32
    %201 = vector.broadcast %cst_131 : f32 to vector<8x64xf32>
    %202 = arith.mulf %201, %200 : vector<8x64xf32>
    %203 = arith.addf %198, %202 : vector<8x64xf32>
    %cst_132 = arith.constant 0.797884583 : f32
    %204 = vector.broadcast %cst_132 : f32 to vector<8x64xf32>
    %205 = arith.mulf %204, %203 : vector<8x64xf32>
    %206 = math.tanh %205 : vector<8x64xf32>
    %cst_133 = arith.constant 1.000000e+00 : f32
    %207 = vector.broadcast %cst_133 : f32 to vector<8x64xf32>
    %208 = arith.addf %207, %206 : vector<8x64xf32>
    %cst_134 = arith.constant 5.000000e-01 : f32
    %209 = vector.broadcast %cst_134 : f32 to vector<8x64xf32>
    %210 = arith.mulf %209, %208 : vector<8x64xf32>
    %211 = arith.mulf %198, %210 : vector<8x64xf32>
    %212 = arith.truncf %211 : vector<8x64xf32> to vector<8x64xbf16>
    %c0_135 = arith.constant 0 : index
    %c0_136 = arith.constant 0 : index
    %c0_137 = arith.constant 0 : index
    %213 = vector.load %arg13[%c0_135, %c0_136, %c0_137] : memref<1x64x32xbf16, #tpu.memory_space<vmem>>, vector<1x64x32xbf16>
    %214 = vector.shape_cast %213 : vector<1x64x32xbf16> to vector<64x32xbf16>
    %cst_138 = arith.constant dense<0.000000e+00> : vector<8x32xf32>
    %215 = tpu.matmul %212, %214, %cst_138 {dimension_numbers = #tpu.dot_dimension_numbers<[1], [0], [0], [1], [0, 0, 1, 1], [], []>} : vector<8x64xbf16>, vector<64x32xbf16>, vector<8x32xf32> -> vector<8x32xf32>
    %216 = arith.addf %164, %215 : vector<8x32xf32>
    %c0_139 = arith.constant 0 : index
    %c0_140 = arith.constant 0 : index
    %c0_141 = arith.constant 0 : index
    %217 = vector.load %arg14[%c0_139, %c0_140, %c0_141] : memref<1x1x32xf32, #tpu.memory_space<vmem>>, vector<1x1x32xf32>
    %218 = vector.shape_cast %217 : vector<1x1x32xf32> to vector<1x32xf32>
    %219 = vector.broadcast %218 : vector<1x32xf32> to vector<8x32xf32>
    %220 = arith.addf %216, %219 : vector<8x32xf32>
    %c0_142 = arith.constant 0 : index
    %c0_143 = arith.constant 0 : index
    %221 = vector.load %arg15[%c0_142, %c0_143] : memref<8x32xf32, #tpu.memory_space<vmem>>, vector<8x32xf32>
    tpu.vector_store %arg15[%c0_142, %c0_143], %220 {strides = array<i32>} : memref<8x32xf32, #tpu.memory_space<vmem>>, vector<8x32xf32>,
    return
  }
  func.func @transform_0(%arg0: i32) -> (i32, i32) {
    %c0_i32 = arith.constant 0 : i32
    %c0_i32_0 = arith.constant 0 : i32
    %c0_i32_1 = arith.constant 0 : i32
    return %c0_i32, %c0_i32_0 : i32, i32
  }
  func.func @transform_1(%arg0: i32) -> (i32, i32, i32) {
    %c0_i32 = arith.constant 0 : i32
    %c0_i32_0 = arith.constant 0 : i32
    %c0_i32_1 = arith.constant 0 : i32
    return %arg0, %c0_i32, %c0_i32_0 : i32, i32, i32
  }
  func.func @transform_2(%arg0: i32) -> (i32, i32, i32) {
    %c0_i32 = arith.constant 0 : i32
    %c0_i32_0 = arith.constant 0 : i32
    %c0_i32_1 = arith.constant 0 : i32
    return %arg0, %c0_i32, %c0_i32_0 : i32, i32, i32
  }
  func.func @transform_3(%arg0: i32) -> (i32, i32, i32, i32) {
    %c0_i32 = arith.constant 0 : i32
    %c0_i32_0 = arith.constant 0 : i32
    %c0_i32_1 = arith.constant 0 : i32
    %c0_i32_2 = arith.constant 0 : i32
    return %arg0, %c0_i32, %c0_i32_0, %c0_i32_1 : i32, i32, i32, i32
  }
  func.func @transform_4(%arg0: i32) -> (i32, i32, i32, i32) {
    %c0_i32 = arith.constant 0 : i32
    %c0_i32_0 = arith.constant 0 : i32
    %c0_i32_1 = arith.constant 0 : i32
    %c0_i32_2 = arith.constant 0 : i32
    return %arg0, %c0_i32, %c0_i32_0, %c0_i32_1 : i32, i32, i32, i32
  }
  func.func @transform_5(%arg0: i32) -> (i32, i32, i32, i32) {
    %c0_i32 = arith.constant 0 : i32
    %c0_i32_0 = arith.constant 0 : i32
    %c0_i32_1 = arith.constant 0 : i32
    %c0_i32_2 = arith.constant 0 : i32
    return %arg0, %c0_i32, %c0_i32_0, %c0_i32_1 : i32, i32, i32, i32
  }
  func.func @transform_6(%arg0: i32) -> (i32, i32, i32, i32) {
    %c0_i32 = arith.constant 0 : i32
    %c0_i32_0 = arith.constant 0 : i32
    %c0_i32_1 = arith.constant 0 : i32
    %c0_i32_2 = arith.constant 0 : i32
    return %arg0, %c0_i32, %c0_i32_0, %c0_i32_1 : i32, i32, i32, i32
  }
  func.func @transform_7(%arg0: i32) -> (i32, i32, i32) {
    %c0_i32 = arith.constant 0 : i32
    %c0_i32_0 = arith.constant 0 : i32
    %c0_i32_1 = arith.constant 0 : i32
    return %arg0, %c0_i32, %c0_i32_0 : i32, i32, i32
  }
  func.func @transform_8(%arg0: i32) -> (i32, i32, i32) {
    %c0_i32 = arith.constant 0 : i32
    %c0_i32_0 = arith.constant 0 : i32
    %c0_i32_1 = arith.constant 0 : i32
    return %arg0, %c0_i32, %c0_i32_0 : i32, i32, i32
  }
  func.func @transform_9(%arg0: i32) -> (i32, i32, i32) {
    %c0_i32 = arith.constant 0 : i32
    %c0_i32_0 = arith.constant 0 : i32
    %c0_i32_1 = arith.constant 0 : i32
    return %arg0, %c0_i32, %c0_i32_0 : i32, i32, i32
  }
  func.func @transform_10(%arg0: i32) -> (i32, i32, i32) {
    %c0_i32 = arith.constant 0 : i32
    %c0_i32_0 = arith.constant 0 : i32
    %c0_i32_1 = arith.constant 0 : i32
    return %arg0, %c0_i32, %c0_i32_0 : i32, i32, i32
  }
  func.func @transform_11(%arg0: i32) -> (i32, i32, i32) {
    %c0_i32 = arith.constant 0 : i32
    %c0_i32_0 = arith.constant 0 : i32
    %c0_i32_1 = arith.constant 0 : i32
    return %arg0, %c0_i32, %c0_i32_0 : i32, i32, i32
  }
  func.func @transform_12(%arg0: i32) -> (i32, i32, i32) {
    %c0_i32 = arith.constant 0 : i32
    %c0_i32_0 = arith.constant 0 : i32
    %c0_i32_1 = arith.constant 0 : i32
    return %arg0, %c0_i32, %c0_i32_0 : i32, i32, i32
  }
  func.func @transform_13(%arg0: i32) -> (i32, i32, i32) {
    %c0_i32 = arith.constant 0 : i32
    %c0_i32_0 = arith.constant 0 : i32
    %c0_i32_1 = arith.constant 0 : i32
    return %arg0, %c0_i32, %c0_i32_0 : i32, i32, i32
  }
  func.func @transform_14(%arg0: i32) -> (i32, i32) {
    %c0_i32 = arith.constant 0 : i32
    %c0_i32_0 = arith.constant 0 : i32
    %c0_i32_1 = arith.constant 0 : i32
    return %c0_i32, %c0_i32_0 : i32, i32
  }
}

module attributes {stable_mosaic.version = 11 : i64} {
  func.func @_ln_linear_add_kernel(%arg0: i32, %arg1: memref<8x32xf32, #tpu.memory_space<vmem>>, %arg2: memref<1x32xf32, #tpu.memory_space<vmem>>, %arg3: memref<1x32xf32, #tpu.memory_space<vmem>>, %arg4: memref<32x48xbf16, #tpu.memory_space<vmem>>, %arg5: memref<1x48xf32, #tpu.memory_space<vmem>>, %arg6: memref<8x48xf32, #tpu.memory_space<vmem>>, %arg7: memref<8x48xf32, #tpu.memory_space<vmem>>) attributes {dimension_semantics = [#tpu.dimension_semantics<arbitrary>], iteration_bounds = array<i64: 1>, scalar_prefetch = 0 : i64, scratch_operands = 0 : i64, tpu.core_type = #tpu.core_type<tc>, window_params = [{pipeline_mode = #tpu.pipeline_mode<synchronous>, transform_indices = @transform_0, window_bounds = array<i64: 8, 32>}, {pipeline_mode = #tpu.pipeline_mode<synchronous>, transform_indices = @transform_1, window_bounds = array<i64: 1, 32>}, {pipeline_mode = #tpu.pipeline_mode<synchronous>, transform_indices = @transform_2, window_bounds = array<i64: 1, 32>}, {pipeline_mode = #tpu.pipeline_mode<synchronous>, transform_indices = @transform_3, window_bounds = array<i64: 32, 48>}, {pipeline_mode = #tpu.pipeline_mode<synchronous>, transform_indices = @transform_4, window_bounds = array<i64: 1, 48>}, {pipeline_mode = #tpu.pipeline_mode<synchronous>, transform_indices = @transform_5, window_bounds = array<i64: 8, 48>}, {pipeline_mode = #tpu.pipeline_mode<synchronous>, transform_indices = @transform_6, window_bounds = array<i64: 8, 48>}]} {
    %c0 = arith.constant 0 : index
    %c0_0 = arith.constant 0 : index
    %0 = vector.load %arg1[%c0, %c0_0] : memref<8x32xf32, #tpu.memory_space<vmem>>, vector<8x32xf32>
    %c0_1 = arith.constant 0 : index
    %c0_2 = arith.constant 0 : index
    %1 = vector.load %arg2[%c0_1, %c0_2] : memref<1x32xf32, #tpu.memory_space<vmem>>, vector<1x32xf32>
    %c0_3 = arith.constant 0 : index
    %c0_4 = arith.constant 0 : index
    %2 = vector.load %arg3[%c0_3, %c0_4] : memref<1x32xf32, #tpu.memory_space<vmem>>, vector<1x32xf32>
    %cst = arith.constant dense<0.000000e+00> : vector<8xf32>
    %3 = vector.multi_reduction <add>, %0, %cst [1] : vector<8x32xf32> to vector<8xf32>
    %4 = vector.shape_cast %3 : vector<8xf32> to vector<8x1xf32>
    %cst_5 = arith.constant 3.200000e+01 : f32
    %5 = vector.broadcast %cst_5 : f32 to vector<8x1xf32>
    %6 = arith.divf %4, %5 : vector<8x1xf32>
    %7 = vector.broadcast %6 : vector<8x1xf32> to vector<8x32xf32>
    %8 = arith.subf %0, %7 : vector<8x32xf32>
    %9 = arith.mulf %8, %8 : vector<8x32xf32>
    %cst_6 = arith.constant dense<0.000000e+00> : vector<8xf32>
    %10 = vector.multi_reduction <add>, %9, %cst_6 [1] : vector<8x32xf32> to vector<8xf32>
    %11 = vector.shape_cast %10 : vector<8xf32> to vector<8x1xf32>
    %cst_7 = arith.constant 3.200000e+01 : f32
    %12 = vector.broadcast %cst_7 : f32 to vector<8x1xf32>
    %13 = arith.divf %11, %12 : vector<8x1xf32>
    %14 = vector.broadcast %6 : vector<8x1xf32> to vector<8x32xf32>
    %15 = arith.subf %0, %14 : vector<8x32xf32>
    %cst_8 = arith.constant 9.99999974E-6 : f32
    %16 = vector.broadcast %cst_8 : f32 to vector<8x1xf32>
    %17 = arith.addf %13, %16 : vector<8x1xf32>
    %18 = math.rsqrt %17 : vector<8x1xf32>
    %19 = vector.broadcast %18 : vector<8x1xf32> to vector<8x32xf32>
    %20 = arith.mulf %15, %19 : vector<8x32xf32>
    %21 = vector.broadcast %1 : vector<1x32xf32> to vector<8x32xf32>
    %22 = arith.mulf %20, %21 : vector<8x32xf32>
    %23 = vector.broadcast %2 : vector<1x32xf32> to vector<8x32xf32>
    %24 = arith.addf %22, %23 : vector<8x32xf32>
    %25 = arith.truncf %24 : vector<8x32xf32> to vector<8x32xbf16>
    %c0_9 = arith.constant 0 : index
    %c0_10 = arith.constant 0 : index
    %26 = vector.load %arg4[%c0_9, %c0_10] : memref<32x48xbf16, #tpu.memory_space<vmem>>, vector<32x48xbf16>
    %cst_11 = arith.constant dense<0.000000e+00> : vector<8x48xf32>
    %27 = tpu.matmul %25, %26, %cst_11 {dimension_numbers = #tpu.dot_dimension_numbers<[1], [0], [0], [1], [0, 0, 1, 1], [], []>} : vector<8x32xbf16>, vector<32x48xbf16>, vector<8x48xf32> -> vector<8x48xf32>
    %c0_12 = arith.constant 0 : index
    %c0_13 = arith.constant 0 : index
    %28 = vector.load %arg5[%c0_12, %c0_13] : memref<1x48xf32, #tpu.memory_space<vmem>>, vector<1x48xf32>
    %29 = vector.broadcast %28 : vector<1x48xf32> to vector<8x48xf32>
    %30 = arith.addf %27, %29 : vector<8x48xf32>
    %c0_14 = arith.constant 0 : index
    %c0_15 = arith.constant 0 : index
    %31 = vector.load %arg6[%c0_14, %c0_15] : memref<8x48xf32, #tpu.memory_space<vmem>>, vector<8x48xf32>
    %32 = arith.addf %30, %31 : vector<8x48xf32>
    %c0_16 = arith.constant 0 : index
    %c0_17 = arith.constant 0 : index
    %33 = vector.load %arg7[%c0_16, %c0_17] : memref<8x48xf32, #tpu.memory_space<vmem>>, vector<8x48xf32>
    tpu.vector_store %arg7[%c0_16, %c0_17], %32 {strides = array<i32>} : memref<8x48xf32, #tpu.memory_space<vmem>>, vector<8x48xf32>,
    return
  }
  func.func @transform_0(%arg0: i32) -> (i32, i32) {
    %c0_i32 = arith.constant 0 : i32
    %c0_i32_0 = arith.constant 0 : i32
    %c0_i32_1 = arith.constant 0 : i32
    return %c0_i32, %c0_i32_0 : i32, i32
  }
  func.func @transform_1(%arg0: i32) -> (i32, i32) {
    %c0_i32 = arith.constant 0 : i32
    %c0_i32_0 = arith.constant 0 : i32
    %c0_i32_1 = arith.constant 0 : i32
    return %c0_i32, %c0_i32_0 : i32, i32
  }
  func.func @transform_2(%arg0: i32) -> (i32, i32) {
    %c0_i32 = arith.constant 0 : i32
    %c0_i32_0 = arith.constant 0 : i32
    %c0_i32_1 = arith.constant 0 : i32
    return %c0_i32, %c0_i32_0 : i32, i32
  }
  func.func @transform_3(%arg0: i32) -> (i32, i32) {
    %c0_i32 = arith.constant 0 : i32
    %c0_i32_0 = arith.constant 0 : i32
    %c0_i32_1 = arith.constant 0 : i32
    return %c0_i32, %c0_i32_0 : i32, i32
  }
  func.func @transform_4(%arg0: i32) -> (i32, i32) {
    %c0_i32 = arith.constant 0 : i32
    %c0_i32_0 = arith.constant 0 : i32
    %c0_i32_1 = arith.constant 0 : i32
    return %c0_i32, %c0_i32_0 : i32, i32
  }
  func.func @transform_5(%arg0: i32) -> (i32, i32) {
    %c0_i32 = arith.constant 0 : i32
    %c0_i32_0 = arith.constant 0 : i32
    %c0_i32_1 = arith.constant 0 : i32
    return %c0_i32, %c0_i32_0 : i32, i32
  }
  func.func @transform_6(%arg0: i32) -> (i32, i32) {
    %c0_i32 = arith.constant 0 : i32
    %c0_i32_0 = arith.constant 0 : i32
    %c0_i32_1 = arith.constant 0 : i32
    return %c0_i32, %c0_i32_0 : i32, i32
  }
}

module attributes {stable_mosaic.version = 11 : i64} {
  func.func @_transformer_stack_kernel(%arg0: i32, %arg1: memref<32x48xf32, #tpu.memory_space<vmem>>, %arg2: memref<1x1x48xf32, #tpu.memory_space<vmem>>, %arg3: memref<1x1x48xf32, #tpu.memory_space<vmem>>, %arg4: memref<1x4x48x16xbf16, #tpu.memory_space<vmem>>, %arg5: memref<1x4x48x16xbf16, #tpu.memory_space<vmem>>, %arg6: memref<1x4x48x16xbf16, #tpu.memory_space<vmem>>, %arg7: memref<1x4x16x48xbf16, #tpu.memory_space<vmem>>, %arg8: memref<1x1x48xf32, #tpu.memory_space<vmem>>, %arg9: memref<1x1x48xf32, #tpu.memory_space<vmem>>, %arg10: memref<1x1x48xf32, #tpu.memory_space<vmem>>, %arg11: memref<1x48x192xbf16, #tpu.memory_space<vmem>>, %arg12: memref<1x1x192xf32, #tpu.memory_space<vmem>>, %arg13: memref<1x192x48xbf16, #tpu.memory_space<vmem>>, %arg14: memref<1x1x48xf32, #tpu.memory_space<vmem>>, %arg15: memref<32x48xf32, #tpu.memory_space<vmem>>) attributes {dimension_semantics = [#tpu.dimension_semantics<arbitrary>], iteration_bounds = array<i64: 1>, scalar_prefetch = 0 : i64, scratch_operands = 0 : i64, tpu.core_type = #tpu.core_type<tc>, window_params = [{pipeline_mode = #tpu.pipeline_mode<synchronous>, transform_indices = @transform_0, window_bounds = array<i64: 32, 48>}, {transform_indices = @transform_1, window_bounds = array<i64: 1, 1, 48>}, {transform_indices = @transform_2, window_bounds = array<i64: 1, 1, 48>}, {transform_indices = @transform_3, window_bounds = array<i64: 1, 4, 48, 16>}, {transform_indices = @transform_4, window_bounds = array<i64: 1, 4, 48, 16>}, {transform_indices = @transform_5, window_bounds = array<i64: 1, 4, 48, 16>}, {transform_indices = @transform_6, window_bounds = array<i64: 1, 4, 16, 48>}, {transform_indices = @transform_7, window_bounds = array<i64: 1, 1, 48>}, {transform_indices = @transform_8, window_bounds = array<i64: 1, 1, 48>}, {transform_indices = @transform_9, window_bounds = array<i64: 1, 1, 48>}, {transform_indices = @transform_10, window_bounds = array<i64: 1, 48, 192>}, {transform_indices = @transform_11, window_bounds = array<i64: 1, 1, 192>}, {transform_indices = @transform_12, window_bounds = array<i64: 1, 192, 48>}, {transform_indices = @transform_13, window_bounds = array<i64: 1, 1, 48>}, {pipeline_mode = #tpu.pipeline_mode<synchronous>, transform_indices = @transform_14, window_bounds = array<i64: 32, 48>}]} {
    %c0_i32 = arith.constant 0 : i32
    %0 = arith.cmpi eq, %arg0, %c0_i32 : i32
    %1 = arith.extui %0 : i1 to i32
    %c0_i32_0 = arith.constant 0 : i32
    %2 = arith.cmpi ne, %1, %c0_i32_0 : i32
    scf.if %2 {
      %c0_144 = arith.constant 0 : index
      %c0_145 = arith.constant 0 : index
      %222 = vector.load %arg1[%c0_144, %c0_145] : memref<32x48xf32, #tpu.memory_space<vmem>>, vector<32x48xf32>
      %c0_146 = arith.constant 0 : index
      %c0_147 = arith.constant 0 : index
      %223 = vector.load %arg15[%c0_146, %c0_147] : memref<32x48xf32, #tpu.memory_space<vmem>>, vector<32x48xf32>
      tpu.vector_store %arg15[%c0_146, %c0_147], %222 {strides = array<i32>} : memref<32x48xf32, #tpu.memory_space<vmem>>, vector<32x48xf32>,
    } else {
    }
    %c0 = arith.constant 0 : index
    %c0_1 = arith.constant 0 : index
    %3 = vector.load %arg15[%c0, %c0_1] : memref<32x48xf32, #tpu.memory_space<vmem>>, vector<32x48xf32>
    %c0_2 = arith.constant 0 : index
    %c0_3 = arith.constant 0 : index
    %c0_4 = arith.constant 0 : index
    %4 = vector.load %arg2[%c0_2, %c0_3, %c0_4] : memref<1x1x48xf32, #tpu.memory_space<vmem>>, vector<1x1x48xf32>
    %5 = vector.shape_cast %4 : vector<1x1x48xf32> to vector<1x48xf32>
    %c0_5 = arith.constant 0 : index
    %c0_6 = arith.constant 0 : index
    %c0_7 = arith.constant 0 : index
    %6 = vector.load %arg3[%c0_5, %c0_6, %c0_7] : memref<1x1x48xf32, #tpu.memory_space<vmem>>, vector<1x1x48xf32>
    %7 = vector.shape_cast %6 : vector<1x1x48xf32> to vector<1x48xf32>
    %cst = arith.constant dense<0.000000e+00> : vector<32xf32>
    %8 = vector.multi_reduction <add>, %3, %cst [1] : vector<32x48xf32> to vector<32xf32>
    %9 = vector.shape_cast %8 : vector<32xf32> to vector<32x1xf32>
    %cst_8 = arith.constant 4.800000e+01 : f32
    %10 = vector.broadcast %cst_8 : f32 to vector<32x1xf32>
    %11 = arith.divf %9, %10 : vector<32x1xf32>
    %12 = vector.broadcast %11 : vector<32x1xf32> to vector<32x48xf32>
    %13 = arith.subf %3, %12 : vector<32x48xf32>
    %14 = arith.mulf %13, %13 : vector<32x48xf32>
    %cst_9 = arith.constant dense<0.000000e+00> : vector<32xf32>
    %15 = vector.multi_reduction <add>, %14, %cst_9 [1] : vector<32x48xf32> to vector<32xf32>
    %16 = vector.shape_cast %15 : vector<32xf32> to vector<32x1xf32>
    %cst_10 = arith.constant 4.800000e+01 : f32
    %17 = vector.broadcast %cst_10 : f32 to vector<32x1xf32>
    %18 = arith.divf %16, %17 : vector<32x1xf32>
    %19 = vector.broadcast %11 : vector<32x1xf32> to vector<32x48xf32>
    %20 = arith.subf %3, %19 : vector<32x48xf32>
    %cst_11 = arith.constant 9.99999974E-6 : f32
    %21 = vector.broadcast %cst_11 : f32 to vector<32x1xf32>
    %22 = arith.addf %18, %21 : vector<32x1xf32>
    %23 = math.rsqrt %22 : vector<32x1xf32>
    %24 = vector.broadcast %23 : vector<32x1xf32> to vector<32x48xf32>
    %25 = arith.mulf %20, %24 : vector<32x48xf32>
    %26 = vector.broadcast %5 : vector<1x48xf32> to vector<32x48xf32>
    %27 = arith.mulf %25, %26 : vector<32x48xf32>
    %28 = vector.broadcast %7 : vector<1x48xf32> to vector<32x48xf32>
    %29 = arith.addf %27, %28 : vector<32x48xf32>
    %30 = arith.truncf %29 : vector<32x48xf32> to vector<32x48xbf16>
    %cst_12 = arith.constant 0.000000e+00 : f32
    %31 = vector.broadcast %cst_12 : f32 to vector<32x48xf32>
    %c0_13 = arith.constant 0 : index
    %c0_14 = arith.constant 0 : index
    %c0_15 = arith.constant 0 : index
    %c0_16 = arith.constant 0 : index
    %32 = vector.load %arg4[%c0_13, %c0_14, %c0_15, %c0_16] : memref<1x4x48x16xbf16, #tpu.memory_space<vmem>>, vector<1x1x48x16xbf16>
    %33 = vector.shape_cast %32 : vector<1x1x48x16xbf16> to vector<48x16xbf16>
    %cst_17 = arith.constant dense<0.000000e+00> : vector<32x16xf32>
    %34 = tpu.matmul %30, %33, %cst_17 {dimension_numbers = #tpu.dot_dimension_numbers<[1], [0], [0], [1], [0, 0, 1, 1], [], []>} : vector<32x48xbf16>, vector<48x16xbf16>, vector<32x16xf32> -> vector<32x16xf32>
    %35 = vector.shape_cast %34 : vector<32x16xf32> to vector<2x16x16xf32>
    %c0_18 = arith.constant 0 : index
    %c0_19 = arith.constant 0 : index
    %c0_20 = arith.constant 0 : index
    %c0_21 = arith.constant 0 : index
    %36 = vector.load %arg5[%c0_18, %c0_19, %c0_20, %c0_21] : memref<1x4x48x16xbf16, #tpu.memory_space<vmem>>, vector<1x1x48x16xbf16>
    %37 = vector.shape_cast %36 : vector<1x1x48x16xbf16> to vector<48x16xbf16>
    %cst_22 = arith.constant dense<0.000000e+00> : vector<32x16xf32>
    %38 = tpu.matmul %30, %37, %cst_22 {dimension_numbers = #tpu.dot_dimension_numbers<[1], [0], [0], [1], [0, 0, 1, 1], [], []>} : vector<32x48xbf16>, vector<48x16xbf16>, vector<32x16xf32> -> vector<32x16xf32>
    %39 = vector.shape_cast %38 : vector<32x16xf32> to vector<2x16x16xf32>
    %c0_23 = arith.constant 0 : index
    %c0_24 = arith.constant 0 : index
    %c0_25 = arith.constant 0 : index
    %c0_26 = arith.constant 0 : index
    %40 = vector.load %arg6[%c0_23, %c0_24, %c0_25, %c0_26] : memref<1x4x48x16xbf16, #tpu.memory_space<vmem>>, vector<1x1x48x16xbf16>
    %41 = vector.shape_cast %40 : vector<1x1x48x16xbf16> to vector<48x16xbf16>
    %cst_27 = arith.constant dense<0.000000e+00> : vector<32x16xf32>
    %42 = tpu.matmul %30, %41, %cst_27 {dimension_numbers = #tpu.dot_dimension_numbers<[1], [0], [0], [1], [0, 0, 1, 1], [], []>} : vector<32x48xbf16>, vector<48x16xbf16>, vector<32x16xf32> -> vector<32x16xf32>
    %43 = vector.shape_cast %42 : vector<32x16xf32> to vector<2x16x16xf32>
    "tpu.trace_start"() <{level = 10 : i32, message = "bqd,bkd->bqk"}> : () -> ()
    %cst_28 = arith.constant dense<0.000000e+00> : vector<2x16x16xf32>
    %44 = tpu.matmul %35, %39, %cst_28 {dimension_numbers = #tpu.dot_dimension_numbers<[2], [2], [1], [1], [0, 0, 0, 1, 1, 1], [0], [0]>} : vector<2x16x16xf32>, vector<2x16x16xf32>, vector<2x16x16xf32> -> vector<2x16x16xf32>
    "tpu.trace_stop"() : () -> ()
    %cst_29 = arith.constant 2.500000e-01 : f32
    %45 = vector.broadcast %cst_29 : f32 to vector<2x16x16xf32>
    %46 = arith.mulf %44, %45 : vector<2x16x16xf32>
    %cst_30 = arith.constant dense<0xFF800000> : vector<2x16xf32>
    %47 = vector.multi_reduction <maximumf>, %46, %cst_30 [2] : vector<2x16x16xf32> to vector<2x16xf32>
    %48 = vector.shape_cast %47 : vector<2x16xf32> to vector<2x16x1xf32>
    %49 = vector.broadcast %48 : vector<2x16x1xf32> to vector<2x16x16xf32>
    %50 = arith.subf %46, %49 : vector<2x16x16xf32>
    %51 = math.exp %50 : vector<2x16x16xf32>
    %cst_31 = arith.constant dense<0.000000e+00> : vector<2x16xf32>
    %52 = vector.multi_reduction <add>, %51, %cst_31 [2] : vector<2x16x16xf32> to vector<2x16xf32>
    %53 = vector.shape_cast %52 : vector<2x16xf32> to vector<2x16x1xf32>
    %54 = tpu.reciprocal %53 {approx = true} : vector<2x16x1xf32> -> vector<2x16x1xf32>
    %55 = vector.broadcast %54 : vector<2x16x1xf32> to vector<2x16x16xf32>
    %56 = arith.mulf %51, %55 : vector<2x16x16xf32>
    "tpu.trace_start"() <{level = 10 : i32, message = "bqk,bkd->bqd"}> : () -> ()
    %cst_32 = arith.constant dense<0.000000e+00> : vector<2x16x16xf32>
    %57 = tpu.matmul %56, %43, %cst_32 {dimension_numbers = #tpu.dot_dimension_numbers<[2], [1], [1], [2], [0, 0, 0, 1, 1, 2], [0], [0]>} : vector<2x16x16xf32>, vector<2x16x16xf32>, vector<2x16x16xf32> -> vector<2x16x16xf32>
    "tpu.trace_stop"() : () -> ()
    %58 = vector.shape_cast %57 : vector<2x16x16xf32> to vector<32x16xf32>
    %59 = arith.truncf %58 : vector<32x16xf32> to vector<32x16xbf16>
    %c0_33 = arith.constant 0 : index
    %c0_34 = arith.constant 0 : index
    %c0_35 = arith.constant 0 : index
    %c0_36 = arith.constant 0 : index
    %60 = vector.load %arg7[%c0_33, %c0_34, %c0_35, %c0_36] : memref<1x4x16x48xbf16, #tpu.memory_space<vmem>>, vector<1x1x16x48xbf16>
    %61 = vector.shape_cast %60 : vector<1x1x16x48xbf16> to vector<16x48xbf16>
    %cst_37 = arith.constant dense<0.000000e+00> : vector<32x48xf32>
    %62 = tpu.matmul %59, %61, %cst_37 {dimension_numbers = #tpu.dot_dimension_numbers<[1], [0], [0], [1], [0, 0, 1, 1], [], []>} : vector<32x16xbf16>, vector<16x48xbf16>, vector<32x48xf32> -> vector<32x48xf32>
    %63 = arith.addf %31, %62 : vector<32x48xf32>
    %c0_38 = arith.constant 0 : index
    %c1 = arith.constant 1 : index
    %c0_39 = arith.constant 0 : index
    %c0_40 = arith.constant 0 : index
    %64 = vector.load %arg4[%c0_38, %c1, %c0_39, %c0_40] : memref<1x4x48x16xbf16, #tpu.memory_space<vmem>>, vector<1x1x48x16xbf16>
    %65 = vector.shape_cast %64 : vector<1x1x48x16xbf16> to vector<48x16xbf16>
    %cst_41 = arith.constant dense<0.000000e+00> : vector<32x16xf32>
    %66 = tpu.matmul %30, %65, %cst_41 {dimension_numbers = #tpu.dot_dimension_numbers<[1], [0], [0], [1], [0, 0, 1, 1], [], []>} : vector<32x48xbf16>, vector<48x16xbf16>, vector<32x16xf32> -> vector<32x16xf32>
    %67 = vector.shape_cast %66 : vector<32x16xf32> to vector<2x16x16xf32>
    %c0_42 = arith.constant 0 : index
    %c1_43 = arith.constant 1 : index
    %c0_44 = arith.constant 0 : index
    %c0_45 = arith.constant 0 : index
    %68 = vector.load %arg5[%c0_42, %c1_43, %c0_44, %c0_45] : memref<1x4x48x16xbf16, #tpu.memory_space<vmem>>, vector<1x1x48x16xbf16>
    %69 = vector.shape_cast %68 : vector<1x1x48x16xbf16> to vector<48x16xbf16>
    %cst_46 = arith.constant dense<0.000000e+00> : vector<32x16xf32>
    %70 = tpu.matmul %30, %69, %cst_46 {dimension_numbers = #tpu.dot_dimension_numbers<[1], [0], [0], [1], [0, 0, 1, 1], [], []>} : vector<32x48xbf16>, vector<48x16xbf16>, vector<32x16xf32> -> vector<32x16xf32>
    %71 = vector.shape_cast %70 : vector<32x16xf32> to vector<2x16x16xf32>
    %c0_47 = arith.constant 0 : index
    %c1_48 = arith.constant 1 : index
    %c0_49 = arith.constant 0 : index
    %c0_50 = arith.constant 0 : index
    %72 = vector.load %arg6[%c0_47, %c1_48, %c0_49, %c0_50] : memref<1x4x48x16xbf16, #tpu.memory_space<vmem>>, vector<1x1x48x16xbf16>
    %73 = vector.shape_cast %72 : vector<1x1x48x16xbf16> to vector<48x16xbf16>
    %cst_51 = arith.constant dense<0.000000e+00> : vector<32x16xf32>
    %74 = tpu.matmul %30, %73, %cst_51 {dimension_numbers = #tpu.dot_dimension_numbers<[1], [0], [0], [1], [0, 0, 1, 1], [], []>} : vector<32x48xbf16>, vector<48x16xbf16>, vector<32x16xf32> -> vector<32x16xf32>
    %75 = vector.shape_cast %74 : vector<32x16xf32> to vector<2x16x16xf32>
    "tpu.trace_start"() <{level = 10 : i32, message = "bqd,bkd->bqk"}> : () -> ()
    %cst_52 = arith.constant dense<0.000000e+00> : vector<2x16x16xf32>
    %76 = tpu.matmul %67, %71, %cst_52 {dimension_numbers = #tpu.dot_dimension_numbers<[2], [2], [1], [1], [0, 0, 0, 1, 1, 1], [0], [0]>} : vector<2x16x16xf32>, vector<2x16x16xf32>, vector<2x16x16xf32> -> vector<2x16x16xf32>
    "tpu.trace_stop"() : () -> ()
    %cst_53 = arith.constant 2.500000e-01 : f32
    %77 = vector.broadcast %cst_53 : f32 to vector<2x16x16xf32>
    %78 = arith.mulf %76, %77 : vector<2x16x16xf32>
    %cst_54 = arith.constant dense<0xFF800000> : vector<2x16xf32>
    %79 = vector.multi_reduction <maximumf>, %78, %cst_54 [2] : vector<2x16x16xf32> to vector<2x16xf32>
    %80 = vector.shape_cast %79 : vector<2x16xf32> to vector<2x16x1xf32>
    %81 = vector.broadcast %80 : vector<2x16x1xf32> to vector<2x16x16xf32>
    %82 = arith.subf %78, %81 : vector<2x16x16xf32>
    %83 = math.exp %82 : vector<2x16x16xf32>
    %cst_55 = arith.constant dense<0.000000e+00> : vector<2x16xf32>
    %84 = vector.multi_reduction <add>, %83, %cst_55 [2] : vector<2x16x16xf32> to vector<2x16xf32>
    %85 = vector.shape_cast %84 : vector<2x16xf32> to vector<2x16x1xf32>
    %86 = tpu.reciprocal %85 {approx = true} : vector<2x16x1xf32> -> vector<2x16x1xf32>
    %87 = vector.broadcast %86 : vector<2x16x1xf32> to vector<2x16x16xf32>
    %88 = arith.mulf %83, %87 : vector<2x16x16xf32>
    "tpu.trace_start"() <{level = 10 : i32, message = "bqk,bkd->bqd"}> : () -> ()
    %cst_56 = arith.constant dense<0.000000e+00> : vector<2x16x16xf32>
    %89 = tpu.matmul %88, %75, %cst_56 {dimension_numbers = #tpu.dot_dimension_numbers<[2], [1], [1], [2], [0, 0, 0, 1, 1, 2], [0], [0]>} : vector<2x16x16xf32>, vector<2x16x16xf32>, vector<2x16x16xf32> -> vector<2x16x16xf32>
    "tpu.trace_stop"() : () -> ()
    %90 = vector.shape_cast %89 : vector<2x16x16xf32> to vector<32x16xf32>
    %91 = arith.truncf %90 : vector<32x16xf32> to vector<32x16xbf16>
    %c0_57 = arith.constant 0 : index
    %c1_58 = arith.constant 1 : index
    %c0_59 = arith.constant 0 : index
    %c0_60 = arith.constant 0 : index
    %92 = vector.load %arg7[%c0_57, %c1_58, %c0_59, %c0_60] : memref<1x4x16x48xbf16, #tpu.memory_space<vmem>>, vector<1x1x16x48xbf16>
    %93 = vector.shape_cast %92 : vector<1x1x16x48xbf16> to vector<16x48xbf16>
    %cst_61 = arith.constant dense<0.000000e+00> : vector<32x48xf32>
    %94 = tpu.matmul %91, %93, %cst_61 {dimension_numbers = #tpu.dot_dimension_numbers<[1], [0], [0], [1], [0, 0, 1, 1], [], []>} : vector<32x16xbf16>, vector<16x48xbf16>, vector<32x48xf32> -> vector<32x48xf32>
    %95 = arith.addf %63, %94 : vector<32x48xf32>
    %c0_62 = arith.constant 0 : index
    %c2 = arith.constant 2 : index
    %c0_63 = arith.constant 0 : index
    %c0_64 = arith.constant 0 : index
    %96 = vector.load %arg4[%c0_62, %c2, %c0_63, %c0_64] : memref<1x4x48x16xbf16, #tpu.memory_space<vmem>>, vector<1x1x48x16xbf16>
    %97 = vector.shape_cast %96 : vector<1x1x48x16xbf16> to vector<48x16xbf16>
    %cst_65 = arith.constant dense<0.000000e+00> : vector<32x16xf32>
    %98 = tpu.matmul %30, %97, %cst_65 {dimension_numbers = #tpu.dot_dimension_numbers<[1], [0], [0], [1], [0, 0, 1, 1], [], []>} : vector<32x48xbf16>, vector<48x16xbf16>, vector<32x16xf32> -> vector<32x16xf32>
    %99 = vector.shape_cast %98 : vector<32x16xf32> to vector<2x16x16xf32>
    %c0_66 = arith.constant 0 : index
    %c2_67 = arith.constant 2 : index
    %c0_68 = arith.constant 0 : index
    %c0_69 = arith.constant 0 : index
    %100 = vector.load %arg5[%c0_66, %c2_67, %c0_68, %c0_69] : memref<1x4x48x16xbf16, #tpu.memory_space<vmem>>, vector<1x1x48x16xbf16>
    %101 = vector.shape_cast %100 : vector<1x1x48x16xbf16> to vector<48x16xbf16>
    %cst_70 = arith.constant dense<0.000000e+00> : vector<32x16xf32>
    %102 = tpu.matmul %30, %101, %cst_70 {dimension_numbers = #tpu.dot_dimension_numbers<[1], [0], [0], [1], [0, 0, 1, 1], [], []>} : vector<32x48xbf16>, vector<48x16xbf16>, vector<32x16xf32> -> vector<32x16xf32>
    %103 = vector.shape_cast %102 : vector<32x16xf32> to vector<2x16x16xf32>
    %c0_71 = arith.constant 0 : index
    %c2_72 = arith.constant 2 : index
    %c0_73 = arith.constant 0 : index
    %c0_74 = arith.constant 0 : index
    %104 = vector.load %arg6[%c0_71, %c2_72, %c0_73, %c0_74] : memref<1x4x48x16xbf16, #tpu.memory_space<vmem>>, vector<1x1x48x16xbf16>
    %105 = vector.shape_cast %104 : vector<1x1x48x16xbf16> to vector<48x16xbf16>
    %cst_75 = arith.constant dense<0.000000e+00> : vector<32x16xf32>
    %106 = tpu.matmul %30, %105, %cst_75 {dimension_numbers = #tpu.dot_dimension_numbers<[1], [0], [0], [1], [0, 0, 1, 1], [], []>} : vector<32x48xbf16>, vector<48x16xbf16>, vector<32x16xf32> -> vector<32x16xf32>
    %107 = vector.shape_cast %106 : vector<32x16xf32> to vector<2x16x16xf32>
    "tpu.trace_start"() <{level = 10 : i32, message = "bqd,bkd->bqk"}> : () -> ()
    %cst_76 = arith.constant dense<0.000000e+00> : vector<2x16x16xf32>
    %108 = tpu.matmul %99, %103, %cst_76 {dimension_numbers = #tpu.dot_dimension_numbers<[2], [2], [1], [1], [0, 0, 0, 1, 1, 1], [0], [0]>} : vector<2x16x16xf32>, vector<2x16x16xf32>, vector<2x16x16xf32> -> vector<2x16x16xf32>
    "tpu.trace_stop"() : () -> ()
    %cst_77 = arith.constant 2.500000e-01 : f32
    %109 = vector.broadcast %cst_77 : f32 to vector<2x16x16xf32>
    %110 = arith.mulf %108, %109 : vector<2x16x16xf32>
    %cst_78 = arith.constant dense<0xFF800000> : vector<2x16xf32>
    %111 = vector.multi_reduction <maximumf>, %110, %cst_78 [2] : vector<2x16x16xf32> to vector<2x16xf32>
    %112 = vector.shape_cast %111 : vector<2x16xf32> to vector<2x16x1xf32>
    %113 = vector.broadcast %112 : vector<2x16x1xf32> to vector<2x16x16xf32>
    %114 = arith.subf %110, %113 : vector<2x16x16xf32>
    %115 = math.exp %114 : vector<2x16x16xf32>
    %cst_79 = arith.constant dense<0.000000e+00> : vector<2x16xf32>
    %116 = vector.multi_reduction <add>, %115, %cst_79 [2] : vector<2x16x16xf32> to vector<2x16xf32>
    %117 = vector.shape_cast %116 : vector<2x16xf32> to vector<2x16x1xf32>
    %118 = tpu.reciprocal %117 {approx = true} : vector<2x16x1xf32> -> vector<2x16x1xf32>
    %119 = vector.broadcast %118 : vector<2x16x1xf32> to vector<2x16x16xf32>
    %120 = arith.mulf %115, %119 : vector<2x16x16xf32>
    "tpu.trace_start"() <{level = 10 : i32, message = "bqk,bkd->bqd"}> : () -> ()
    %cst_80 = arith.constant dense<0.000000e+00> : vector<2x16x16xf32>
    %121 = tpu.matmul %120, %107, %cst_80 {dimension_numbers = #tpu.dot_dimension_numbers<[2], [1], [1], [2], [0, 0, 0, 1, 1, 2], [0], [0]>} : vector<2x16x16xf32>, vector<2x16x16xf32>, vector<2x16x16xf32> -> vector<2x16x16xf32>
    "tpu.trace_stop"() : () -> ()
    %122 = vector.shape_cast %121 : vector<2x16x16xf32> to vector<32x16xf32>
    %123 = arith.truncf %122 : vector<32x16xf32> to vector<32x16xbf16>
    %c0_81 = arith.constant 0 : index
    %c2_82 = arith.constant 2 : index
    %c0_83 = arith.constant 0 : index
    %c0_84 = arith.constant 0 : index
    %124 = vector.load %arg7[%c0_81, %c2_82, %c0_83, %c0_84] : memref<1x4x16x48xbf16, #tpu.memory_space<vmem>>, vector<1x1x16x48xbf16>
    %125 = vector.shape_cast %124 : vector<1x1x16x48xbf16> to vector<16x48xbf16>
    %cst_85 = arith.constant dense<0.000000e+00> : vector<32x48xf32>
    %126 = tpu.matmul %123, %125, %cst_85 {dimension_numbers = #tpu.dot_dimension_numbers<[1], [0], [0], [1], [0, 0, 1, 1], [], []>} : vector<32x16xbf16>, vector<16x48xbf16>, vector<32x48xf32> -> vector<32x48xf32>
    %127 = arith.addf %95, %126 : vector<32x48xf32>
    %c0_86 = arith.constant 0 : index
    %c3 = arith.constant 3 : index
    %c0_87 = arith.constant 0 : index
    %c0_88 = arith.constant 0 : index
    %128 = vector.load %arg4[%c0_86, %c3, %c0_87, %c0_88] : memref<1x4x48x16xbf16, #tpu.memory_space<vmem>>, vector<1x1x48x16xbf16>
    %129 = vector.shape_cast %128 : vector<1x1x48x16xbf16> to vector<48x16xbf16>
    %cst_89 = arith.constant dense<0.000000e+00> : vector<32x16xf32>
    %130 = tpu.matmul %30, %129, %cst_89 {dimension_numbers = #tpu.dot_dimension_numbers<[1], [0], [0], [1], [0, 0, 1, 1], [], []>} : vector<32x48xbf16>, vector<48x16xbf16>, vector<32x16xf32> -> vector<32x16xf32>
    %131 = vector.shape_cast %130 : vector<32x16xf32> to vector<2x16x16xf32>
    %c0_90 = arith.constant 0 : index
    %c3_91 = arith.constant 3 : index
    %c0_92 = arith.constant 0 : index
    %c0_93 = arith.constant 0 : index
    %132 = vector.load %arg5[%c0_90, %c3_91, %c0_92, %c0_93] : memref<1x4x48x16xbf16, #tpu.memory_space<vmem>>, vector<1x1x48x16xbf16>
    %133 = vector.shape_cast %132 : vector<1x1x48x16xbf16> to vector<48x16xbf16>
    %cst_94 = arith.constant dense<0.000000e+00> : vector<32x16xf32>
    %134 = tpu.matmul %30, %133, %cst_94 {dimension_numbers = #tpu.dot_dimension_numbers<[1], [0], [0], [1], [0, 0, 1, 1], [], []>} : vector<32x48xbf16>, vector<48x16xbf16>, vector<32x16xf32> -> vector<32x16xf32>
    %135 = vector.shape_cast %134 : vector<32x16xf32> to vector<2x16x16xf32>
    %c0_95 = arith.constant 0 : index
    %c3_96 = arith.constant 3 : index
    %c0_97 = arith.constant 0 : index
    %c0_98 = arith.constant 0 : index
    %136 = vector.load %arg6[%c0_95, %c3_96, %c0_97, %c0_98] : memref<1x4x48x16xbf16, #tpu.memory_space<vmem>>, vector<1x1x48x16xbf16>
    %137 = vector.shape_cast %136 : vector<1x1x48x16xbf16> to vector<48x16xbf16>
    %cst_99 = arith.constant dense<0.000000e+00> : vector<32x16xf32>
    %138 = tpu.matmul %30, %137, %cst_99 {dimension_numbers = #tpu.dot_dimension_numbers<[1], [0], [0], [1], [0, 0, 1, 1], [], []>} : vector<32x48xbf16>, vector<48x16xbf16>, vector<32x16xf32> -> vector<32x16xf32>
    %139 = vector.shape_cast %138 : vector<32x16xf32> to vector<2x16x16xf32>
    "tpu.trace_start"() <{level = 10 : i32, message = "bqd,bkd->bqk"}> : () -> ()
    %cst_100 = arith.constant dense<0.000000e+00> : vector<2x16x16xf32>
    %140 = tpu.matmul %131, %135, %cst_100 {dimension_numbers = #tpu.dot_dimension_numbers<[2], [2], [1], [1], [0, 0, 0, 1, 1, 1], [0], [0]>} : vector<2x16x16xf32>, vector<2x16x16xf32>, vector<2x16x16xf32> -> vector<2x16x16xf32>
    "tpu.trace_stop"() : () -> ()
    %cst_101 = arith.constant 2.500000e-01 : f32
    %141 = vector.broadcast %cst_101 : f32 to vector<2x16x16xf32>
    %142 = arith.mulf %140, %141 : vector<2x16x16xf32>
    %cst_102 = arith.constant dense<0xFF800000> : vector<2x16xf32>
    %143 = vector.multi_reduction <maximumf>, %142, %cst_102 [2] : vector<2x16x16xf32> to vector<2x16xf32>
    %144 = vector.shape_cast %143 : vector<2x16xf32> to vector<2x16x1xf32>
    %145 = vector.broadcast %144 : vector<2x16x1xf32> to vector<2x16x16xf32>
    %146 = arith.subf %142, %145 : vector<2x16x16xf32>
    %147 = math.exp %146 : vector<2x16x16xf32>
    %cst_103 = arith.constant dense<0.000000e+00> : vector<2x16xf32>
    %148 = vector.multi_reduction <add>, %147, %cst_103 [2] : vector<2x16x16xf32> to vector<2x16xf32>
    %149 = vector.shape_cast %148 : vector<2x16xf32> to vector<2x16x1xf32>
    %150 = tpu.reciprocal %149 {approx = true} : vector<2x16x1xf32> -> vector<2x16x1xf32>
    %151 = vector.broadcast %150 : vector<2x16x1xf32> to vector<2x16x16xf32>
    %152 = arith.mulf %147, %151 : vector<2x16x16xf32>
    "tpu.trace_start"() <{level = 10 : i32, message = "bqk,bkd->bqd"}> : () -> ()
    %cst_104 = arith.constant dense<0.000000e+00> : vector<2x16x16xf32>
    %153 = tpu.matmul %152, %139, %cst_104 {dimension_numbers = #tpu.dot_dimension_numbers<[2], [1], [1], [2], [0, 0, 0, 1, 1, 2], [0], [0]>} : vector<2x16x16xf32>, vector<2x16x16xf32>, vector<2x16x16xf32> -> vector<2x16x16xf32>
    "tpu.trace_stop"() : () -> ()
    %154 = vector.shape_cast %153 : vector<2x16x16xf32> to vector<32x16xf32>
    %155 = arith.truncf %154 : vector<32x16xf32> to vector<32x16xbf16>
    %c0_105 = arith.constant 0 : index
    %c3_106 = arith.constant 3 : index
    %c0_107 = arith.constant 0 : index
    %c0_108 = arith.constant 0 : index
    %156 = vector.load %arg7[%c0_105, %c3_106, %c0_107, %c0_108] : memref<1x4x16x48xbf16, #tpu.memory_space<vmem>>, vector<1x1x16x48xbf16>
    %157 = vector.shape_cast %156 : vector<1x1x16x48xbf16> to vector<16x48xbf16>
    %cst_109 = arith.constant dense<0.000000e+00> : vector<32x48xf32>
    %158 = tpu.matmul %155, %157, %cst_109 {dimension_numbers = #tpu.dot_dimension_numbers<[1], [0], [0], [1], [0, 0, 1, 1], [], []>} : vector<32x16xbf16>, vector<16x48xbf16>, vector<32x48xf32> -> vector<32x48xf32>
    %159 = arith.addf %127, %158 : vector<32x48xf32>
    %160 = arith.addf %3, %159 : vector<32x48xf32>
    %c0_110 = arith.constant 0 : index
    %c0_111 = arith.constant 0 : index
    %c0_112 = arith.constant 0 : index
    %161 = vector.load %arg8[%c0_110, %c0_111, %c0_112] : memref<1x1x48xf32, #tpu.memory_space<vmem>>, vector<1x1x48xf32>
    %162 = vector.shape_cast %161 : vector<1x1x48xf32> to vector<1x48xf32>
    %163 = vector.broadcast %162 : vector<1x48xf32> to vector<32x48xf32>
    %164 = arith.addf %160, %163 : vector<32x48xf32>
    %c0_113 = arith.constant 0 : index
    %c0_114 = arith.constant 0 : index
    %c0_115 = arith.constant 0 : index
    %165 = vector.load %arg9[%c0_113, %c0_114, %c0_115] : memref<1x1x48xf32, #tpu.memory_space<vmem>>, vector<1x1x48xf32>
    %166 = vector.shape_cast %165 : vector<1x1x48xf32> to vector<1x48xf32>
    %c0_116 = arith.constant 0 : index
    %c0_117 = arith.constant 0 : index
    %c0_118 = arith.constant 0 : index
    %167 = vector.load %arg10[%c0_116, %c0_117, %c0_118] : memref<1x1x48xf32, #tpu.memory_space<vmem>>, vector<1x1x48xf32>
    %168 = vector.shape_cast %167 : vector<1x1x48xf32> to vector<1x48xf32>
    %cst_119 = arith.constant dense<0.000000e+00> : vector<32xf32>
    %169 = vector.multi_reduction <add>, %164, %cst_119 [1] : vector<32x48xf32> to vector<32xf32>
    %170 = vector.shape_cast %169 : vector<32xf32> to vector<32x1xf32>
    %cst_120 = arith.constant 4.800000e+01 : f32
    %171 = vector.broadcast %cst_120 : f32 to vector<32x1xf32>
    %172 = arith.divf %170, %171 : vector<32x1xf32>
    %173 = vector.broadcast %172 : vector<32x1xf32> to vector<32x48xf32>
    %174 = arith.subf %164, %173 : vector<32x48xf32>
    %175 = arith.mulf %174, %174 : vector<32x48xf32>
    %cst_121 = arith.constant dense<0.000000e+00> : vector<32xf32>
    %176 = vector.multi_reduction <add>, %175, %cst_121 [1] : vector<32x48xf32> to vector<32xf32>
    %177 = vector.shape_cast %176 : vector<32xf32> to vector<32x1xf32>
    %cst_122 = arith.constant 4.800000e+01 : f32
    %178 = vector.broadcast %cst_122 : f32 to vector<32x1xf32>
    %179 = arith.divf %177, %178 : vector<32x1xf32>
    %180 = vector.broadcast %172 : vector<32x1xf32> to vector<32x48xf32>
    %181 = arith.subf %164, %180 : vector<32x48xf32>
    %cst_123 = arith.constant 9.99999974E-6 : f32
    %182 = vector.broadcast %cst_123 : f32 to vector<32x1xf32>
    %183 = arith.addf %179, %182 : vector<32x1xf32>
    %184 = math.rsqrt %183 : vector<32x1xf32>
    %185 = vector.broadcast %184 : vector<32x1xf32> to vector<32x48xf32>
    %186 = arith.mulf %181, %185 : vector<32x48xf32>
    %187 = vector.broadcast %166 : vector<1x48xf32> to vector<32x48xf32>
    %188 = arith.mulf %186, %187 : vector<32x48xf32>
    %189 = vector.broadcast %168 : vector<1x48xf32> to vector<32x48xf32>
    %190 = arith.addf %188, %189 : vector<32x48xf32>
    %191 = arith.truncf %190 : vector<32x48xf32> to vector<32x48xbf16>
    %c0_124 = arith.constant 0 : index
    %c0_125 = arith.constant 0 : index
    %c0_126 = arith.constant 0 : index
    %192 = vector.load %arg11[%c0_124, %c0_125, %c0_126] : memref<1x48x192xbf16, #tpu.memory_space<vmem>>, vector<1x48x192xbf16>
    %193 = vector.shape_cast %192 : vector<1x48x192xbf16> to vector<48x192xbf16>
    %cst_127 = arith.constant dense<0.000000e+00> : vector<32x192xf32>
    %194 = tpu.matmul %191, %193, %cst_127 {dimension_numbers = #tpu.dot_dimension_numbers<[1], [0], [0], [1], [0, 0, 1, 1], [], []>} : vector<32x48xbf16>, vector<48x192xbf16>, vector<32x192xf32> -> vector<32x192xf32>
    %c0_128 = arith.constant 0 : index
    %c0_129 = arith.constant 0 : index
    %c0_130 = arith.constant 0 : index
    %195 = vector.load %arg12[%c0_128, %c0_129, %c0_130] : memref<1x1x192xf32, #tpu.memory_space<vmem>>, vector<1x1x192xf32>
    %196 = vector.shape_cast %195 : vector<1x1x192xf32> to vector<1x192xf32>
    %197 = vector.broadcast %196 : vector<1x192xf32> to vector<32x192xf32>
    %198 = arith.addf %194, %197 : vector<32x192xf32>
    %199 = arith.mulf %198, %198 : vector<32x192xf32>
    %200 = arith.mulf %198, %199 : vector<32x192xf32>
    %cst_131 = arith.constant 4.471500e-02 : f32
    %201 = vector.broadcast %cst_131 : f32 to vector<32x192xf32>
    %202 = arith.mulf %201, %200 : vector<32x192xf32>
    %203 = arith.addf %198, %202 : vector<32x192xf32>
    %cst_132 = arith.constant 0.797884583 : f32
    %204 = vector.broadcast %cst_132 : f32 to vector<32x192xf32>
    %205 = arith.mulf %204, %203 : vector<32x192xf32>
    %206 = math.tanh %205 : vector<32x192xf32>
    %cst_133 = arith.constant 1.000000e+00 : f32
    %207 = vector.broadcast %cst_133 : f32 to vector<32x192xf32>
    %208 = arith.addf %207, %206 : vector<32x192xf32>
    %cst_134 = arith.constant 5.000000e-01 : f32
    %209 = vector.broadcast %cst_134 : f32 to vector<32x192xf32>
    %210 = arith.mulf %209, %208 : vector<32x192xf32>
    %211 = arith.mulf %198, %210 : vector<32x192xf32>
    %212 = arith.truncf %211 : vector<32x192xf32> to vector<32x192xbf16>
    %c0_135 = arith.constant 0 : index
    %c0_136 = arith.constant 0 : index
    %c0_137 = arith.constant 0 : index
    %213 = vector.load %arg13[%c0_135, %c0_136, %c0_137] : memref<1x192x48xbf16, #tpu.memory_space<vmem>>, vector<1x192x48xbf16>
    %214 = vector.shape_cast %213 : vector<1x192x48xbf16> to vector<192x48xbf16>
    %cst_138 = arith.constant dense<0.000000e+00> : vector<32x48xf32>
    %215 = tpu.matmul %212, %214, %cst_138 {dimension_numbers = #tpu.dot_dimension_numbers<[1], [0], [0], [1], [0, 0, 1, 1], [], []>} : vector<32x192xbf16>, vector<192x48xbf16>, vector<32x48xf32> -> vector<32x48xf32>
    %216 = arith.addf %164, %215 : vector<32x48xf32>
    %c0_139 = arith.constant 0 : index
    %c0_140 = arith.constant 0 : index
    %c0_141 = arith.constant 0 : index
    %217 = vector.load %arg14[%c0_139, %c0_140, %c0_141] : memref<1x1x48xf32, #tpu.memory_space<vmem>>, vector<1x1x48xf32>
    %218 = vector.shape_cast %217 : vector<1x1x48xf32> to vector<1x48xf32>
    %219 = vector.broadcast %218 : vector<1x48xf32> to vector<32x48xf32>
    %220 = arith.addf %216, %219 : vector<32x48xf32>
    %c0_142 = arith.constant 0 : index
    %c0_143 = arith.constant 0 : index
    %221 = vector.load %arg15[%c0_142, %c0_143] : memref<32x48xf32, #tpu.memory_space<vmem>>, vector<32x48xf32>
    tpu.vector_store %arg15[%c0_142, %c0_143], %220 {strides = array<i32>} : memref<32x48xf32, #tpu.memory_space<vmem>>, vector<32x48xf32>,
    return
  }
  func.func @transform_0(%arg0: i32) -> (i32, i32) {
    %c0_i32 = arith.constant 0 : i32
    %c0_i32_0 = arith.constant 0 : i32
    %c0_i32_1 = arith.constant 0 : i32
    return %c0_i32, %c0_i32_0 : i32, i32
  }
  func.func @transform_1(%arg0: i32) -> (i32, i32, i32) {
    %c0_i32 = arith.constant 0 : i32
    %c0_i32_0 = arith.constant 0 : i32
    %c0_i32_1 = arith.constant 0 : i32
    return %arg0, %c0_i32, %c0_i32_0 : i32, i32, i32
  }
  func.func @transform_2(%arg0: i32) -> (i32, i32, i32) {
    %c0_i32 = arith.constant 0 : i32
    %c0_i32_0 = arith.constant 0 : i32
    %c0_i32_1 = arith.constant 0 : i32
    return %arg0, %c0_i32, %c0_i32_0 : i32, i32, i32
  }
  func.func @transform_3(%arg0: i32) -> (i32, i32, i32, i32) {
    %c0_i32 = arith.constant 0 : i32
    %c0_i32_0 = arith.constant 0 : i32
    %c0_i32_1 = arith.constant 0 : i32
    %c0_i32_2 = arith.constant 0 : i32
    return %arg0, %c0_i32, %c0_i32_0, %c0_i32_1 : i32, i32, i32, i32
  }
  func.func @transform_4(%arg0: i32) -> (i32, i32, i32, i32) {
    %c0_i32 = arith.constant 0 : i32
    %c0_i32_0 = arith.constant 0 : i32
    %c0_i32_1 = arith.constant 0 : i32
    %c0_i32_2 = arith.constant 0 : i32
    return %arg0, %c0_i32, %c0_i32_0, %c0_i32_1 : i32, i32, i32, i32
  }
  func.func @transform_5(%arg0: i32) -> (i32, i32, i32, i32) {
    %c0_i32 = arith.constant 0 : i32
    %c0_i32_0 = arith.constant 0 : i32
    %c0_i32_1 = arith.constant 0 : i32
    %c0_i32_2 = arith.constant 0 : i32
    return %arg0, %c0_i32, %c0_i32_0, %c0_i32_1 : i32, i32, i32, i32
  }
  func.func @transform_6(%arg0: i32) -> (i32, i32, i32, i32) {
    %c0_i32 = arith.constant 0 : i32
    %c0_i32_0 = arith.constant 0 : i32
    %c0_i32_1 = arith.constant 0 : i32
    %c0_i32_2 = arith.constant 0 : i32
    return %arg0, %c0_i32, %c0_i32_0, %c0_i32_1 : i32, i32, i32, i32
  }
  func.func @transform_7(%arg0: i32) -> (i32, i32, i32) {
    %c0_i32 = arith.constant 0 : i32
    %c0_i32_0 = arith.constant 0 : i32
    %c0_i32_1 = arith.constant 0 : i32
    return %arg0, %c0_i32, %c0_i32_0 : i32, i32, i32
  }
  func.func @transform_8(%arg0: i32) -> (i32, i32, i32) {
    %c0_i32 = arith.constant 0 : i32
    %c0_i32_0 = arith.constant 0 : i32
    %c0_i32_1 = arith.constant 0 : i32
    return %arg0, %c0_i32, %c0_i32_0 : i32, i32, i32
  }
  func.func @transform_9(%arg0: i32) -> (i32, i32, i32) {
    %c0_i32 = arith.constant 0 : i32
    %c0_i32_0 = arith.constant 0 : i32
    %c0_i32_1 = arith.constant 0 : i32
    return %arg0, %c0_i32, %c0_i32_0 : i32, i32, i32
  }
  func.func @transform_10(%arg0: i32) -> (i32, i32, i32) {
    %c0_i32 = arith.constant 0 : i32
    %c0_i32_0 = arith.constant 0 : i32
    %c0_i32_1 = arith.constant 0 : i32
    return %arg0, %c0_i32, %c0_i32_0 : i32, i32, i32
  }
  func.func @transform_11(%arg0: i32) -> (i32, i32, i32) {
    %c0_i32 = arith.constant 0 : i32
    %c0_i32_0 = arith.constant 0 : i32
    %c0_i32_1 = arith.constant 0 : i32
    return %arg0, %c0_i32, %c0_i32_0 : i32, i32, i32
  }
  func.func @transform_12(%arg0: i32) -> (i32, i32, i32) {
    %c0_i32 = arith.constant 0 : i32
    %c0_i32_0 = arith.constant 0 : i32
    %c0_i32_1 = arith.constant 0 : i32
    return %arg0, %c0_i32, %c0_i32_0 : i32, i32, i32
  }
  func.func @transform_13(%arg0: i32) -> (i32, i32, i32) {
    %c0_i32 = arith.constant 0 : i32
    %c0_i32_0 = arith.constant 0 : i32
    %c0_i32_1 = arith.constant 0 : i32
    return %arg0, %c0_i32, %c0_i32_0 : i32, i32, i32
  }
  func.func @transform_14(%arg0: i32) -> (i32, i32) {
    %c0_i32 = arith.constant 0 : i32
    %c0_i32_0 = arith.constant 0 : i32
    %c0_i32_1 = arith.constant 0 : i32
    return %c0_i32, %c0_i32_0 : i32, i32
  }
}

module attributes {stable_mosaic.version = 11 : i64} {
  func.func @_ln_sigmoid_linear_kernel(%arg0: i32, %arg1: memref<32x48xf32, #tpu.memory_space<vmem>>, %arg2: memref<1x48xf32, #tpu.memory_space<vmem>>, %arg3: memref<1x48xf32, #tpu.memory_space<vmem>>, %arg4: memref<48x64xbf16, #tpu.memory_space<vmem>>, %arg5: memref<1x64xf32, #tpu.memory_space<vmem>>, %arg6: memref<32x64xf32, #tpu.memory_space<vmem>>) attributes {dimension_semantics = [#tpu.dimension_semantics<arbitrary>], iteration_bounds = array<i64: 1>, scalar_prefetch = 0 : i64, scratch_operands = 0 : i64, tpu.core_type = #tpu.core_type<tc>, window_params = [{pipeline_mode = #tpu.pipeline_mode<synchronous>, transform_indices = @transform_0, window_bounds = array<i64: 32, 48>}, {pipeline_mode = #tpu.pipeline_mode<synchronous>, transform_indices = @transform_1, window_bounds = array<i64: 1, 48>}, {pipeline_mode = #tpu.pipeline_mode<synchronous>, transform_indices = @transform_2, window_bounds = array<i64: 1, 48>}, {pipeline_mode = #tpu.pipeline_mode<synchronous>, transform_indices = @transform_3, window_bounds = array<i64: 48, 64>}, {pipeline_mode = #tpu.pipeline_mode<synchronous>, transform_indices = @transform_4, window_bounds = array<i64: 1, 64>}, {pipeline_mode = #tpu.pipeline_mode<synchronous>, transform_indices = @transform_5, window_bounds = array<i64: 32, 64>}]} {
    %c0 = arith.constant 0 : index
    %c0_0 = arith.constant 0 : index
    %0 = vector.load %arg1[%c0, %c0_0] : memref<32x48xf32, #tpu.memory_space<vmem>>, vector<32x48xf32>
    %c0_1 = arith.constant 0 : index
    %c0_2 = arith.constant 0 : index
    %1 = vector.load %arg2[%c0_1, %c0_2] : memref<1x48xf32, #tpu.memory_space<vmem>>, vector<1x48xf32>
    %c0_3 = arith.constant 0 : index
    %c0_4 = arith.constant 0 : index
    %2 = vector.load %arg3[%c0_3, %c0_4] : memref<1x48xf32, #tpu.memory_space<vmem>>, vector<1x48xf32>
    %cst = arith.constant dense<0.000000e+00> : vector<32xf32>
    %3 = vector.multi_reduction <add>, %0, %cst [1] : vector<32x48xf32> to vector<32xf32>
    %4 = vector.shape_cast %3 : vector<32xf32> to vector<32x1xf32>
    %cst_5 = arith.constant 4.800000e+01 : f32
    %5 = vector.broadcast %cst_5 : f32 to vector<32x1xf32>
    %6 = arith.divf %4, %5 : vector<32x1xf32>
    %7 = vector.broadcast %6 : vector<32x1xf32> to vector<32x48xf32>
    %8 = arith.subf %0, %7 : vector<32x48xf32>
    %9 = arith.mulf %8, %8 : vector<32x48xf32>
    %cst_6 = arith.constant dense<0.000000e+00> : vector<32xf32>
    %10 = vector.multi_reduction <add>, %9, %cst_6 [1] : vector<32x48xf32> to vector<32xf32>
    %11 = vector.shape_cast %10 : vector<32xf32> to vector<32x1xf32>
    %cst_7 = arith.constant 4.800000e+01 : f32
    %12 = vector.broadcast %cst_7 : f32 to vector<32x1xf32>
    %13 = arith.divf %11, %12 : vector<32x1xf32>
    %14 = vector.broadcast %6 : vector<32x1xf32> to vector<32x48xf32>
    %15 = arith.subf %0, %14 : vector<32x48xf32>
    %cst_8 = arith.constant 9.99999974E-6 : f32
    %16 = vector.broadcast %cst_8 : f32 to vector<32x1xf32>
    %17 = arith.addf %13, %16 : vector<32x1xf32>
    %18 = math.rsqrt %17 : vector<32x1xf32>
    %19 = vector.broadcast %18 : vector<32x1xf32> to vector<32x48xf32>
    %20 = arith.mulf %15, %19 : vector<32x48xf32>
    %21 = vector.broadcast %1 : vector<1x48xf32> to vector<32x48xf32>
    %22 = arith.mulf %20, %21 : vector<32x48xf32>
    %23 = vector.broadcast %2 : vector<1x48xf32> to vector<32x48xf32>
    %24 = arith.addf %22, %23 : vector<32x48xf32>
    %25 = arith.negf %24 : vector<32x48xf32>
    %26 = math.exp %25 : vector<32x48xf32>
    %cst_9 = arith.constant 1.000000e+00 : f32
    %27 = vector.broadcast %cst_9 : f32 to vector<32x48xf32>
    %28 = arith.addf %27, %26 : vector<32x48xf32>
    %29 = arith.divf %27, %28 : vector<32x48xf32>
    %30 = arith.truncf %29 : vector<32x48xf32> to vector<32x48xbf16>
    %c0_10 = arith.constant 0 : index
    %c0_11 = arith.constant 0 : index
    %31 = vector.load %arg4[%c0_10, %c0_11] : memref<48x64xbf16, #tpu.memory_space<vmem>>, vector<48x64xbf16>
    %cst_12 = arith.constant dense<0.000000e+00> : vector<32x64xf32>
    %32 = tpu.matmul %30, %31, %cst_12 {dimension_numbers = #tpu.dot_dimension_numbers<[1], [0], [0], [1], [0, 0, 1, 1], [], []>} : vector<32x48xbf16>, vector<48x64xbf16>, vector<32x64xf32> -> vector<32x64xf32>
    %c0_13 = arith.constant 0 : index
    %c0_14 = arith.constant 0 : index
    %33 = vector.load %arg5[%c0_13, %c0_14] : memref<1x64xf32, #tpu.memory_space<vmem>>, vector<1x64xf32>
    %34 = vector.broadcast %33 : vector<1x64xf32> to vector<32x64xf32>
    %35 = arith.addf %32, %34 : vector<32x64xf32>
    %c0_15 = arith.constant 0 : index
    %c0_16 = arith.constant 0 : index
    %36 = vector.load %arg6[%c0_15, %c0_16] : memref<32x64xf32, #tpu.memory_space<vmem>>, vector<32x64xf32>
    tpu.vector_store %arg6[%c0_15, %c0_16], %35 {strides = array<i32>} : memref<32x64xf32, #tpu.memory_space<vmem>>, vector<32x64xf32>,
    return
  }
  func.func @transform_0(%arg0: i32) -> (i32, i32) {
    %c0_i32 = arith.constant 0 : i32
    %c0_i32_0 = arith.constant 0 : i32
    %c0_i32_1 = arith.constant 0 : i32
    return %c0_i32, %c0_i32_0 : i32, i32
  }
  func.func @transform_1(%arg0: i32) -> (i32, i32) {
    %c0_i32 = arith.constant 0 : i32
    %c0_i32_0 = arith.constant 0 : i32
    %c0_i32_1 = arith.constant 0 : i32
    return %c0_i32, %c0_i32_0 : i32, i32
  }
  func.func @transform_2(%arg0: i32) -> (i32, i32) {
    %c0_i32 = arith.constant 0 : i32
    %c0_i32_0 = arith.constant 0 : i32
    %c0_i32_1 = arith.constant 0 : i32
    return %c0_i32, %c0_i32_0 : i32, i32
  }
  func.func @transform_3(%arg0: i32) -> (i32, i32) {
    %c0_i32 = arith.constant 0 : i32
    %c0_i32_0 = arith.constant 0 : i32
    %c0_i32_1 = arith.constant 0 : i32
    return %c0_i32, %c0_i32_0 : i32, i32
  }
  func.func @transform_4(%arg0: i32) -> (i32, i32) {
    %c0_i32 = arith.constant 0 : i32
    %c0_i32_0 = arith.constant 0 : i32
    %c0_i32_1 = arith.constant 0 : i32
    return %c0_i32, %c0_i32_0 : i32, i32
  }
  func.func @transform_5(%arg0: i32) -> (i32, i32) {
    %c0_i32 = arith.constant 0 : i32
    %c0_i32_0 = arith.constant 0 : i32
    %c0_i32_1 = arith.constant 0 : i32
    return %c0_i32, %c0_i32_0 : i32, i32
  }
}

</mosaic_0001>

<bundles_post_ra>
// kernel: mae_forward.5
= control target key start
LH: loop header
LB: loop body
LE: loop exit
PB: predicated region body
PF: predicated region fallthrough
CT: control target
= control target key end

     0   :  { %vm36_vm0 = vcmask 523264   ;;  %vm208_vm1 = vcmask 261120   ;;  %s477_s0 = inlined_call_operand.vmem [shape: f32[32,64], index: 0, kind: input, shape index: {}]   ;;  %s478_s3 = inlined_call_operand.vmem [shape: bf16[64,32], index: 3, kind: input, shape index: {}]   ;;  %s479_s1 = inlined_call_operand.vmem [shape: f32[1,64], index: 1, kind: input, shape index: {}]   ;;  %s480_s2 = inlined_call_operand.vmem [shape: f32[1,64], index: 2, kind: input, shape index: {}]   ;;  %s481_s4 = inlined_call_operand.vmem [shape: f32[1,32], index: 4, kind: input, shape index: {}]   ;;  %s482_s5 = inlined_call_operand.vmem [shape: f32[1,32], index: 5, kind: input, shape index: {}]   ;;  %s483_s6 = inlined_call_operand.vmem [shape: f32[1,32], index: 6, kind: input, shape index: {}]   ;;  %s484_s7 = inlined_call_operand.vmem [shape: f32[32,32], index: 7, kind: input, shape index: {}]   ;;  %s485_s8 = inlined_call_operand.vmem [shape: f32[32,32], index: 8, kind: output, shape index: {}]  }
   0x1   :  { %v30_v0 = vld [vmem:[%s477_s0] sm:$0xff]  ;;  %v32_v1 = vld [vmem:[%s477_s0 + $0x10] sm:$0xff]  ;;  %v31_v2 = vld [vmem:[%s477_s0 + $0x8] sm:$0xff] }
   0x2   :  { %v37_v3 = vsel %vm36_vm0, %v30_v0, 0.0  ;;  %v43_v4 = vsel %vm36_vm0, %v32_v1, 0.0  ;;  %v33_v5 = vld [vmem:[%s477_s0 + $0x18] sm:$0xff]  ;;  %v40_v6 = vsel %vm36_vm0, %v31_v2, 0.0  ;;  %v327_v28 = vld [vmem:[%s478_s3] sm:$0xff]   ;;  %v328_v29 = vld [vmem:[%s478_s3 + $0x8] sm:$0xff]  }
   0x3   :  { %38 = vadd.xlane.f32.xlu0 %v37_v3  ;;  %44 = vadd.xlane.f32.xlu1 %v43_v4  ;;  %v46_v7 = vsel %vm36_vm0, %v33_v5, 0.0  ;;  %v329_v30 = vld [vmem:[%s478_s3 + $0x10] sm:$0xff]   ;;  %v330_v31 = vld [vmem:[%s478_s3 + $0x18] sm:$0xff]   ;;  %v298_v46 = vld [vmem:[%s479_s1] ss:$0 sm:$0xff] }
   0x4   :  { %315 = vmatprep.subr.bf16.mxu0 %v327_v28  ;;  %v299_v52 = vld [vmem:[%s480_s2] ss:$0 sm:$0xff] }
   0x5   :  { %316 = vmatpush3.bf16.msra.mxu0 %v327_v28 }
   0x6   :  { %317 = vmatprep.subr.bf16.mxu0 %v328_v29 }
   0x7   :  { %41 = vadd.xlane.f32.xlu0 %v40_v6  ;;  %47 = vadd.xlane.f32.xlu1 %v46_v7 }
   0x9   :  { %318 = vmatpush3.bf16.msra.mxu0 %v328_v29 }
   0xa   :  { %319 = vmatprep.subr.bf16.mxu0 %v329_v30 }
   0xd   :  { %320 = vmatpush3.bf16.msra.mxu0 %v329_v30 }
   0xe   :  { %321 = vmatprep.subr.bf16.mxu0 %v330_v31 }
  0x11   :  { %322 = vmatpush3.bf16.msra.mxu0 %v330_v31 }
  0x90   :  { %v39_v8 = vpop.xlane.xlu0 %38  ;;  %v45_v9 = vpop.xlane.xlu1 %44 }
  0x91   :  { %v50_v10 = vmul.f32 0.015625, %v39_v8  ;;  %v52_v11 = vmul.f32 0.015625, %v45_v9 }
  0x93   :  { %v54_v12 = vsub.f32 %v30_v0, %v50_v10  ;;  %v56_v13 = vsub.f32 %v32_v1, %v52_v11  ;;  %v300_v0 = vld [vmem:[%s481_s4] ss:$0 sm:$0xff] }
  0x94   :  { %v42_v14 = vpop.xlane.xlu0 %41  ;;  %v48_v15 = vpop.xlane.xlu1 %47 }
  0x95   :  { %v51_v16 = vmul.f32 0.015625, %v42_v14  ;;  %v53_v17 = vmul.f32 0.015625, %v48_v15  ;;  %v58_v18 = vmul.f32 %v54_v12, %v54_v12  ;;  %v60_v19 = vmul.f32 %v56_v13, %v56_v13 }
  0x97   :  { %v55_v20 = vsub.f32 %v31_v2, %v51_v16  ;;  %v57_v21 = vsub.f32 %v33_v5, %v53_v17  ;;  %v62_v22 = vsel %vm36_vm0, %v58_v18, 0.0  ;;  %v68_v23 = vsel %vm36_vm0, %v60_v19, 0.0 }
  0x98   :  { %63 = vadd.xlane.f32.xlu0 %v62_v22 }
  0x99   :  { %v59_v24 = vmul.f32 %v55_v20, %v55_v20  ;;  %v61_v25 = vmul.f32 %v57_v21, %v57_v21 }
  0x9b   :  { %v65_v26 = vsel %vm36_vm0, %v59_v24, 0.0  ;;  %v71_v27 = vsel %vm36_vm0, %v61_v25, 0.0 }
  0x9c   :  { %69 = vadd.xlane.f32.xlu0 %v68_v23  ;;  %66 = vadd.xlane.f32.xlu1 %v65_v26 }
  0xa0   :  { %72 = vadd.xlane.f32.xlu1 %v71_v27 }
 0x125   :  { %v64_v32 = vpop.xlane.xlu0 %63 }
 0x126   :  { %v74_v33 = vmul.f32 0.015625, %v64_v32 }
 0x128   :  { %v78_v34 = vadd.f32 1e-05, %v74_v33 }
 0x129   :  { %v67_v35 = vpop.xlane.xlu1 %66  ;;  %v70_v36 = vpop.xlane.xlu0 %69 }
 0x12a   :  { %331 = vrsqrt.f32 %v78_v34  ;;  %v75_v37 = vmul.f32 0.015625, %v67_v35  ;;  %v76_v38 = vmul.f32 0.015625, %v70_v36 }
 0x12c   :  { %v79_v39 = vadd.f32 1e-05, %v75_v37  ;;  %v80_v40 = vadd.f32 1e-05, %v76_v38 }
 0x12d   :  { %v73_v41 = vpop.xlane.xlu1 %72 }
 0x12e   :  { %333 = vrsqrt.f32 %v79_v39  ;;  %v77_v42 = vmul.f32 0.015625, %v73_v41 }
 0x12f   :  { %335 = vrsqrt.f32 %v80_v40 }
 0x130   :  { %v81_v43 = vadd.f32 1e-05, %v77_v42 }
 0x132   :  { %337 = vrsqrt.f32 %v81_v43 }
 0x134   :  { %v332_v44 = vpop.eup %331 }
 0x135   :  { %v86_v45 = vmul.f32 %v332_v44, %v54_v12 }
 0x137   :  { %v96_v50 = vmul.f32 %v298_v46, %v86_v45 }
 0x138   :  { %v334_v47 = vpop.eup %333 }
 0x139   :  { %v336_v48 = vpop.eup %335  ;;  %v87_v49 = vmul.f32 %v334_v47, %v55_v20  ;;  %v106_v56 = vadd.f32 %v299_v52, %v96_v50 }
 0x13a   :  { %v88_v51 = vmul.f32 %v336_v48, %v56_v13 }
 0x13b   :  { %v97_v53 = vmul.f32 %v298_v46, %v87_v49  ;;  %v308_v49 = vld [vmem:[%s483_s6] ss:$0 sm:$0xff] }
 0x13c   :  { %v338_v54 = vpop.eup %337  ;;  %v98_v58 = vmul.f32 %v298_v46, %v88_v51 }
 0x13d   :  { %v89_v55 = vmul.f32 %v338_v54, %v57_v21  ;;  %v107_v57 = vadd.f32 %v299_v52, %v97_v53  ;;  %v282_v53 = vld [vmem:[%s484_s7] sm:$0xff] }
 0x13e   :  { %v108_v61 = vadd.f32 %v299_v52, %v98_v58  ;;  %v283_v58 = vld [vmem:[%s484_s7 + $0x8] sm:$0xff] }
 0x13f   :  { %v110_v59 = vpack.c.bf16 %v107_v57, %v106_v56  ;;  %v99_v60 = vmul.f32 %v298_v46, %v89_v55  ;;  %v307_v46 = vld [vmem:[%s482_s5] ss:$0 sm:$0xff] }
 0x141   :  { %323 = vmatprep.mubr.msk.bf16.mxu0 %vm36_vm0, %v110_v59  ;;  %v109_v62 = vadd.f32 %v299_v52, %v99_v60 }
 0x143   :  { %v111_v63 = vpack.c.bf16 %v109_v62, %v108_v61 }
 0x145   :  { %324 = vmatmul.mubr.msk.bf16.vlgmr.msra.gmra.mrb[0].mxu0 %vm36_vm0, %v111_v63  ;;  %v284_v63 = vld [vmem:[%s484_s7 + $0x10] sm:$0xff] }
 0x218   :  { %v325_v1 = vpop.f32.mrb[0].mxu0 }
 0x219   :  { %v191_v2 = vpop.f32.mrb[1].mxu0  ;;  %v200_v6 = vadd.f32 %v325_v1, %v300_v0 }
 0x21a   :  { %v192_v3 = vadd.f32 %v300_v0, %v191_v2  ;;  %v326_v4 = vpop.f32.mrb[2].mxu0 }
 0x21b   :  { %v194_v5 = vpop.f32.mrb[3].mxu0  ;;  %v203_v9 = vadd.f32 %v326_v4, %v300_v0  ;;  %v215_v11 = vsel %vm208_vm1, %v200_v6, 0.0 }
 0x21c   :  { %v195_v7 = vadd.f32 %v300_v0, %v194_v5  ;;  %v209_v8 = vsel %vm208_vm1, %v192_v3, 0.0 }
 0x21d   :  { %210 = vadd.xlane.f32.xlu0 %v209_v8  ;;  %v218_v12 = vsel %vm208_vm1, %v203_v9, 0.0 }
 0x21e   :  { %v212_v10 = vsel %vm208_vm1, %v195_v7, 0.0 }
 0x21f   :  { %213 = vadd.xlane.f32.xlu1 %v212_v10 }
 0x221   :  { %216 = vadd.xlane.f32.xlu0 %v215_v11 }
 0x223   :  { %219 = vadd.xlane.f32.xlu1 %v218_v12 }
 0x2aa   :  { %v211_v13 = vpop.xlane.xlu0 %210 }
 0x2ab   :  { %v222_v14 = vmul.f32 0.03125, %v211_v13 }
 0x2ac   :  { %v214_v15 = vpop.xlane.xlu1 %213 }
 0x2ad   :  { %v226_v16 = vsub.f32 %v192_v3, %v222_v14  ;;  %v223_v17 = vmul.f32 0.03125, %v214_v15  ;;  %v285_v3 = vld [vmem:[%s484_s7 + $0x18] sm:$0xff] }
 0x2ae   :  { %v217_v18 = vpop.xlane.xlu0 %216 }
 0x2af   :  { %v227_v19 = vsub.f32 %v195_v7, %v223_v17  ;;  %v224_v20 = vmul.f32 0.03125, %v217_v18  ;;  %v230_v21 = vmul.f32 %v226_v16, %v226_v16 }
 0x2b0   :  { %v220_v22 = vpop.xlane.xlu1 %219 }
 0x2b1   :  { %v228_v23 = vsub.f32 %v200_v6, %v224_v20  ;;  %v225_v24 = vmul.f32 0.03125, %v220_v22  ;;  %v234_v25 = vsel %vm208_vm1, %v230_v21, 0.0  ;;  %v231_v26 = vmul.f32 %v227_v19, %v227_v19 }
 0x2b2   :  { %235 = vadd.xlane.f32.xlu0 %v234_v25 }
 0x2b3   :  { %v229_v27 = vsub.f32 %v203_v9, %v225_v24  ;;  %v237_v28 = vsel %vm208_vm1, %v231_v26, 0.0  ;;  %v232_v29 = vmul.f32 %v228_v23, %v228_v23 }
 0x2b4   :  { %238 = vadd.xlane.f32.xlu1 %v237_v28 }
 0x2b5   :  { %v240_v30 = vsel %vm208_vm1, %v232_v29, 0.0  ;;  %v233_v31 = vmul.f32 %v229_v27, %v229_v27 }
 0x2b6   :  { %241 = vadd.xlane.f32.xlu0 %v240_v30 }
 0x2b7   :  { %v243_v32 = vsel %vm208_vm1, %v233_v31, 0.0 }
 0x2b8   :  { %244 = vadd.xlane.f32.xlu1 %v243_v32 }
 0x33f   :  { %v236_v33 = vpop.xlane.xlu0 %235 }
 0x340   :  { %v246_v34 = vmul.f32 0.03125, %v236_v33 }
 0x341   :  { %v239_v35 = vpop.xlane.xlu1 %238 }
 0x342   :  { %v250_v36 = vadd.f32 1e-05, %v246_v34  ;;  %v247_v37 = vmul.f32 0.03125, %v239_v35 }
 0x343   :  { %v242_v38 = vpop.xlane.xlu0 %241 }
 0x344   :  { %339 = vrsqrt.f32 %v250_v36  ;;  %v251_v39 = vadd.f32 1e-05, %v247_v37  ;;  %v248_v40 = vmul.f32 0.03125, %v242_v38 }
 0x345   :  { %v245_v41 = vpop.xlane.xlu1 %244 }
 0x346   :  { %341 = vrsqrt.f32 %v251_v39  ;;  %v252_v42 = vadd.f32 1e-05, %v248_v40  ;;  %v249_v43 = vmul.f32 0.03125, %v245_v41 }
 0x348   :  { %343 = vrsqrt.f32 %v252_v42  ;;  %v253_v44 = vadd.f32 1e-05, %v249_v43 }
 0x34a   :  { %345 = vrsqrt.f32 %v253_v44 }
 0x34e   :  { %v340_v45 = vpop.eup %339 }
 0x34f   :  { %v258_v47 = vmul.f32 %v340_v45, %v226_v16 }
 0x350   :  { %v342_v48 = vpop.eup %341 }
 0x351   :  { %v268_v50 = vmul.f32 %v307_v46, %v258_v47  ;;  %v259_v51 = vmul.f32 %v342_v48, %v227_v19 }
 0x352   :  { %v344_v52 = vpop.eup %343 }
 0x353   :  { %v278_v54 = vadd.f32 %v308_v49, %v268_v50  ;;  %v269_v55 = vmul.f32 %v307_v46, %v259_v51  ;;  %v260_v56 = vmul.f32 %v344_v52, %v228_v23 }
 0x354   :  { %v346_v57 = vpop.eup %345 }
 0x355   :  { %v286_v59 = vadd.f32 %v282_v53, %v278_v54  ;;  %v279_v60 = vadd.f32 %v308_v49, %v269_v55  ;;  %v270_v61 = vmul.f32 %v307_v46, %v260_v56  ;;  %v261_v62 = vmul.f32 %v346_v57, %v229_v27 }
 0x357   :  { %290 = vst.msk [vmem:[%s485_s8] sm:$0xff] %vm208_vm1, %v286_v59  ;;  %v287_v0 = vadd.f32 %v283_v58, %v279_v60  ;;  %v280_v1 = vadd.f32 %v308_v49, %v270_v61  ;;  %v271_v2 = vmul.f32 %v307_v46, %v261_v62 }
 0x359   :  { %291 = vst.msk [vmem:[%s485_s8 + $0x8] sm:$0xff] %vm208_vm1, %v287_v0  ;;  %v288_v4 = vadd.f32 %v284_v63, %v280_v1  ;;  %v281_v5 = vadd.f32 %v308_v49, %v271_v2 }
 0x35b   :  { %292 = vst.msk [vmem:[%s485_s8 + $0x10] sm:$0xff] %vm208_vm1, %v288_v4  ;;  %v289_v6 = vadd.f32 %v285_v3, %v281_v5 }
 0x35d   :  { %293 = vst.msk [vmem:[%s485_s8 + $0x18] sm:$0xff] %vm208_vm1, %v289_v6 }

// kernel: mae_forward.7
= control target key start
LH: loop header
LB: loop body
LE: loop exit
PB: predicated region body
PF: predicated region fallthrough
CT: control target
= control target key end

     0   :  { %vm27_vm0 = vcmask 261120   ;;  %v154_v8 = vmov 0.0   ;;  %vm155_vm1 = vmmov 0   ;;  %vm125_vm2 = vcmask 392192   ;;  %s218_s0 = inlined_call_operand.vmem [shape: f32[8,32], index: 0, kind: input, shape index: {}]   ;;  %s219_s3 = inlined_call_operand.vmem [shape: bf16[32,48], index: 3, kind: input, shape index: {}]   ;;  %s220_s1 = inlined_call_operand.vmem [shape: f32[1,32], index: 1, kind: input, shape index: {}]   ;;  %s221_s2 = inlined_call_operand.vmem [shape: f32[1,32], index: 2, kind: input, shape index: {}]   ;;  %s222_s4 = inlined_call_operand.vmem [shape: f32[1,48], index: 4, kind: input, shape index: {}]   ;;  %s223_s5 = inlined_call_operand.vmem [shape: f32[8,48], index: 5, kind: input, shape index: {}]   ;;  %s224_s6 = inlined_call_operand.vmem [shape: f32[8,48], index: 6, kind: output, shape index: {}]  }
   0x1   :  { %v24_v0 = vld [vmem:[%s218_s0] sm:$0xff]  ;;  %140 = vmatprep.subr.bf16.mxu0 %v154_v8  ;;  %v151_v9 = vld [vmem:[%s219_s3 + $0x8] sm:$0xff]   ;;  %144 = vmatprep.mubr.msk.bf16.mxu0 %vm155_vm1, %v154_v8 }
   0x2   :  { %v28_v1 = vsel %vm27_vm0, %v24_v0, 0.0  ;;  %v150_v7 = vld [vmem:[%s219_s3] sm:$0xff]  }
   0x3   :  { %29 = vadd.xlane.f32.xlu0 %v28_v1  ;;  %141 = vmatpush3.bf16.msra.mxu0 %v150_v7  ;;  %v131_v14 = vld [vmem:[%s220_s1] ss:$0 sm:$0xff] }
   0x4   :  { %142 = vmatprep.subr.bf16.mxu0 %v154_v8  ;;  %v132_v16 = vld [vmem:[%s221_s2] ss:$0 sm:$0xff] }
   0x5   :  { %v133_v20 = vld [vmem:[%s222_s4] ss:$0 sm:$0xff] }
   0x6   :  { %v123_v22 = vld [vmem:[%s223_s5] sm:$0xff] }
   0x7   :  { %143 = vmatpush3.bf16.msra.mxu0 %v151_v9 }
  0x90   :  { %v30_v2 = vpop.xlane.xlu0 %29 }
  0x91   :  { %v32_v3 = vmul.f32 0.03125, %v30_v2 }
  0x93   :  { %v33_v4 = vsub.f32 %v24_v0, %v32_v3 }
  0x95   :  { %v34_v5 = vmul.f32 %v33_v4, %v33_v4 }
  0x97   :  { %v35_v6 = vsel %vm27_vm0, %v34_v5, 0.0 }
  0x98   :  { %36 = vadd.xlane.f32.xlu0 %v35_v6 }
 0x125   :  { %v37_v10 = vpop.xlane.xlu0 %36 }
 0x126   :  { %v38_v11 = vmul.f32 0.03125, %v37_v10 }
 0x128   :  { %v39_v12 = vadd.f32 1e-05, %v38_v11 }
 0x12a   :  { %152 = vrsqrt.f32 %v39_v12 }
 0x134   :  { %v153_v13 = vpop.eup %152 }
 0x135   :  { %v41_v15 = vmul.f32 %v153_v13, %v33_v4 }
 0x137   :  { %v48_v17 = vmul.f32 %v131_v14, %v41_v15 }
 0x139   :  { %v55_v18 = vadd.f32 %v132_v16, %v48_v17 }
 0x13b   :  { %v56_v19 = vpack.c.bf16 %v55_v18, %v55_v18 }
 0x13d   :  { %145 = vmatmul.mubr.msk.bf16.vlgmr.msra.gmra.mrb[0].mxu0 %vm27_vm0, %v56_v19 }
 0x210   :  { %v117_v21 = vpop.f32.mrb[0].mxu0 }
 0x211   :  { %v118_v23 = vadd.f32 %v133_v20, %v117_v21  ;;  %v146_v24 = vpop.f32.mrb[1].mxu0 }
 0x212   :  { %v120_v25 = vpop.f32.mrb[2].mxu0 }
 0x213   :  { %v124_v26 = vadd.f32 %v123_v22, %v118_v23  ;;  %v147_v27 = vpop.f32.mrb[3].mxu0 }
 0x215   :  { %126 = vst.msk [vmem:[%s224_s6] sm:$0xff] %vm125_vm2, %v124_v26 }

// kernel: mae_forward.6
= control target key start
LH: loop header
LB: loop body
LE: loop exit
PB: predicated region body
PF: predicated region fallthrough
CT: control target
= control target key end

     0   :  { %vm53_vm0 = vcmask 261120   ;;  %v3006_v9 = vmov 0.0   ;;  %vm3007_vm1 = vmmov 0   ;;  %vm265_vm2 = vcmask 64512   ;;  %s3445_s0 = inlined_call_operand.vmem [shape: f32[8,32], index: 0, kind: input, shape index: {}]   ;;  %s3446_s14 = inlined_call_operand.vmem [shape: f32[8,32], index: 14, kind: output, shape index: {}]   ;;  %s3447_s3 = inlined_call_operand.vmem [shape: bf16[1,4,32,8], index: 3, kind: input, shape index: {}]   ;;  %s3448_s4 = inlined_call_operand.vmem [shape: bf16[1,4,32,8], index: 4, kind: input, shape index: {}]   ;;  %s3449_s5 = inlined_call_operand.vmem [shape: bf16[1,4,32,8], index: 5, kind: input, shape index: {}]   ;;  %s3450_s1 = inlined_call_operand.vmem [shape: f32[1,1,32], index: 1, kind: input, shape index: {}]   ;;  %s3451_s2 = inlined_call_operand.vmem [shape: f32[1,1,32], index: 2, kind: input, shape index: {}]   ;;  %s3452_s6 = inlined_call_operand.vmem [shape: bf16[1,4,8,32], index: 6, kind: input, shape index: {}]   ;;  %s3453_s7 = inlined_call_operand.vmem [shape: f32[1,1,32], index: 7, kind: input, shape index: {}]   ;;  %s3454_s10 = inlined_call_operand.vmem [shape: bf16[1,32,64], index: 10, kind: input, shape index: {}]   ;;  %s3455_s8 = inlined_call_operand.vmem [shape: f32[1,1,32], index: 8, kind: input, shape index: {}]   ;;  %s3456_s9 = inlined_call_operand.vmem [shape: f32[1,1,32], index: 9, kind: input, shape index: {}]   ;;  %s3457_s12 = inlined_call_operand.vmem [shape: bf16[1,64,32], index: 12, kind: input, shape index: {}]   ;;  %s3458_s11 = inlined_call_operand.vmem [shape: f32[1,1,64], index: 11, kind: input, shape index: {}]   ;;  %s3459_s13 = inlined_call_operand.vmem [shape: f32[1,1,32], index: 13, kind: input, shape index: {}]  }
   0x1   :  { %v52_v0 = vld [vmem:[%s3445_s0] sm:$0xff]  ;;  %2716 = vmatprep.subr.bf16.mxu0 %v3006_v9  ;;  %2724 = vmatprep.subr.bf16.mxu1 %v3006_v9  ;;  %v2940_v11 = vld [vmem:[%s3447_s3 + $0x8] sm:$0xff]   ;;  %vm443_vm3 = vcmask 1043456   ;;  %vm416_vm4 = vcmask 27648   ;;  %vm439_vm5 = vcmask 31744   ;;  %v2944_v61 = vld [vmem:[%s3448_s4 + $0x10] sm:$0xff]  }
   0x2   :  { %54 = vst.msk [vmem:[%s3446_s14] sm:$0xff] %vm53_vm0, %v52_v0  ;;  %v2938_v8 = vld [vmem:[%s3447_s3] sm:$0xff]   ;;  %v2941_v12 = vld [vmem:[%s3448_s4 + $0x8] sm:$0xff]   ;;  %2720 = vmatprep.mubr.msk.bf16.mxu0 %vm3007_vm1, %v3006_v9  ;;  %2728 = vmatprep.mubr.msk.bf16.mxu1 %vm3007_vm1, %v3006_v9  ;;  %v2945_v0 = vld [vmem:[%s3447_s3 + $0x10] sm:$0xff]   ;;  %vm2448_vm6 = vcmask 523264  }
   0x3   :  { %v2939_v10 = vld [vmem:[%s3448_s4] sm:$0xff]   ;;  %2717 = vmatpush3.bf16.msra.mxu0 %v2938_v8  ;;  %v2943_v24 = vld [vmem:[%s3449_s5 + $0x8] sm:$0xff]  }
   0x4   :  { %2725 = vmatpush3.bf16.msra.mxu1 %v2939_v10  ;;  %2718 = vmatprep.subr.bf16.mxu0 %v3006_v9  ;;  %v2506_v17 = vld [vmem:[%s3450_s1] ss:$0 sm:$0xff] }
   0x5   :  { %2726 = vmatprep.subr.bf16.mxu1 %v3006_v9  ;;  %v2507_v19 = vld [vmem:[%s3451_s2] ss:$0 sm:$0xff] }
   0x6   :  { %v2942_v22 = vld [vmem:[%s3449_s5] sm:$0xff]  }
   0x7   :  { %2719 = vmatpush3.bf16.msra.mxu0 %v2940_v11 }
   0x8   :  { %2727 = vmatpush3.bf16.msra.mxu1 %v2941_v12  ;;  %2732 = vmatprep.subr.bf16.mxu0 %v3006_v9 }
   0x9   :  { %v3093_v1 = vld [vmem:[%s3446_s14] sm:$0xff]  ;;  %2745 = vmatprep.subr.mxu1 %v3006_v9 }
   0xa   :  { %v59_v2 = vsel %vm53_vm0, %v3093_v1, 0.0 }
   0xb   :  { %60 = vadd.xlane.f32.xlu0 %v59_v2  ;;  %v2946_v2 = vld [vmem:[%s3448_s4 + $0x18] sm:$0xff]  }
  0x98   :  { %v61_v3 = vpop.xlane.xlu0 %60 }
  0x99   :  { %v63_v4 = vmul.f32 0.03125, %v61_v3 }
  0x9b   :  { %v64_v5 = vsub.f32 %v3093_v1, %v63_v4  ;;  %v2947_v4 = vld [vmem:[%s3447_s3 + $0x18] sm:$0xff]  }
  0x9d   :  { %v65_v6 = vmul.f32 %v64_v5, %v64_v5 }
  0x9f   :  { %v66_v7 = vsel %vm53_vm0, %v65_v6, 0.0  ;;  %v2949_v6 = vld [vmem:[%s3449_s5 + $0x18] sm:$0xff]  }
  0xa0   :  { %67 = vadd.xlane.f32.xlu0 %v66_v7 }
 0x12d   :  { %v68_v13 = vpop.xlane.xlu0 %67 }
 0x12e   :  { %v69_v14 = vmul.f32 0.03125, %v68_v13 }
 0x130   :  { %v70_v15 = vadd.f32 1e-05, %v69_v14 }
 0x132   :  { %2968 = vrsqrt.f32 %v70_v15 }
 0x13c   :  { %v2969_v16 = vpop.eup %2968 }
 0x13d   :  { %v72_v18 = vmul.f32 %v2969_v16, %v64_v5  ;;  %v2948_v5 = vld [vmem:[%s3449_s5 + $0x10] sm:$0xff]  }
 0x13f   :  { %v79_v20 = vmul.f32 %v2506_v17, %v72_v18 }
 0x141   :  { %v86_v21 = vadd.f32 %v2507_v19, %v79_v20 }
 0x143   :  { %v3130_v23 = vpack.c.bf16 %v86_v21, %v86_v21 }
 0x145   :  { %2721 = vmatmul.mubr.msk.bf16.vlgmr.msra.gmra.mrb[0].mxu0 %vm53_vm0, %v3130_v23  ;;  %2729 = vmatmul.mubr.msk.bf16.vlgmr.msra.gmra.mrb[0].mxu1 %vm53_vm0, %v3130_v23 }
 0x146   :  { %2733 = vmatpush3.bf16.msra.mxu0 %v2942_v22  ;;  %2736 = vmatprep.mubr.msk.bf16.mxu0 %vm3007_vm1, %v3006_v9 }
 0x147   :  { %2734 = vmatprep.subr.bf16.mxu0 %v3006_v9  ;;  %2747 = vmatprep.mubr.msk.f32.mxu1 %vm3007_vm1, %v3006_v9 }
 0x14a   :  { %2735 = vmatpush3.bf16.msra.mxu0 %v2943_v24 }
 0x14b   :  { %2740 = vmatprep.subr.mxu0 %v3006_v9 }
 0x14d   :  { %2737 = vmatmul.mubr.msk.bf16.vlgmr.msra.gmra.mrb[4].mxu0 %vm53_vm0, %v3130_v23 }
 0x14e   :  { %2742 = vmatprep.mubr.msk.f32.mxu0 %vm3007_vm1, %v3006_v9 }
 0x218   :  { %v141_v25 = vpop.f32.mrb[0].mxu0  ;;  %v199_v26 = vpop.f32.mrb[0].mxu1 }
 0x219   :  { %v206_v27 = vcombine.high %v199_v26, %v199_v26  ;;  %v2722_v28 = vpop.f32.mrb[1].mxu0  ;;  %v2730_v29 = vpop.f32.mrb[1].mxu1  ;;  %2741 = vmatpush3.xpose.msk.msra.mxu0 %vm265_vm2, %v199_v26  ;;  %v148_v34 = vcombine.high %v141_v25, %v141_v25 }
 0x21a   :  { %v144_v30 = vpop.f32.mrb[2].mxu0  ;;  %v202_v31 = vpop.f32.mrb[2].mxu1  ;;  %2750 = vmatprep.subr.mxu0 %v3006_v9 }
 0x21b   :  { %v2723_v32 = vpop.f32.mrb[3].mxu0  ;;  %v2731_v33 = vpop.f32.mrb[3].mxu1  ;;  %2746 = vmatpush3.xpose.msk.msra.mxu1 %vm265_vm2, %v206_v27 }
 0x21c   :  { %2743 = vmatmul.mubr.msk.f32.vlgmr.msra.gmra.mrb[8].mxu0 %vm265_vm2, %v141_v25  ;;  %2755 = vmatprep.subr.mxu1 %v3006_v9 }
 0x21d   :  { %2752 = vmatprep.mubr.msk.f32.mxu0 %vm3007_vm1, %v3006_v9 }
 0x21e   :  { %2748 = vmatmul.mubr.msk.f32.vlgmr.msra.gmra.mrb[4].mxu1 %vm265_vm2, %v148_v34 }
 0x21f   :  { %2757 = vmatprep.mubr.msk.f32.mxu1 %vm3007_vm1, %v3006_v9 }
 0x220   :  { %v257_v35 = vpop.f32.mrb[4].mxu0 }
 0x221   :  { %v264_v36 = vcombine.high %v257_v35, %v257_v35  ;;  %v2738_v37 = vpop.f32.mrb[5].mxu0  ;;  %2751 = vmatpush3.msk.msra.mxu0 %vm443_vm3, %v257_v35 }
 0x222   :  { %v260_v38 = vpop.f32.mrb[6].mxu0  ;;  %2760 = vmatprep.subr.bf16.mxu0 %v3006_v9 }
 0x223   :  { %v2739_v39 = vpop.f32.mrb[7].mxu0  ;;  %2756 = vmatpush3.msk.msra.mxu1 %vm443_vm3, %v264_v36 }
 0x224   :  { %2768 = vmatprep.subr.bf16.mxu1 %v3006_v9 }
 0x2ef   :  { %v336_v40 = vpop.f32.mrb[8].mxu0 }
 0x2f0   :  { %v2744_v41 = vpop.f32.mrb[9].mxu0  ;;  %v414_v45 = vmul.f32 0.35355338, %v336_v40 }
 0x2f1   :  { %v410_v42 = vpop.f32.mrb[4].mxu1 }
 0x2f2   :  { %v415_v43 = vmul.f32 0.35355338, %v410_v42  ;;  %v2749_v44 = vpop.f32.mrb[5].mxu1  ;;  %v417_v47 = vsel %vm416_vm4, %v414_v45, -inf }
 0x2f4   :  { %v420_v46 = vsel %vm416_vm4, %v415_v43, -inf }
 0x2f5   :  { %421 = vmax.xlane.f32.xlu1 %v420_v46 }
 0x2f9   :  { %418 = vmax.xlane.f32.xlu1 %v417_v47 }
 0x382   :  { %v422_v48 = vpop.xlane.xlu1 %421 }
 0x383   :  { %v424_v49 = vsub.f32 %v415_v43, %v422_v48 }
 0x385   :  { %v427_v50 = vmul.f32 1.442695, %v424_v49 }
 0x386   :  { %v419_v51 = vpop.xlane.xlu1 %418 }
 0x387   :  { %2970 = vpow2.f32 %v427_v50  ;;  %v423_v52 = vsub.f32 %v414_v45, %v419_v51  ;;  %v596_v51 = vld [vmem:[%s3452_s6] sm:$0xf] }
 0x389   :  { %v425_v53 = vmul.f32 1.442695, %v423_v52 }
 0x38b   :  { %2972 = vpow2.f32 %v425_v53 }
 0x391   :  { %v2971_v54 = vpop.eup %2970 }
 0x392   :  { %v432_v55 = vsel %vm416_vm4, %v2971_v54, 0.0 }
 0x393   :  { %433 = vadd.xlane.f32.xlu0 %v432_v55  ;;  %v2950_v55 = vld [vmem:[%s3448_s4 + $0x20] sm:$0xff]  }
 0x395   :  { %v2973_v56 = vpop.eup %2972 }
 0x396   :  { %v429_v57 = vsel %vm416_vm4, %v2973_v56, 0.0 }
 0x397   :  { %430 = vadd.xlane.f32.xlu1 %v429_v57  ;;  %v2951_v57 = vld [vmem:[%s3448_s4 + $0x28] sm:$0xff]  }
 0x420   :  { %v434_v58 = vpop.xlane.xlu0 %433 }
 0x421   :  { %2974 = vrcp.f32 %v434_v58  ;;  %v2554_v58 = vld [vmem:[%s3452_s6 + $0x4] sm:$0xf] }
 0x424   :  { %v431_v59 = vpop.xlane.xlu1 %430 }
 0x425   :  { %2976 = vrcp.f32 %v431_v59  ;;  %v1107_v59 = vsel %vm443_vm3, %v2554_v58, 0  ;;  %v2957_v58 = vld [vmem:[%s3447_s3 + $0x38] sm:$0xff]  }
 0x42b   :  { %v2975_v60 = vpop.eup %2974 }
 0x42c   :  { %v438_v62 = vmul.f32 %v2975_v60, %v2971_v54  ;;  %v1153_v54 = vsel %vm443_vm3, %v596_v51, 0 }
 0x42e   :  { %2758 = vmatmul.mubr.msk.f32.vlgmr.msra.gmra.mrb[6].mxu1 %vm439_vm5, %v438_v62 }
 0x42f   :  { %v2977_v63 = vpop.eup %2976  ;;  %2769 = vmatpush3.bf16.msra.mxu1 %v2944_v61  ;;  %2772 = vmatprep.mubr.msk.bf16.mxu1 %vm3007_vm1, %v3006_v9 }
 0x430   :  { %v437_v3 = vmul.f32 %v2977_v63, %v2973_v56  ;;  %2770 = vmatprep.subr.bf16.mxu1 %v3006_v9 }
 0x432   :  { %2753 = vmatmul.mubr.msk.f32.vlgmr.msra.gmra.mrb[10].mxu0 %vm439_vm5, %v437_v3 }
 0x433   :  { %2761 = vmatpush3.bf16.msra.mxu0 %v2945_v0  ;;  %2771 = vmatpush3.bf16.msra.mxu1 %v2946_v2  ;;  %v2952_v2 = vld [vmem:[%s3447_s3 + $0x20] sm:$0xff]  }
 0x434   :  { %2762 = vmatprep.subr.bf16.mxu0 %v3006_v9  ;;  %2764 = vmatprep.mubr.msk.bf16.mxu0 %vm3007_vm1, %v3006_v9 }
 0x435   :  { %2784 = vmatprep.subr.mxu1 %v3006_v9 }
 0x436   :  { %2773 = vmatmul.mubr.msk.bf16.vlgmr.msra.gmra.mrb[8].mxu1 %vm53_vm0, %v3130_v23 }
 0x437   :  { %2763 = vmatpush3.bf16.msra.mxu0 %v2947_v4  ;;  %2786 = vmatprep.mubr.msk.f32.mxu1 %vm3007_vm1, %v3006_v9 }
 0x438   :  { %2776 = vmatprep.subr.bf16.mxu0 %v3006_v9 }
 0x43a   :  { %2765 = vmatmul.mubr.msk.bf16.vlgmr.msra.gmra.mrb[12].mxu0 %vm53_vm0, %v3130_v23 }
 0x43b   :  { %2777 = vmatpush3.bf16.msra.mxu0 %v2948_v5  ;;  %2780 = vmatprep.mubr.msk.bf16.mxu0 %vm3007_vm1, %v3006_v9 }
 0x43c   :  { %2778 = vmatprep.subr.bf16.mxu0 %v3006_v9 }
 0x43f   :  { %2779 = vmatpush3.bf16.msra.mxu0 %v2949_v6 }
 0x440   :  { %2794 = vmatprep.subr.mxu0 %v3006_v9 }
 0x442   :  { %2781 = vmatmul.mubr.msk.bf16.vlgmr.msra.gmra.mrb[16].mxu0 %vm53_vm0, %v3130_v23 }
 0x443   :  { %2796 = vmatprep.mubr.msk.f32.mxu0 %vm3007_vm1, %v3006_v9 }
 0x501   :  { %v587_v7 = vpop.f32.mrb[6].mxu1 }
 0x502   :  { %v2759_v8 = vpop.f32.mrb[7].mxu1 }
 0x505   :  { %v512_v10 = vpop.f32.mrb[10].mxu0 }
 0x506   :  { %v3209_v11 = vcombine.low %v512_v10, %v587_v7  ;;  %v2754_v12 = vpop.f32.mrb[11].mxu0  ;;  %v2953_v7 = vld [vmem:[%s3447_s3 + $0x28] sm:$0xff]   ;;  %v2954_v10 = vld [vmem:[%s3449_s5 + $0x20] sm:$0xff]  }
 0x508   :  { %v595_v56 = vpack.c.bf16 %v3209_v11, %v3209_v11 }
 0x509   :  { %v707_v13 = vpop.f32.mrb[8].mxu1 }
 0x50a   :  { %v2774_v14 = vpop.f32.mrb[9].mxu1  ;;  %2785 = vmatpush3.xpose.msk.msra.mxu1 %vm265_vm2, %v707_v13  ;;  %v714_v17 = vcombine.high %v707_v13, %v707_v13 }
 0x50b   :  { %v710_v15 = vpop.f32.mrb[10].mxu1  ;;  %2789 = vmatprep.subr.mxu1 %v3006_v9  ;;  %v2955_v14 = vld [vmem:[%s3449_s5 + $0x28] sm:$0xff]  }
 0x50c   :  { %v2775_v16 = vpop.f32.mrb[11].mxu1 }
 0x50d   :  { %v648_v18 = vpop.f32.mrb[12].mxu0 }
 0x50e   :  { %v2766_v19 = vpop.f32.mrb[13].mxu0  ;;  %2787 = vmatmul.mubr.msk.f32.vlgmr.msra.gmra.mrb[12].mxu1 %vm265_vm2, %v648_v18  ;;  %v655_v21 = vcombine.high %v648_v18, %v648_v18 }
 0x50f   :  { %2790 = vmatpush3.xpose.msk.msra.mxu1 %vm265_vm2, %v714_v17  ;;  %v651_v20 = vpop.f32.mrb[14].mxu0  ;;  %2791 = vmatprep.mubr.msk.f32.mxu1 %vm3007_vm1, %v3006_v9 }
 0x510   :  { %v2767_v22 = vpop.f32.mrb[15].mxu0  ;;  %2799 = vmatprep.subr.mxu1 %v3006_v9 }
 0x512   :  { %2792 = vmatmul.mubr.msk.f32.vlgmr.msra.gmra.mrb[14].mxu1 %vm265_vm2, %v655_v21 }
 0x513   :  { %2801 = vmatprep.mubr.msk.f32.mxu1 %vm3007_vm1, %v3006_v9 }
 0x515   :  { %v766_v24 = vpop.f32.mrb[16].mxu0 }
 0x516   :  { %v773_v25 = vcombine.high %v766_v24, %v766_v24  ;;  %v2782_v26 = vpop.f32.mrb[17].mxu0  ;;  %2795 = vmatpush3.msk.msra.mxu0 %vm443_vm3, %v766_v24 }
 0x517   :  { %v769_v27 = vpop.f32.mrb[18].mxu0  ;;  %2804 = vmatprep.subr.bf16.mxu0 %v3006_v9 }
 0x518   :  { %v2783_v28 = vpop.f32.mrb[19].mxu0  ;;  %2800 = vmatpush3.msk.msra.mxu1 %vm443_vm3, %v773_v25 }
 0x519   :  { %2810 = vmatprep.subr.bf16.mxu1 %v3006_v9 }
 0x5e1   :  { %v844_v29 = vpop.f32.mrb[12].mxu1 }
 0x5e2   :  { %v922_v30 = vmul.f32 0.35355338, %v844_v29  ;;  %v2788_v31 = vpop.f32.mrb[13].mxu1 }
 0x5e4   :  { %v924_v32 = vsel %vm416_vm4, %v922_v30, -inf }
 0x5e5   :  { %925 = vmax.xlane.f32.xlu0 %v924_v32  ;;  %v918_v33 = vpop.f32.mrb[14].mxu1 }
 0x5e6   :  { %v923_v34 = vmul.f32 0.35355338, %v918_v33  ;;  %v2793_v35 = vpop.f32.mrb[15].mxu1 }
 0x5e8   :  { %v927_v36 = vsel %vm416_vm4, %v923_v34, -inf }
 0x5e9   :  { %928 = vmax.xlane.f32.xlu1 %v927_v36 }
 0x672   :  { %v926_v37 = vpop.xlane.xlu0 %925 }
 0x673   :  { %v930_v38 = vsub.f32 %v922_v30, %v926_v37 }
 0x675   :  { %v932_v39 = vmul.f32 1.442695, %v930_v38 }
 0x676   :  { %v929_v40 = vpop.xlane.xlu1 %928 }
 0x677   :  { %2978 = vpow2.f32 %v932_v39  ;;  %v931_v41 = vsub.f32 %v923_v34, %v929_v40 }
 0x679   :  { %v934_v42 = vmul.f32 1.442695, %v931_v41 }
 0x67b   :  { %2980 = vpow2.f32 %v934_v42 }
 0x681   :  { %v2979_v43 = vpop.eup %2978 }
 0x682   :  { %v936_v44 = vsel %vm416_vm4, %v2979_v43, 0.0 }
 0x683   :  { %937 = vadd.xlane.f32.xlu0 %v936_v44 }
 0x685   :  { %v2981_v45 = vpop.eup %2980 }
 0x686   :  { %v939_v46 = vsel %vm416_vm4, %v2981_v45, 0.0 }
 0x687   :  { %940 = vadd.xlane.f32.xlu1 %v939_v46 }
 0x710   :  { %v938_v47 = vpop.xlane.xlu0 %937 }
 0x711   :  { %2982 = vrcp.f32 %v938_v47 }
 0x714   :  { %v941_v48 = vpop.xlane.xlu1 %940 }
 0x715   :  { %2984 = vrcp.f32 %v941_v48 }
 0x71b   :  { %v2983_v49 = vpop.eup %2982 }
 0x71c   :  { %v944_v50 = vmul.f32 %v2983_v49, %v2979_v43 }
 0x71e   :  { %2797 = vmatmul.mubr.msk.f32.vlgmr.msra.gmra.mrb[20].mxu0 %vm439_vm5, %v944_v50 }
 0x71f   :  { %v2985_v52 = vpop.eup %2984  ;;  %2806 = vmatprep.mubr.msk.bf16.mxu0 %vm3007_vm1, %v3006_v9  ;;  %2805 = vmatpush3.bf16.msra.mxu0 %v1107_v59  ;;  %v2958_v59 = vld [vmem:[%s3449_s5 + $0x30] sm:$0xff]  }
 0x720   :  { %v945_v53 = vmul.f32 %v2985_v52, %v2981_v45  ;;  %2816 = vmatprep.subr.bf16.mxu0 %v3006_v9 }
 0x722   :  { %2802 = vmatmul.mubr.msk.f32.vlgmr.msra.gmra.mrb[16].mxu1 %vm439_vm5, %v945_v53 }
 0x723   :  { %2811 = vmatpush3.bf16.msra.mxu1 %v1153_v54  ;;  %2812 = vmatprep.mubr.msk.bf16.mxu1 %vm3007_vm1, %v3006_v9 }
 0x724   :  { %2824 = vmatprep.subr.bf16.mxu1 %v3006_v9 }
 0x726   :  { %2813 = vmatmul.mubr.msk.bf16.vlgmr.msra.gmra.mrb[20].mxu1 %vm265_vm2, %v595_v56  ;;  %v2956_v56 = vld [vmem:[%s3447_s3 + $0x30] sm:$0xff]  }
 0x727   :  { %2825 = vmatpush3.bf16.msra.mxu1 %v2950_v55  ;;  %2828 = vmatprep.mubr.msk.bf16.mxu1 %vm3007_vm1, %v3006_v9 }
 0x728   :  { %2826 = vmatprep.subr.bf16.mxu1 %v3006_v9 }
 0x72b   :  { %2827 = vmatpush3.bf16.msra.mxu1 %v2951_v57 }
 0x72c   :  { %2840 = vmatprep.subr.mxu1 %v3006_v9 }
 0x72e   :  { %2829 = vmatmul.mubr.msk.bf16.vlgmr.msra.gmra.mrb[24].mxu1 %vm53_vm0, %v3130_v23 }
 0x72f   :  { %2842 = vmatprep.mubr.msk.f32.mxu1 %vm3007_vm1, %v3006_v9 }
 0x7f1   :  { %v1017_v60 = vpop.f32.mrb[20].mxu0 }
 0x7f2   :  { %v2798_v61 = vpop.f32.mrb[21].mxu0 }
 0x7f3   :  { %v2586_v61 = vld [vmem:[%s3452_s6 + $0x8] sm:$0xf] }
 0x7f5   :  { %v1092_v62 = vpop.f32.mrb[16].mxu1 }
 0x7f6   :  { %v1098_v63 = vcombine.low %v1017_v60, %v1092_v62  ;;  %v2803_v0 = vpop.f32.mrb[17].mxu1  ;;  %v2959_v60 = vld [vmem:[%s3449_s5 + $0x38] sm:$0xff]   ;;  %v1705_v62 = vsel %vm443_vm3, %v2586_v61, 0 }
 0x7f8   :  { %v1100_v3 = vpack.c.bf16 %v1098_v63, %v1098_v63 }
 0x7f9   :  { %v1189_v4 = vpop.f32.mrb[20].mxu1 }
 0x7fa   :  { %2807 = vmatmul.mubr.msk.bf16.vlgmr.msra.gmra.mrb[24].mxu0 %vm265_vm2, %v1100_v3  ;;  %v2814_v5 = vpop.f32.mrb[21].mxu1 }
 0x7fb   :  { %v1192_v6 = vpop.f32.mrb[22].mxu1  ;;  %2817 = vmatpush3.bf16.msra.mxu0 %v2952_v2  ;;  %2820 = vmatprep.mubr.msk.bf16.mxu0 %vm3007_vm1, %v3006_v9  ;;  %v2960_v5 = vld [vmem:[%s3448_s4 + $0x30] sm:$0xff]  }
 0x7fc   :  { %v2815_v8 = vpop.f32.mrb[23].mxu1  ;;  %2818 = vmatprep.subr.bf16.mxu0 %v3006_v9 }
 0x7ff   :  { %2819 = vmatpush3.bf16.msra.mxu0 %v2953_v7  ;;  %v2961_v7 = vld [vmem:[%s3448_s4 + $0x38] sm:$0xff]  }
 0x800   :  { %2832 = vmatprep.subr.bf16.mxu0 %v3006_v9 }
 0x801   :  { %v1305_v11 = vpop.f32.mrb[24].mxu1 }
 0x802   :  { %2821 = vmatmul.mubr.msk.bf16.vlgmr.msra.gmra.mrb[28].mxu0 %vm53_vm0, %v3130_v23  ;;  %v2830_v12 = vpop.f32.mrb[25].mxu1  ;;  %2841 = vmatpush3.xpose.msk.msra.mxu1 %vm265_vm2, %v1305_v11  ;;  %v1312_v21 = vcombine.high %v1305_v11, %v1305_v11 }
 0x803   :  { %v1308_v13 = vpop.f32.mrb[26].mxu1  ;;  %2833 = vmatpush3.bf16.msra.mxu0 %v2954_v10  ;;  %2836 = vmatprep.mubr.msk.bf16.mxu0 %vm3007_vm1, %v3006_v9 }
 0x804   :  { %v2831_v15 = vpop.f32.mrb[27].mxu1  ;;  %2834 = vmatprep.subr.bf16.mxu0 %v3006_v9  ;;  %2845 = vmatprep.subr.mxu1 %v3006_v9 }
 0x807   :  { %2835 = vmatpush3.bf16.msra.mxu0 %v2955_v14 }
 0x808   :  { %2850 = vmatprep.subr.mxu0 %v3006_v9 }
 0x80a   :  { %2837 = vmatmul.mubr.msk.bf16.vlgmr.msra.gmra.mrb[32].mxu0 %vm53_vm0, %v3130_v23 }
 0x80b   :  { %2852 = vmatprep.mubr.msk.f32.mxu0 %vm3007_vm1, %v3006_v9 }
 0x8cd   :  { %v1143_v16 = vpop.f32.mrb[24].mxu0 }
 0x8ce   :  { %v3291_v17 = vadd.f32 %v1189_v4, %v1143_v16  ;;  %v2808_v18 = vpop.f32.mrb[25].mxu0 }
 0x8cf   :  { %v1146_v19 = vpop.f32.mrb[26].mxu0 }
 0x8d0   :  { %v2809_v20 = vpop.f32.mrb[27].mxu0 }
 0x8d5   :  { %v1246_v22 = vpop.f32.mrb[28].mxu0 }
 0x8d6   :  { %v2822_v24 = vpop.f32.mrb[29].mxu0  ;;  %2843 = vmatmul.mubr.msk.f32.vlgmr.msra.gmra.mrb[18].mxu1 %vm265_vm2, %v1246_v22  ;;  %v1253_v26 = vcombine.high %v1246_v22, %v1246_v22 }
 0x8d7   :  { %2846 = vmatpush3.xpose.msk.msra.mxu1 %vm265_vm2, %v1312_v21  ;;  %v1249_v25 = vpop.f32.mrb[30].mxu0  ;;  %2847 = vmatprep.mubr.msk.f32.mxu1 %vm3007_vm1, %v3006_v9 }
 0x8d8   :  { %v2823_v27 = vpop.f32.mrb[31].mxu0  ;;  %2855 = vmatprep.subr.mxu1 %v3006_v9 }
 0x8da   :  { %2848 = vmatmul.mubr.msk.f32.vlgmr.msra.gmra.mrb[28].mxu1 %vm265_vm2, %v1253_v26 }
 0x8db   :  { %2857 = vmatprep.mubr.msk.f32.mxu1 %vm3007_vm1, %v3006_v9 }
 0x8dd   :  { %v1364_v28 = vpop.f32.mrb[32].mxu0 }
 0x8de   :  { %v1371_v29 = vcombine.high %v1364_v28, %v1364_v28  ;;  %v2838_v30 = vpop.f32.mrb[33].mxu0  ;;  %2851 = vmatpush3.msk.msra.mxu0 %vm443_vm3, %v1364_v28 }
 0x8df   :  { %v1367_v31 = vpop.f32.mrb[34].mxu0  ;;  %2860 = vmatprep.subr.bf16.mxu0 %v3006_v9 }
 0x8e0   :  { %v2839_v32 = vpop.f32.mrb[35].mxu0  ;;  %2856 = vmatpush3.msk.msra.mxu1 %vm443_vm3, %v1371_v29 }
 0x8e1   :  { %2866 = vmatprep.subr.bf16.mxu1 %v3006_v9 }
 0x9a9   :  { %v1442_v33 = vpop.f32.mrb[18].mxu1 }
 0x9aa   :  { %v1520_v34 = vmul.f32 0.35355338, %v1442_v33  ;;  %v2844_v35 = vpop.f32.mrb[19].mxu1 }
 0x9ac   :  { %v1522_v36 = vsel %vm416_vm4, %v1520_v34, -inf }
 0x9ad   :  { %1523 = vmax.xlane.f32.xlu0 %v1522_v36  ;;  %v1516_v37 = vpop.f32.mrb[28].mxu1 }
 0x9ae   :  { %v1521_v38 = vmul.f32 0.35355338, %v1516_v37  ;;  %v2849_v39 = vpop.f32.mrb[29].mxu1 }
 0x9b0   :  { %v1525_v40 = vsel %vm416_vm4, %v1521_v38, -inf }
 0x9b1   :  { %1526 = vmax.xlane.f32.xlu1 %v1525_v40 }
 0xa3a   :  { %v1524_v41 = vpop.xlane.xlu0 %1523 }
 0xa3b   :  { %v1528_v42 = vsub.f32 %v1520_v34, %v1524_v41 }
 0xa3d   :  { %v1530_v43 = vmul.f32 1.442695, %v1528_v42 }
 0xa3e   :  { %v1527_v44 = vpop.xlane.xlu1 %1526 }
 0xa3f   :  { %2986 = vpow2.f32 %v1530_v43  ;;  %v1529_v45 = vsub.f32 %v1521_v38, %v1527_v44 }
 0xa41   :  { %v1532_v46 = vmul.f32 1.442695, %v1529_v45 }
 0xa43   :  { %2988 = vpow2.f32 %v1532_v46 }
 0xa49   :  { %v2987_v47 = vpop.eup %2986 }
 0xa4a   :  { %v1534_v48 = vsel %vm416_vm4, %v2987_v47, 0.0 }
 0xa4b   :  { %1535 = vadd.xlane.f32.xlu0 %v1534_v48 }
 0xa4d   :  { %v2989_v49 = vpop.eup %2988 }
 0xa4e   :  { %v1537_v50 = vsel %vm416_vm4, %v2989_v49, 0.0 }
 0xa4f   :  { %1538 = vadd.xlane.f32.xlu1 %v1537_v50 }
 0xad8   :  { %v1536_v51 = vpop.xlane.xlu0 %1535 }
 0xad9   :  { %2990 = vrcp.f32 %v1536_v51 }
 0xadc   :  { %v1539_v52 = vpop.xlane.xlu1 %1538 }
 0xadd   :  { %2992 = vrcp.f32 %v1539_v52 }
 0xae3   :  { %v2991_v53 = vpop.eup %2990 }
 0xae4   :  { %v1542_v54 = vmul.f32 %v2991_v53, %v2987_v47  ;;  %v2617_v53 = vld [vmem:[%s3452_s6 + $0xc] sm:$0xf] }
 0xae6   :  { %2853 = vmatmul.mubr.msk.f32.vlgmr.msra.gmra.mrb[22].mxu0 %vm439_vm5, %v1542_v54  ;;  %v2258_v54 = vsel %vm443_vm3, %v2617_v53, 0 }
 0xae7   :  { %v2993_v55 = vpop.eup %2992  ;;  %2862 = vmatprep.mubr.msk.bf16.mxu0 %vm3007_vm1, %v3006_v9  ;;  %2861 = vmatpush3.bf16.msra.mxu0 %v1705_v62 }
 0xae8   :  { %v1543_v57 = vmul.f32 %v2993_v55, %v2989_v49  ;;  %2874 = vmatprep.subr.bf16.mxu0 %v3006_v9 }
 0xaea   :  { %2858 = vmatmul.mubr.msk.f32.vlgmr.msra.gmra.mrb[30].mxu1 %vm439_vm5, %v1543_v57 }
 0xaeb   :  { %2867 = vmatpush3.bf16.msra.mxu1 %v2956_v56  ;;  %2870 = vmatprep.mubr.msk.bf16.mxu1 %vm3007_vm1, %v3006_v9 }
 0xaec   :  { %2868 = vmatprep.subr.bf16.mxu1 %v3006_v9 }
 0xaef   :  { %2869 = vmatpush3.bf16.msra.mxu1 %v2957_v58 }
 0xaf0   :  { %2882 = vmatprep.subr.bf16.mxu1 %v3006_v9 }
 0xaf2   :  { %2871 = vmatmul.mubr.msk.bf16.vlgmr.msra.gmra.mrb[32].mxu1 %vm53_vm0, %v3130_v23 }
 0xaf3   :  { %2883 = vmatpush3.bf16.msra.mxu1 %v2958_v59  ;;  %2886 = vmatprep.mubr.msk.bf16.mxu1 %vm3007_vm1, %v3006_v9 }
 0xaf4   :  { %2884 = vmatprep.subr.bf16.mxu1 %v3006_v9 }
 0xaf7   :  { %2885 = vmatpush3.bf16.msra.mxu1 %v2959_v60 }
 0xaf8   :  { %2900 = vmatprep.subr.mxu1 %v3006_v9 }
 0xafa   :  { %2887 = vmatmul.mubr.msk.bf16.vlgmr.msra.gmra.mrb[36].mxu1 %vm53_vm0, %v3130_v23 }
 0xafb   :  { %2902 = vmatprep.mubr.msk.f32.mxu1 %vm3007_vm1, %v3006_v9 }
 0xbb9   :  { %v1615_v63 = vpop.f32.mrb[22].mxu0 }
 0xbba   :  { %v2854_v0 = vpop.f32.mrb[23].mxu0 }
 0xbbb   :  { %v2619_v0 = vld [vmem:[%s3453_s7] ss:$0 sm:$0xff] }
 0xbbd   :  { %v1690_v2 = vpop.f32.mrb[30].mxu1 }
 0xbbe   :  { %v1696_v3 = vcombine.low %v1615_v63, %v1690_v2  ;;  %v2859_v4 = vpop.f32.mrb[31].mxu1 }
 0xbc0   :  { %v1698_v6 = vpack.c.bf16 %v1696_v3, %v1696_v3 }
 0xbc2   :  { %2863 = vmatmul.mubr.msk.bf16.vlgmr.msra.gmra.mrb[36].mxu0 %vm265_vm2, %v1698_v6 }
 0xbc3   :  { %2875 = vmatpush3.bf16.msra.mxu0 %v2960_v5  ;;  %2878 = vmatprep.mubr.msk.bf16.mxu0 %vm3007_vm1, %v3006_v9 }
 0xbc4   :  { %2876 = vmatprep.subr.bf16.mxu0 %v3006_v9 }
 0xbc5   :  { %v1799_v8 = vpop.f32.mrb[32].mxu1 }
 0xbc6   :  { %v2872_v10 = vpop.f32.mrb[33].mxu1 }
 0xbc7   :  { %v1802_v11 = vpop.f32.mrb[34].mxu1  ;;  %2877 = vmatpush3.bf16.msra.mxu0 %v2961_v7 }
 0xbc8   :  { %v2873_v12 = vpop.f32.mrb[35].mxu1  ;;  %2890 = vmatprep.subr.mxu0 %v3006_v9 }
 0xbca   :  { %2879 = vmatmul.mubr.msk.bf16.vlgmr.msra.gmra.mrb[40].mxu0 %vm53_vm0, %v3130_v23 }
 0xbcb   :  { %2892 = vmatprep.mubr.msk.f32.mxu0 %vm3007_vm1, %v3006_v9 }
 0xbcd   :  { %v1917_v13 = vpop.f32.mrb[36].mxu1 }
 0xbce   :  { %v2888_v14 = vpop.f32.mrb[37].mxu1  ;;  %2901 = vmatpush3.msk.msra.mxu1 %vm443_vm3, %v1917_v13  ;;  %v1924_v28 = vcombine.high %v1917_v13, %v1917_v13  ;;  %v2962_v13 = vld [vmem:[%s3454_s10] sm:$0xff]  }
 0xbcf   :  { %v1920_v15 = vpop.f32.mrb[38].mxu1  ;;  %2910 = vmatprep.subr.bf16.mxu1 %v3006_v9 }
 0xbd0   :  { %v2889_v16 = vpop.f32.mrb[39].mxu1 }
 0xc95   :  { %v1741_v18 = vpop.f32.mrb[36].mxu0 }
 0xc96   :  { %v3362_v19 = vadd.f32 %v1741_v18, %v3291_v17  ;;  %v2864_v20 = vpop.f32.mrb[37].mxu0  ;;  %v1806_v17 = vcombine.high %v1799_v8, %v1799_v8 }
 0xc97   :  { %v1744_v21 = vpop.f32.mrb[38].mxu0 }
 0xc98   :  { %v2865_v22 = vpop.f32.mrb[39].mxu0  ;;  %v2621_v21 = vld [vmem:[%s3456_s9] ss:$0 sm:$0xff] }
 0xc9d   :  { %v1858_v24 = vpop.f32.mrb[40].mxu0 }
 0xc9e   :  { %v2880_v23 = vpop.f32.mrb[41].mxu0  ;;  %2891 = vmatpush3.xpose.msk.msra.mxu0 %vm265_vm2, %v1858_v24  ;;  %v1865_v26 = vcombine.high %v1858_v24, %v1858_v24 }
 0xc9f   :  { %v1861_v25 = vpop.f32.mrb[42].mxu0  ;;  %2895 = vmatprep.subr.mxu0 %v3006_v9 }
 0xca0   :  { %v2881_v27 = vpop.f32.mrb[43].mxu0  ;;  %v2964_v25 = vld [vmem:[%s3457_s12] sm:$0xff]  }
 0xca1   :  { %2893 = vmatmul.mubr.msk.f32.vlgmr.msra.gmra.mrb[44].mxu0 %vm265_vm2, %v1799_v8  ;;  %v2966_v27 = vld [vmem:[%s3457_s12 + $0x10] sm:$0xff]  }
 0xca2   :  { %2896 = vmatpush3.xpose.msk.msra.mxu0 %vm265_vm2, %v1865_v26  ;;  %2897 = vmatprep.mubr.msk.f32.mxu0 %vm3007_vm1, %v3006_v9  ;;  %v2965_v26 = vld [vmem:[%s3457_s12 + $0x8] sm:$0xff]  }
 0xca3   :  { %2905 = vmatprep.subr.mxu0 %v3006_v9 }
 0xca5   :  { %2898 = vmatmul.mubr.msk.f32.vlgmr.msra.gmra.mrb[46].mxu0 %vm265_vm2, %v1806_v17  ;;  %v2967_v17 = vld [vmem:[%s3457_s12 + $0x18] sm:$0xff]  }
 0xca6   :  { %2906 = vmatpush3.msk.msra.mxu0 %vm443_vm3, %v1924_v28  ;;  %2907 = vmatprep.mubr.msk.f32.mxu0 %vm3007_vm1, %v3006_v9  ;;  %v2622_v28 = vld [vmem:[%s3458_s11] ss:$0 sm:$0xff] }
 0xca7   :  { %2916 = vmatprep.subr.bf16.mxu0 %v3006_v9 }
 0xd74   :  { %v1995_v29 = vpop.f32.mrb[44].mxu0 }
 0xd75   :  { %v2073_v30 = vmul.f32 0.35355338, %v1995_v29  ;;  %v2894_v31 = vpop.f32.mrb[45].mxu0 }
 0xd77   :  { %v2075_v32 = vsel %vm416_vm4, %v2073_v30, -inf }
 0xd78   :  { %2076 = vmax.xlane.f32.xlu0 %v2075_v32  ;;  %v2069_v33 = vpop.f32.mrb[46].mxu0 }
 0xd79   :  { %v2074_v34 = vmul.f32 0.35355338, %v2069_v33  ;;  %v2899_v35 = vpop.f32.mrb[47].mxu0 }
 0xd7b   :  { %v2078_v36 = vsel %vm416_vm4, %v2074_v34, -inf }
 0xd7c   :  { %2079 = vmax.xlane.f32.xlu1 %v2078_v36 }
 0xe05   :  { %v2077_v37 = vpop.xlane.xlu0 %2076 }
 0xe06   :  { %v2081_v38 = vsub.f32 %v2073_v30, %v2077_v37 }
 0xe08   :  { %v2083_v39 = vmul.f32 1.442695, %v2081_v38 }
 0xe09   :  { %v2080_v40 = vpop.xlane.xlu1 %2079 }
 0xe0a   :  { %2994 = vpow2.f32 %v2083_v39  ;;  %v2082_v41 = vsub.f32 %v2074_v34, %v2080_v40 }
 0xe0c   :  { %v2085_v42 = vmul.f32 1.442695, %v2082_v41 }
 0xe0e   :  { %2996 = vpow2.f32 %v2085_v42 }
 0xe14   :  { %v2995_v43 = vpop.eup %2994 }
 0xe15   :  { %v2087_v44 = vsel %vm416_vm4, %v2995_v43, 0.0 }
 0xe16   :  { %2088 = vadd.xlane.f32.xlu0 %v2087_v44  ;;  %v2631_v44 = vld [vmem:[%s3459_s13] ss:$0 sm:$0xff] }
 0xe18   :  { %v2997_v45 = vpop.eup %2996 }
 0xe19   :  { %v2090_v46 = vsel %vm416_vm4, %v2997_v45, 0.0 }
 0xe1a   :  { %2091 = vadd.xlane.f32.xlu1 %v2090_v46 }
 0xea3   :  { %v2089_v47 = vpop.xlane.xlu0 %2088 }
 0xea4   :  { %2998 = vrcp.f32 %v2089_v47 }
 0xea7   :  { %v2092_v48 = vpop.xlane.xlu1 %2091 }
 0xea8   :  { %3000 = vrcp.f32 %v2092_v48 }
 0xeae   :  { %v2999_v49 = vpop.eup %2998 }
 0xeaf   :  { %v2095_v50 = vmul.f32 %v2999_v49, %v2995_v43 }
 0xeb1   :  { %2903 = vmatmul.mubr.msk.f32.vlgmr.msra.gmra.mrb[40].mxu1 %vm439_vm5, %v2095_v50 }
 0xeb2   :  { %v3001_v51 = vpop.eup %3000  ;;  %2912 = vmatprep.mubr.msk.bf16.mxu1 %vm3007_vm1, %v3006_v9  ;;  %2911 = vmatpush3.bf16.msra.mxu1 %v2258_v54 }
 0xeb3   :  { %v2096_v52 = vmul.f32 %v3001_v51, %v2997_v45  ;;  %2924 = vmatprep.subr.bf16.mxu1 %v3006_v9 }
 0xeb5   :  { %2908 = vmatmul.mubr.msk.f32.vlgmr.msra.gmra.mrb[48].mxu0 %vm439_vm5, %v2096_v52 }
 0xeb6   :  { %2920 = vmatprep.mubr.msk.bf16.mxu0 %vm3007_vm1, %v3006_v9  ;;  %2917 = vmatpush3.bf16.msra.mxu0 %v2962_v13 }
 0xeb7   :  { %2918 = vmatprep.subr.bf16.mxu0 %v3006_v9 }
 0xf84   :  { %v2168_v55 = vpop.f32.mrb[40].mxu1 }
 0xf85   :  { %v2904_v56 = vpop.f32.mrb[41].mxu1 }
 0xf88   :  { %v2243_v57 = vpop.f32.mrb[48].mxu0 }
 0xf89   :  { %v2249_v58 = vcombine.low %v2168_v55, %v2243_v57  ;;  %v2909_v59 = vpop.f32.mrb[49].mxu0 }
 0xf8b   :  { %v2251_v60 = vpack.c.bf16 %v2249_v58, %v2249_v58 }
 0xf8d   :  { %2913 = vmatmul.mubr.msk.bf16.vlgmr.msra.gmra.mrb[44].mxu1 %vm265_vm2, %v2251_v60 }
 0xf8e   :  { %2932 = vmatprep.mubr.msk.bf16.mxu1 %vm3007_vm1, %v3006_v9  ;;  %2925 = vmatpush3.bf16.msra.mxu1 %v2964_v25 }
 0xf8f   :  { %2926 = vmatprep.subr.bf16.mxu1 %v3006_v9 }
 0xf92   :  { %2927 = vmatpush3.bf16.msra.mxu1 %v2965_v26 }
 0xf93   :  { %2928 = vmatprep.subr.bf16.mxu1 %v3006_v9 }
 0xf96   :  { %2929 = vmatpush3.bf16.msra.mxu1 %v2966_v27 }
 0xf97   :  { %2930 = vmatprep.subr.bf16.mxu1 %v3006_v9 }
 0xf9a   :  { %2931 = vmatpush3.bf16.msra.mxu1 %v2967_v17 }
0x1060   :  { %v2294_v61 = vpop.f32.mrb[44].mxu1 }
0x1061   :  { %v2300_v62 = vadd.f32 %v2294_v61, %v3362_v19  ;;  %v2914_v63 = vpop.f32.mrb[45].mxu1  ;;  %v2620_v19 = vld [vmem:[%s3455_s8] ss:$0 sm:$0xff] }
0x1062   :  { %v2297_v2 = vpop.f32.mrb[46].mxu1 }
0x1063   :  { %v2301_v3 = vadd.f32 %v2300_v62, %v3093_v1  ;;  %v2915_v4 = vpop.f32.mrb[47].mxu1  ;;  %v2963_v1 = vld [vmem:[%s3454_s10 + $0x8] sm:$0xff]  }
0x1064   :  { %2919 = vmatpush3.bf16.msra.mxu0 %v2963_v1 }
0x1065   :  { %v3399_v5 = vadd.f32 %v2619_v0, %v2301_v3 }
0x1067   :  { %v2312_v6 = vsel %vm53_vm0, %v3399_v5, 0.0 }
0x1068   :  { %2313 = vadd.xlane.f32.xlu0 %v2312_v6 }
0x10f5   :  { %v2314_v7 = vpop.xlane.xlu0 %2313 }
0x10f6   :  { %v2315_v8 = vmul.f32 0.03125, %v2314_v7 }
0x10f8   :  { %v2316_v10 = vsub.f32 %v3399_v5, %v2315_v8 }
0x10fa   :  { %v2317_v11 = vmul.f32 %v2316_v10, %v2316_v10 }
0x10fc   :  { %v2318_v12 = vsel %vm53_vm0, %v2317_v11, 0.0 }
0x10fd   :  { %2319 = vadd.xlane.f32.xlu1 %v2318_v12 }
0x118a   :  { %v2320_v14 = vpop.xlane.xlu1 %2319 }
0x118b   :  { %v2321_v15 = vmul.f32 0.03125, %v2320_v14 }
0x118d   :  { %v2322_v16 = vadd.f32 1e-05, %v2321_v15 }
0x118f   :  { %3002 = vrsqrt.f32 %v2322_v16 }
0x1199   :  { %v3003_v18 = vpop.eup %3002 }
0x119a   :  { %v2324_v20 = vmul.f32 %v3003_v18, %v2316_v10 }
0x119c   :  { %v2331_v22 = vmul.f32 %v2620_v19, %v2324_v20 }
0x119e   :  { %v2338_v24 = vadd.f32 %v2621_v21, %v2331_v22 }
0x11a0   :  { %v2339_v23 = vpack.c.bf16 %v2338_v24, %v2338_v24 }
0x11a2   :  { %2921 = vmatmul.mubr.msk.bf16.vlgmr.msra.gmra.mrb[52].mxu0 %vm53_vm0, %v2339_v23 }
0x1275   :  { %v2400_v29 = vpop.f32.mrb[52].mxu0 }
0x1276   :  { %v2401_v30 = vadd.f32 %v2622_v28, %v2400_v29  ;;  %v2922_v31 = vpop.f32.mrb[53].mxu0 }
0x1277   :  { %v2403_v32 = vpop.f32.mrb[54].mxu0 }
0x1278   :  { %v2406_v33 = vmul.f32 %v2401_v30, %v2401_v30  ;;  %v2923_v34 = vpop.f32.mrb[55].mxu0 }
0x127a   :  { %v2407_v35 = vmul.f32 %v2406_v33, %v2401_v30 }
0x127c   :  { %v2408_v36 = vmul.f32 0.044715, %v2407_v35 }
0x127e   :  { %v2409_v37 = vadd.f32 %v2408_v36, %v2401_v30 }
0x1280   :  { %v2410_v38 = vmul.f32 0.7978846, %v2409_v37 }
0x1282   :  { %3004 = vtanh.f32 %v2410_v38 }
0x128c   :  { %v3005_v9 = vpop.eup %3004 }
0x128d   :  { %v2412_v39 = vadd.f32 1.0, %v3005_v9 }
0x128f   :  { %v2413_v40 = vmul.f32 0.5, %v2412_v39 }
0x1291   :  { %v2414_v41 = vmul.f32 %v2413_v40, %v2401_v30 }
0x1293   :  { %v2415_v42 = vpack.c.bf16 %v2414_v41, %v2414_v41 }
0x1295   :  { %2933 = vmatmul.mubr.msk.bf16.vlgmr.msra.gmra.mrb[48].mxu1 %vm2448_vm6, %v2415_v42 }
0x1368   :  { %v2486_v43 = vpop.f32.mrb[48].mxu1 }
0x1369   :  { %v2492_v45 = vadd.f32 %v2486_v43, %v3399_v5  ;;  %v2934_v46 = vpop.f32.mrb[49].mxu1 }
0x136a   :  { %v2489_v47 = vpop.f32.mrb[50].mxu1 }
0x136b   :  { %v2500_v48 = vadd.f32 %v2631_v44, %v2492_v45  ;;  %v2935_v49 = vpop.f32.mrb[51].mxu1 }
0x136d   :  { %2501 = vst.msk [vmem:[%s3446_s14] sm:$0xff] %vm53_vm0, %v2500_v48 }

// kernel: mae_forward.9
= control target key start
LH: loop header
LB: loop body
LE: loop exit
PB: predicated region body
PF: predicated region fallthrough
CT: control target
= control target key end

     0   :  { %vm27_vm0 = vcmask 392192   ;;  %vm213_vm1 = vcmask 523264   ;;  %s358_s0 = inlined_call_operand.vmem [shape: f32[32,48], index: 0, kind: input, shape index: {}]   ;;  %s359_s3 = inlined_call_operand.vmem [shape: bf16[48,64], index: 3, kind: input, shape index: {}]   ;;  %s360_s1 = inlined_call_operand.vmem [shape: f32[1,48], index: 1, kind: input, shape index: {}]   ;;  %s361_s2 = inlined_call_operand.vmem [shape: f32[1,48], index: 2, kind: input, shape index: {}]   ;;  %s362_s4 = inlined_call_operand.vmem [shape: f32[1,64], index: 4, kind: input, shape index: {}]   ;;  %s363_s5 = inlined_call_operand.vmem [shape: f32[32,64], index: 5, kind: output, shape index: {}]  }
   0x1   :  { %v21_v0 = vld [vmem:[%s358_s0] sm:$0xff]  ;;  %v23_v1 = vld [vmem:[%s358_s0 + $0x10] sm:$0xff]  ;;  %v22_v2 = vld [vmem:[%s358_s0 + $0x8] sm:$0xff] }
   0x2   :  { %v28_v3 = vsel %vm27_vm0, %v21_v0, 0.0  ;;  %v34_v4 = vsel %vm27_vm0, %v23_v1, 0.0  ;;  %v24_v5 = vld [vmem:[%s358_s0 + $0x18] sm:$0xff]  ;;  %v31_v6 = vsel %vm27_vm0, %v22_v2, 0.0  ;;  %v249_v28 = vld [vmem:[%s359_s3] sm:$0xff]   ;;  %v250_v29 = vld [vmem:[%s359_s3 + $0x8] sm:$0xff]  }
   0x3   :  { %29 = vadd.xlane.f32.xlu0 %v28_v3  ;;  %35 = vadd.xlane.f32.xlu1 %v34_v4  ;;  %v37_v7 = vsel %vm27_vm0, %v24_v5, 0.0  ;;  %v251_v30 = vld [vmem:[%s359_s3 + $0x10] sm:$0xff]   ;;  %v222_v44 = vld [vmem:[%s360_s1] ss:$0 sm:$0xff] }
   0x4   :  { %239 = vmatprep.subr.bf16.mxu0 %v249_v28  ;;  %v223_v46 = vld [vmem:[%s361_s2] ss:$0 sm:$0xff] }
   0x5   :  { %240 = vmatpush3.bf16.msra.mxu0 %v249_v28 }
   0x6   :  { %241 = vmatprep.subr.bf16.mxu0 %v250_v29 }
   0x7   :  { %32 = vadd.xlane.f32.xlu0 %v31_v6  ;;  %38 = vadd.xlane.f32.xlu1 %v37_v7 }
   0x9   :  { %242 = vmatpush3.bf16.msra.mxu0 %v250_v29 }
   0xa   :  { %243 = vmatprep.subr.bf16.mxu0 %v251_v30 }
   0xd   :  { %244 = vmatpush3.bf16.msra.mxu0 %v251_v30 }
  0x90   :  { %v30_v8 = vpop.xlane.xlu0 %29  ;;  %v36_v9 = vpop.xlane.xlu1 %35 }
  0x91   :  { %v41_v10 = vmul.f32 0.020833334, %v30_v8  ;;  %v43_v11 = vmul.f32 0.020833334, %v36_v9 }
  0x93   :  { %v45_v12 = vsub.f32 %v21_v0, %v41_v10  ;;  %v47_v13 = vsub.f32 %v23_v1, %v43_v11 }
  0x94   :  { %v33_v14 = vpop.xlane.xlu0 %32  ;;  %v39_v15 = vpop.xlane.xlu1 %38 }
  0x95   :  { %v42_v16 = vmul.f32 0.020833334, %v33_v14  ;;  %v44_v17 = vmul.f32 0.020833334, %v39_v15  ;;  %v49_v18 = vmul.f32 %v45_v12, %v45_v12  ;;  %v51_v19 = vmul.f32 %v47_v13, %v47_v13  ;;  %v228_v15 = vld [vmem:[%s362_s4] ss:$0 sm:$0xff] }
  0x97   :  { %v46_v20 = vsub.f32 %v22_v2, %v42_v16  ;;  %v48_v21 = vsub.f32 %v24_v5, %v44_v17  ;;  %v53_v22 = vsel %vm27_vm0, %v49_v18, 0.0  ;;  %v59_v23 = vsel %vm27_vm0, %v51_v19, 0.0 }
  0x98   :  { %54 = vadd.xlane.f32.xlu0 %v53_v22 }
  0x99   :  { %v50_v24 = vmul.f32 %v46_v20, %v46_v20  ;;  %v52_v25 = vmul.f32 %v48_v21, %v48_v21 }
  0x9b   :  { %v56_v26 = vsel %vm27_vm0, %v50_v24, 0.0  ;;  %v62_v27 = vsel %vm27_vm0, %v52_v25, 0.0 }
  0x9c   :  { %60 = vadd.xlane.f32.xlu0 %v59_v23  ;;  %57 = vadd.xlane.f32.xlu1 %v56_v26 }
  0xa0   :  { %63 = vadd.xlane.f32.xlu1 %v62_v27 }
 0x125   :  { %v55_v31 = vpop.xlane.xlu0 %54 }
 0x126   :  { %v65_v32 = vmul.f32 0.020833334, %v55_v31 }
 0x128   :  { %v69_v33 = vadd.f32 1e-05, %v65_v32 }
 0x129   :  { %v58_v34 = vpop.xlane.xlu1 %57  ;;  %v61_v35 = vpop.xlane.xlu0 %60 }
 0x12a   :  { %252 = vrsqrt.f32 %v69_v33  ;;  %v66_v36 = vmul.f32 0.020833334, %v58_v34  ;;  %v67_v37 = vmul.f32 0.020833334, %v61_v35 }
 0x12c   :  { %v70_v38 = vadd.f32 1e-05, %v66_v36  ;;  %v71_v39 = vadd.f32 1e-05, %v67_v37 }
 0x12d   :  { %v64_v40 = vpop.xlane.xlu1 %63 }
 0x12e   :  { %254 = vrsqrt.f32 %v70_v38  ;;  %v68_v41 = vmul.f32 0.020833334, %v64_v40 }
 0x12f   :  { %256 = vrsqrt.f32 %v71_v39 }
 0x130   :  { %v72_v42 = vadd.f32 1e-05, %v68_v41 }
 0x132   :  { %258 = vrsqrt.f32 %v72_v42 }
 0x134   :  { %v253_v43 = vpop.eup %252 }
 0x135   :  { %v77_v45 = vmul.f32 %v253_v43, %v45_v12 }
 0x137   :  { %v87_v47 = vmul.f32 %v222_v44, %v77_v45 }
 0x138   :  { %v255_v48 = vpop.eup %254 }
 0x139   :  { %v257_v49 = vpop.eup %256  ;;  %v97_v50 = vadd.f32 %v223_v46, %v87_v47  ;;  %v78_v51 = vmul.f32 %v255_v48, %v46_v20 }
 0x13a   :  { %v79_v52 = vmul.f32 %v257_v49, %v47_v13 }
 0x13b   :  { %v88_v53 = vmul.f32 %v222_v44, %v78_v51  ;;  %v224_v54 = vmul.f32 -1.442695, %v97_v50 }
 0x13c   :  { %v259_v55 = vpop.eup %258  ;;  %v89_v56 = vmul.f32 %v222_v44, %v79_v52 }
 0x13d   :  { %v98_v57 = vadd.f32 %v223_v46, %v88_v53  ;;  %v80_v58 = vmul.f32 %v259_v55, %v48_v21  ;;  %260 = vpow2.f32 %v224_v54 }
 0x13e   :  { %v99_v59 = vadd.f32 %v223_v46, %v89_v56 }
 0x13f   :  { %v90_v60 = vmul.f32 %v222_v44, %v80_v58  ;;  %v225_v61 = vmul.f32 -1.442695, %v98_v57 }
 0x140   :  { %v226_v62 = vmul.f32 -1.442695, %v99_v59 }
 0x141   :  { %v100_v63 = vadd.f32 %v223_v46, %v90_v60  ;;  %262 = vpow2.f32 %v225_v61 }
 0x142   :  { %264 = vpow2.f32 %v226_v62 }
 0x143   :  { %v227_v0 = vmul.f32 -1.442695, %v100_v63 }
 0x145   :  { %266 = vpow2.f32 %v227_v0 }
 0x147   :  { %v261_v1 = vpop.eup %260 }
 0x148   :  { %v113_v2 = vadd.f32 1.0, %v261_v1 }
 0x14a   :  { %268 = vrcp.f32 %v113_v2 }
 0x14b   :  { %v263_v3 = vpop.eup %262 }
 0x14c   :  { %v265_v4 = vpop.eup %264  ;;  %v114_v5 = vadd.f32 1.0, %v263_v3 }
 0x14d   :  { %v115_v6 = vadd.f32 1.0, %v265_v4 }
 0x14e   :  { %270 = vrcp.f32 %v114_v5 }
 0x14f   :  { %v267_v7 = vpop.eup %266  ;;  %272 = vrcp.f32 %v115_v6 }
 0x150   :  { %v116_v8 = vadd.f32 1.0, %v267_v7 }
 0x152   :  { %274 = vrcp.f32 %v116_v8 }
 0x154   :  { %v269_v9 = vpop.eup %268 }
 0x158   :  { %v271_v10 = vpop.eup %270 }
 0x159   :  { %v125_v11 = vpack.c.bf16 %v271_v10, %v269_v9  ;;  %v273_v12 = vpop.eup %272 }
 0x15b   :  { %245 = vmatprep.mubr.msk.bf16.mxu0 %vm27_vm0, %v125_v11 }
 0x15c   :  { %v275_v13 = vpop.eup %274 }
 0x15d   :  { %v126_v14 = vpack.c.bf16 %v275_v13, %v273_v12 }
 0x15f   :  { %246 = vmatmul.mubr.msk.bf16.vlgmr.msra.gmra.mrb[0].mxu0 %vm27_vm0, %v126_v14 }
 0x232   :  { %v247_v16 = vpop.f32.mrb[0].mxu0 }
 0x233   :  { %v207_v17 = vadd.f32 %v247_v16, %v228_v15  ;;  %v198_v18 = vpop.f32.mrb[1].mxu0 }
 0x234   :  { %v199_v19 = vadd.f32 %v228_v15, %v198_v18  ;;  %v248_v20 = vpop.f32.mrb[2].mxu0 }
 0x235   :  { %216 = vst.msk [vmem:[%s363_s5 + $0x10] sm:$0xff] %vm213_vm1, %v207_v17  ;;  %v210_v21 = vadd.f32 %v248_v20, %v228_v15  ;;  %v201_v22 = vpop.f32.mrb[3].mxu0 }
 0x236   :  { %214 = vst.msk [vmem:[%s363_s5] sm:$0xff] %vm213_vm1, %v199_v19  ;;  %v202_v23 = vadd.f32 %v228_v15, %v201_v22 }
 0x237   :  { %217 = vst.msk [vmem:[%s363_s5 + $0x18] sm:$0xff] %vm213_vm1, %v210_v21 }
 0x238   :  { %215 = vst.msk [vmem:[%s363_s5 + $0x8] sm:$0xff] %vm213_vm1, %v202_v23 }

// kernel: mae_forward.8
= control target key start
LH: loop header
LB: loop body
LE: loop exit
PB: predicated region body
PF: predicated region fallthrough
CT: control target
= control target key end

     0   :  { %vm56_vm0 = vcmask 392192   ;;  %vm368_vm1 = vcmask 130048   ;;  %vm3212_vm3 = vcmask 523264   ;;  %s4802_s0 = inlined_call_operand.vmem [shape: f32[32,48], index: 0, kind: input, shape index: {}]   ;;  %s4803_s14 = inlined_call_operand.vmem [shape: f32[32,48], index: 14, kind: output, shape index: {}]   ;;  %s4804_s3 = inlined_call_operand.vmem [shape: bf16[1,4,48,16], index: 3, kind: input, shape index: {}]   ;;  %s4805_s4 = inlined_call_operand.vmem [shape: bf16[1,4,48,16], index: 4, kind: input, shape index: {}]   ;;  %s4806_s5 = inlined_call_operand.vmem [shape: bf16[1,4,48,16], index: 5, kind: input, shape index: {}]   ;;  %s4807_s1 = inlined_call_operand.vmem [shape: f32[1,1,48], index: 1, kind: input, shape index: {}]   ;;  %s4808_s2 = inlined_call_operand.vmem [shape: f32[1,1,48], index: 2, kind: input, shape index: {}]   ;;  %s4809_s6 = inlined_call_operand.vmem [shape: bf16[1,4,16,48], index: 6, kind: input, shape index: {}]   ;;  %s4810_s7 = inlined_call_operand.vmem [shape: f32[1,1,48], index: 7, kind: input, shape index: {}]   ;;  %s4811_s10 = inlined_call_operand.vmem [shape: bf16[1,48,192], index: 10, kind: input, shape index: {}]   ;;  %s4812_s12 = inlined_call_operand.vmem [shape: bf16[1,192,48], index: 12, kind: input, shape index: {}]   ;;  %s4813_s8 = inlined_call_operand.vmem [shape: f32[1,1,48], index: 8, kind: input, shape index: {}]   ;;  %s4814_s9 = inlined_call_operand.vmem [shape: f32[1,1,48], index: 9, kind: input, shape index: {}]   ;;  %s4815_s11 = inlined_call_operand.vmem [shape: f32[1,1,192], index: 11, kind: input, shape index: {}]   ;;  %s4816_s13 = inlined_call_operand.vmem [shape: f32[1,1,48], index: 13, kind: input, shape index: {}]  }
   0x1   :  { %v52_v0 = vld [vmem:[%s4802_s0] sm:$0xff]  ;;  %v54_v1 = vld [vmem:[%s4802_s0 + $0x10] sm:$0xff]  ;;  %v53_v2 = vld [vmem:[%s4802_s0 + $0x8] sm:$0xff] }
   0x2   :  { %57 = vst.msk [vmem:[%s4803_s14] sm:$0xff] %vm56_vm0, %v52_v0  ;;  %59 = vst.msk [vmem:[%s4803_s14 + $0x10] sm:$0xff] %vm56_vm0, %v54_v1  ;;  %v55_v3 = vld [vmem:[%s4802_s0 + $0x18] sm:$0xff]  ;;  %v3984_v32 = vld [vmem:[%s4804_s3] sm:$0xff]  }
   0x3   :  { %58 = vst.msk [vmem:[%s4803_s14 + $0x8] sm:$0xff] %vm56_vm0, %v53_v2  ;;  %60 = vst.msk [vmem:[%s4803_s14 + $0x18] sm:$0xff] %vm56_vm0, %v55_v3  ;;  %3635 = vmatprep.subr.bf16.mxu1 %v3984_v32  ;;  %v3985_v33 = vld [vmem:[%s4804_s3 + $0x8] sm:$0xff]   ;;  %v3986_v34 = vld [vmem:[%s4804_s3 + $0x10] sm:$0xff]  }
   0x4   :  { %3636 = vmatpush3.bf16.msra.mxu1 %v3984_v32  ;;  %v3987_v35 = vld [vmem:[%s4805_s4] sm:$0xff]   ;;  %vm4321_vm2 = vmpackc.low %vm368_vm1, %vm368_vm1 }
   0x5   :  { %3637 = vmatprep.subr.bf16.mxu1 %v3985_v33  ;;  %v3291_v50 = vld [vmem:[%s4807_s1] ss:$0 sm:$0xff] }
   0x6   :  { %v3292_v55 = vld [vmem:[%s4808_s2] ss:$0 sm:$0xff] }
   0x8   :  { %3638 = vmatpush3.bf16.msra.mxu1 %v3985_v33 }
   0x9   :  { %v61_v4 = vld [vmem:[%s4803_s14] sm:$0xff]  ;;  %v63_v5 = vld [vmem:[%s4803_s14 + $0x10] sm:$0xff]  ;;  %3639 = vmatprep.subr.bf16.mxu1 %v3986_v34 }
   0xa   :  { %v62_v6 = vld [vmem:[%s4803_s14 + $0x8] sm:$0xff]  ;;  %v68_v7 = vsel %vm56_vm0, %v61_v4, 0.0  ;;  %v74_v8 = vsel %vm56_vm0, %v63_v5, 0.0  ;;  %v64_v9 = vld [vmem:[%s4803_s14 + $0x18] sm:$0xff] }
   0xb   :  { %69 = vadd.xlane.f32.xlu0 %v68_v7  ;;  %75 = vadd.xlane.f32.xlu1 %v74_v8  ;;  %v71_v10 = vsel %vm56_vm0, %v62_v6, 0.0  ;;  %v77_v11 = vsel %vm56_vm0, %v64_v9, 0.0  ;;  %v3991_v7 = vld [vmem:[%s4806_s5 + $0x8] sm:$0xff]   ;;  %v3992_v8 = vld [vmem:[%s4806_s5 + $0x10] sm:$0xff]  }
   0xc   :  { %3640 = vmatpush3.bf16.msra.mxu1 %v3986_v34 }
   0xd   :  { %3645 = vmatprep.subr.bf16.mxu1 %v3987_v35 }
   0xf   :  { %72 = vadd.xlane.f32.xlu0 %v71_v10  ;;  %78 = vadd.xlane.f32.xlu1 %v77_v11 }
  0x98   :  { %v70_v12 = vpop.xlane.xlu0 %69  ;;  %v76_v13 = vpop.xlane.xlu1 %75 }
  0x99   :  { %v81_v14 = vmul.f32 0.020833334, %v70_v12  ;;  %v83_v15 = vmul.f32 0.020833334, %v76_v13 }
  0x9b   :  { %v85_v16 = vsub.f32 %v61_v4, %v81_v14  ;;  %v87_v17 = vsub.f32 %v63_v5, %v83_v15  ;;  %v3988_v4 = vld [vmem:[%s4805_s4 + $0x8] sm:$0xff]   ;;  %v3989_v5 = vld [vmem:[%s4805_s4 + $0x10] sm:$0xff]  }
  0x9c   :  { %v73_v18 = vpop.xlane.xlu0 %72  ;;  %v79_v19 = vpop.xlane.xlu1 %78 }
  0x9d   :  { %v82_v20 = vmul.f32 0.020833334, %v73_v18  ;;  %v84_v21 = vmul.f32 0.020833334, %v79_v19  ;;  %v89_v22 = vmul.f32 %v85_v16, %v85_v16  ;;  %v91_v23 = vmul.f32 %v87_v17, %v87_v17 }
  0x9f   :  { %v86_v24 = vsub.f32 %v62_v6, %v82_v20  ;;  %v88_v25 = vsub.f32 %v64_v9, %v84_v21  ;;  %v93_v26 = vsel %vm56_vm0, %v89_v22, 0.0  ;;  %v99_v27 = vsel %vm56_vm0, %v91_v23, 0.0  ;;  %v3990_v6 = vld [vmem:[%s4806_s5] sm:$0xff]   ;;  %v3993_v21 = vld [vmem:[%s4805_s4 + $0x18] sm:$0xff]  }
  0xa0   :  { %94 = vadd.xlane.f32.xlu0 %v93_v26 }
  0xa1   :  { %v90_v28 = vmul.f32 %v86_v24, %v86_v24  ;;  %v92_v29 = vmul.f32 %v88_v25, %v88_v25 }
  0xa3   :  { %v96_v30 = vsel %vm56_vm0, %v90_v28, 0.0  ;;  %v102_v31 = vsel %vm56_vm0, %v92_v29, 0.0  ;;  %v3995_v28 = vld [vmem:[%s4805_s4 + $0x28] sm:$0xff]  }
  0xa4   :  { %100 = vadd.xlane.f32.xlu0 %v99_v27  ;;  %97 = vadd.xlane.f32.xlu1 %v96_v30  ;;  %v3994_v27 = vld [vmem:[%s4805_s4 + $0x20] sm:$0xff]  }
  0xa8   :  { %103 = vadd.xlane.f32.xlu1 %v102_v31 }
 0x12d   :  { %v95_v36 = vpop.xlane.xlu0 %94 }
 0x12e   :  { %v105_v37 = vmul.f32 0.020833334, %v95_v36 }
 0x130   :  { %v109_v38 = vadd.f32 1e-05, %v105_v37 }
 0x131   :  { %v98_v39 = vpop.xlane.xlu1 %97  ;;  %v101_v40 = vpop.xlane.xlu0 %100 }
 0x132   :  { %4045 = vrsqrt.f32 %v109_v38  ;;  %v106_v41 = vmul.f32 0.020833334, %v98_v39  ;;  %v107_v42 = vmul.f32 0.020833334, %v101_v40 }
 0x134   :  { %v110_v43 = vadd.f32 1e-05, %v106_v41  ;;  %v111_v44 = vadd.f32 1e-05, %v107_v42 }
 0x135   :  { %v104_v45 = vpop.xlane.xlu1 %103 }
 0x136   :  { %4047 = vrsqrt.f32 %v110_v43  ;;  %v108_v46 = vmul.f32 0.020833334, %v104_v45 }
 0x137   :  { %4049 = vrsqrt.f32 %v111_v44 }
 0x138   :  { %v112_v47 = vadd.f32 1e-05, %v108_v46 }
 0x13a   :  { %4051 = vrsqrt.f32 %v112_v47 }
 0x13c   :  { %v4046_v48 = vpop.eup %4045 }
 0x13d   :  { %v117_v49 = vmul.f32 %v4046_v48, %v85_v16 }
 0x13f   :  { %v127_v53 = vmul.f32 %v3291_v50, %v117_v49 }
 0x140   :  { %v4048_v51 = vpop.eup %4047 }
 0x141   :  { %v4050_v52 = vpop.eup %4049  ;;  %v118_v54 = vmul.f32 %v4048_v51, %v86_v24  ;;  %v137_v59 = vadd.f32 %v3292_v55, %v127_v53 }
 0x142   :  { %v119_v56 = vmul.f32 %v4050_v52, %v87_v17 }
 0x143   :  { %v128_v57 = vmul.f32 %v3291_v50, %v118_v54 }
 0x144   :  { %v4052_v58 = vpop.eup %4051  ;;  %v129_v61 = vmul.f32 %v3291_v50, %v119_v56 }
 0x145   :  { %v138_v60 = vadd.f32 %v3292_v55, %v128_v57  ;;  %v120_v62 = vmul.f32 %v4052_v58, %v88_v25 }
 0x146   :  { %v139_v1 = vadd.f32 %v3292_v55, %v129_v61 }
 0x147   :  { %v4287_v63 = vpack.c.bf16 %v138_v60, %v137_v59  ;;  %v130_v0 = vmul.f32 %v3291_v50, %v120_v62 }
 0x149   :  { %v140_v2 = vadd.f32 %v3292_v55, %v130_v0  ;;  %3641 = vmatprep.mubr.msk.bf16.mxu1 %vm56_vm0, %v4287_v63 }
 0x14b   :  { %v4291_v3 = vpack.c.bf16 %v140_v2, %v139_v1 }
 0x14d   :  { %3642 = vmatmul.mubr.msk.bf16.vlgmr.msra.gmra.mrb[0].mxu1 %vm56_vm0, %v4291_v3 }
 0x14e   :  { %3646 = vmatpush3.bf16.msra.mxu1 %v3987_v35  ;;  %3651 = vmatprep.mubr.msk.bf16.mxu1 %vm56_vm0, %v4287_v63 }
 0x14f   :  { %3647 = vmatprep.subr.bf16.mxu1 %v3988_v4 }
 0x152   :  { %3648 = vmatpush3.bf16.msra.mxu1 %v3988_v4 }
 0x153   :  { %3649 = vmatprep.subr.bf16.mxu1 %v3989_v5 }
 0x156   :  { %3650 = vmatpush3.bf16.msra.mxu1 %v3989_v5 }
 0x157   :  { %3655 = vmatprep.subr.bf16.mxu1 %v3990_v6 }
 0x159   :  { %3652 = vmatmul.mubr.msk.bf16.vlgmr.msra.gmra.mrb[4].mxu1 %vm56_vm0, %v4291_v3 }
 0x15a   :  { %3656 = vmatpush3.bf16.msra.mxu1 %v3990_v6  ;;  %3661 = vmatprep.mubr.msk.bf16.mxu1 %vm56_vm0, %v4287_v63 }
 0x15b   :  { %3657 = vmatprep.subr.bf16.mxu1 %v3991_v7 }
 0x15e   :  { %3658 = vmatpush3.bf16.msra.mxu1 %v3991_v7 }
 0x15f   :  { %3659 = vmatprep.subr.bf16.mxu1 %v3992_v8 }
 0x162   :  { %3660 = vmatpush3.bf16.msra.mxu1 %v3992_v8 }
 0x165   :  { %3662 = vmatmul.mubr.msk.bf16.vlgmr.msra.gmra.mrb[8].mxu1 %vm56_vm0, %v4291_v3 }
 0x220   :  { %v3643_v9 = vpop.f32.mrb[0].mxu1 }
 0x221   :  { %v207_v10 = vpop.f32.mrb[1].mxu1 }
 0x222   :  { %v3644_v11 = vpop.f32.mrb[2].mxu1  ;;  %3669 = vmatprep.mubr.msk.f32.mxu1 %vm368_vm1, %v207_v10 }
 0x223   :  { %v210_v12 = vpop.f32.mrb[3].mxu1 }
 0x22c   :  { %v3653_v13 = vpop.f32.mrb[4].mxu1 }
 0x22d   :  { %v280_v14 = vpop.f32.mrb[5].mxu1 }
 0x22e   :  { %v3654_v15 = vpop.f32.mrb[6].mxu1 }
 0x22f   :  { %v3897_v16 = vpack.c.bf16 %v3654_v15, %v3653_v13  ;;  %v283_v17 = vpop.f32.mrb[7].mxu1  ;;  %v3996_v13 = vld [vmem:[%s4804_s3 + $0x18] sm:$0xff]  }
 0x230   :  { %v3891_v19 = vpack.c.bf16 %v283_v17, %v280_v14 }
 0x232   :  { %3893 = vmatprep.subr.msk.bf16.mxu1 %vm4321_vm2, %v3891_v19 }
 0x233   :  { %3896 = vmatpush3.bf16.xpose.msk.msra.mxu1 %vm4321_vm2, %v3891_v19  ;;  %v3997_v19 = vld [vmem:[%s4804_s3 + $0x20] sm:$0xff]  }
 0x234   :  { %3899 = vmatprep.subr.msk.bf16.mxu1 %vm4321_vm2, %v3897_v16 }
 0x238   :  { %v3663_v20 = vpop.f32.mrb[8].mxu1 }
 0x239   :  { %v353_v22 = vpop.f32.mrb[9].mxu1 }
 0x23a   :  { %v3664_v23 = vpop.f32.mrb[10].mxu1  ;;  %3670 = vmatmul.mubr.msk.f32.vlgmr.msra.gmra.mrb[12].mxu1 %vm368_vm1, %v210_v12 }
 0x23b   :  { %v4335_v24 = vpack.c.bf16 %v3664_v23, %v3663_v20  ;;  %v356_v25 = vpop.f32.mrb[11].mxu1  ;;  %3902 = vmatpush3.bf16.xpose.msk.msra.mxu1 %vm4321_vm2, %v3897_v16  ;;  %3676 = vmatprep.mubr.msk.f32.mxu1 %vm368_vm1, %v3643_v9  ;;  %v3998_v20 = vld [vmem:[%s4804_s3 + $0x28] sm:$0xff]  }
 0x23c   :  { %v3903_v26 = vpack.c.bf16 %v356_v25, %v353_v22  ;;  %3703 = vmatprep.subr.bf16.mxu1 %v3993_v21  ;;  %v4000_v22 = vld [vmem:[%s4806_s5 + $0x20] sm:$0xff]   ;;  %v4001_v23 = vld [vmem:[%s4806_s5 + $0x28] sm:$0xff]  }
 0x23e   :  { %3904 = vmatprep.subr.bf16.mxu0 %v3903_v26 }
 0x23f   :  { %3906 = vmatpush3.bf16.msra.mxu0 %v3903_v26 }
 0x240   :  { %3908 = vmatprep.subr.bf16.mxu0 %v4335_v24 }
 0x242   :  { %3677 = vmatmul.mubr.msk.f32.vlgmr.msra.gmra.mrb[14].mxu1 %vm368_vm1, %v3644_v11 }
 0x243   :  { %3704 = vmatpush3.bf16.msra.mxu1 %v3993_v21  ;;  %3709 = vmatprep.mubr.msk.bf16.mxu1 %vm56_vm0, %v4287_v63  ;;  %v3999_v21 = vld [vmem:[%s4806_s5 + $0x18] sm:$0xff]  }
 0x244   :  { %3705 = vmatprep.subr.bf16.mxu1 %v3994_v27 }
 0x247   :  { %3706 = vmatpush3.bf16.msra.mxu1 %v3994_v27 }
 0x248   :  { %3707 = vmatprep.subr.bf16.mxu1 %v3995_v28 }
 0x24b   :  { %3708 = vmatpush3.bf16.msra.mxu1 %v3995_v28 }
 0x24e   :  { %3710 = vmatmul.mubr.msk.bf16.vlgmr.msra.gmra.mrb[16].mxu1 %vm56_vm0, %v4291_v3 }
 0x30d   :  { %v3671_v29 = vpop.f32.mrb[12].mxu1 }
 0x30e   :  { %v544_v30 = vmul.f32 0.25, %v3671_v29  ;;  %v447_v31 = vpop.f32.mrb[13].mxu1 }
 0x30f   :  { %v543_v32 = vmul.f32 0.25, %v447_v31 }
 0x310   :  { %v550_v33 = vsel %vm368_vm1, %v544_v30, -inf }
 0x311   :  { %551 = vmax.xlane.f32.xlu1 %v550_v33  ;;  %v547_v34 = vsel %vm368_vm1, %v543_v32, -inf }
 0x312   :  { %548 = vmax.xlane.f32.xlu0 %v547_v34 }
 0x315   :  { %v3678_v35 = vpop.f32.mrb[14].mxu1 }
 0x316   :  { %v546_v36 = vmul.f32 0.25, %v3678_v35  ;;  %v534_v37 = vpop.f32.mrb[15].mxu1 }
 0x317   :  { %v545_v38 = vmul.f32 0.25, %v534_v37 }
 0x318   :  { %v556_v39 = vsel %vm368_vm1, %v546_v36, -inf }
 0x319   :  { %557 = vmax.xlane.f32.xlu1 %v556_v39  ;;  %v553_v40 = vsel %vm368_vm1, %v545_v38, -inf }
 0x31a   :  { %554 = vmax.xlane.f32.xlu0 %v553_v40 }
 0x321   :  { %v3711_v41 = vpop.f32.mrb[16].mxu1 }
 0x322   :  { %v890_v42 = vpop.f32.mrb[17].mxu1 }
 0x323   :  { %v3712_v43 = vpop.f32.mrb[18].mxu1 }
 0x324   :  { %v4356_v44 = vpack.c.bf16 %v3712_v43, %v3711_v41  ;;  %v893_v45 = vpop.f32.mrb[19].mxu1 }
 0x325   :  { %v3911_v46 = vpack.c.bf16 %v893_v45, %v890_v42 }
 0x327   :  { %3913 = vmatprep.subr.msk.bf16.mxu1 %vm4321_vm2, %v3911_v46 }
 0x328   :  { %3916 = vmatpush3.bf16.xpose.msk.msra.mxu1 %vm4321_vm2, %v3911_v46 }
 0x329   :  { %3919 = vmatprep.subr.msk.bf16.mxu1 %vm4321_vm2, %v4356_v44 }
 0x39e   :  { %v552_v47 = vpop.xlane.xlu1 %551 }
 0x39f   :  { %v560_v48 = vsub.f32 %v544_v30, %v552_v47  ;;  %v549_v49 = vpop.xlane.xlu0 %548 }
 0x3a0   :  { %v559_v50 = vsub.f32 %v543_v32, %v549_v49 }
 0x3a1   :  { %v565_v51 = vmul.f32 1.442695, %v560_v48 }
 0x3a2   :  { %v563_v52 = vmul.f32 1.442695, %v559_v50 }
 0x3a3   :  { %4053 = vpow2.f32 %v565_v51 }
 0x3a4   :  { %4055 = vpow2.f32 %v563_v52 }
 0x3a6   :  { %v558_v53 = vpop.xlane.xlu1 %557 }
 0x3a7   :  { %v562_v54 = vsub.f32 %v546_v36, %v558_v53  ;;  %v555_v55 = vpop.xlane.xlu0 %554 }
 0x3a8   :  { %v561_v56 = vsub.f32 %v545_v38, %v555_v55 }
 0x3a9   :  { %v569_v57 = vmul.f32 1.442695, %v562_v54 }
 0x3aa   :  { %v567_v58 = vmul.f32 1.442695, %v561_v56 }
 0x3ab   :  { %4057 = vpow2.f32 %v569_v57 }
 0x3ac   :  { %4059 = vpow2.f32 %v567_v58 }
 0x3ad   :  { %v4054_v59 = vpop.eup %4053 }
 0x3ae   :  { %v4056_v60 = vpop.eup %4055  ;;  %v574_v61 = vsel %vm368_vm1, %v4054_v59, 0.0 }
 0x3af   :  { %575 = vadd.xlane.f32.xlu1 %v574_v61  ;;  %v571_v62 = vsel %vm368_vm1, %v4056_v60, 0.0 }
 0x3b0   :  { %572 = vadd.xlane.f32.xlu0 %v571_v62 }
 0x3b5   :  { %v4058_v0 = vpop.eup %4057 }
 0x3b6   :  { %v4060_v1 = vpop.eup %4059  ;;  %v580_v2 = vsel %vm368_vm1, %v4058_v0, 0.0 }
 0x3b7   :  { %581 = vadd.xlane.f32.xlu1 %v580_v2  ;;  %v577_v4 = vsel %vm368_vm1, %v4060_v1, 0.0 }
 0x3b8   :  { %578 = vadd.xlane.f32.xlu0 %v577_v4 }
 0x43c   :  { %v576_v5 = vpop.xlane.xlu1 %575 }
 0x43d   :  { %4061 = vrcp.f32 %v576_v5  ;;  %v573_v6 = vpop.xlane.xlu0 %572 }
 0x43e   :  { %4063 = vrcp.f32 %v573_v6 }
 0x444   :  { %v582_v7 = vpop.xlane.xlu1 %581 }
 0x445   :  { %4065 = vrcp.f32 %v582_v7  ;;  %v579_v8 = vpop.xlane.xlu0 %578 }
 0x446   :  { %4067 = vrcp.f32 %v579_v8 }
 0x447   :  { %v4062_v9 = vpop.eup %4061 }
 0x448   :  { %v4064_v10 = vpop.eup %4063  ;;  %v588_v12 = vmul.f32 %v4062_v9, %v4054_v59 }
 0x449   :  { %v587_v11 = vmul.f32 %v4064_v10, %v4056_v60  ;;  %v4002_v10 = vld [vmem:[%s4804_s3 + $0x30] sm:$0xff]  }
 0x44b   :  { %3683 = vmatprep.mubr.msk.f32.mxu0 %vm368_vm1, %v587_v11 }
 0x44c   :  { %3684 = vmatmul.mubr.msk.f32.vlgmr.msra.gmra.mrb[0].mxu0 %vm368_vm1, %v588_v12 }
 0x44d   :  { %3910 = vmatpush3.bf16.msra.mxu0 %v4335_v24 }
 0x44e   :  { %3693 = vmatprep.subr.bf16.mxu0 %v3996_v13 }
 0x44f   :  { %v4066_v14 = vpop.eup %4065 }
 0x450   :  { %v4068_v15 = vpop.eup %4067  ;;  %v590_v17 = vmul.f32 %v4066_v14, %v4058_v0 }
 0x451   :  { %v589_v16 = vmul.f32 %v4068_v15, %v4060_v1 }
 0x453   :  { %3690 = vmatprep.mubr.msk.f32.mxu0 %vm368_vm1, %v589_v16 }
 0x454   :  { %3691 = vmatmul.mubr.msk.f32.vlgmr.msra.gmra.mrb[2].mxu0 %vm368_vm1, %v590_v17 }
 0x455   :  { %3694 = vmatpush3.bf16.msra.mxu0 %v3996_v13  ;;  %3699 = vmatprep.mubr.msk.bf16.mxu0 %vm56_vm0, %v4287_v63 }
 0x456   :  { %3695 = vmatprep.subr.bf16.mxu0 %v3997_v19 }
 0x459   :  { %3696 = vmatpush3.bf16.msra.mxu0 %v3997_v19 }
 0x45a   :  { %3697 = vmatprep.subr.bf16.mxu0 %v3998_v20 }
 0x45d   :  { %3698 = vmatpush3.bf16.msra.mxu0 %v3998_v20 }
 0x45e   :  { %3713 = vmatprep.subr.bf16.mxu0 %v3999_v21 }
 0x460   :  { %3700 = vmatmul.mubr.msk.bf16.vlgmr.msra.gmra.mrb[4].mxu0 %vm56_vm0, %v4291_v3 }
 0x461   :  { %3714 = vmatpush3.bf16.msra.mxu0 %v3999_v21  ;;  %3719 = vmatprep.mubr.msk.bf16.mxu0 %vm56_vm0, %v4287_v63 }
 0x462   :  { %3715 = vmatprep.subr.bf16.mxu0 %v4000_v22 }
 0x465   :  { %3716 = vmatpush3.bf16.msra.mxu0 %v4000_v22 }
 0x466   :  { %3717 = vmatprep.subr.bf16.mxu0 %v4001_v23 }
 0x469   :  { %3718 = vmatpush3.bf16.msra.mxu0 %v4001_v23 }
 0x46c   :  { %3720 = vmatmul.mubr.msk.bf16.vlgmr.msra.gmra.mrb[8].mxu0 %vm56_vm0, %v4291_v3 }
 0x51f   :  { %v4400_v24 = vpop.f32.mrb[0].mxu0 }
 0x520   :  { %v4402_v25 = vpop.f32.mrb[1].mxu0 }
 0x521   :  { %v753_v26 = vpack.c.bf16 %v4400_v24, %v4402_v25  ;;  %v4012_v24 = vld [vmem:[%s4805_s4 + $0x40] sm:$0xff]  }
 0x527   :  { %v4406_v27 = vpop.f32.mrb[2].mxu0 }
 0x528   :  { %v4408_v28 = vpop.f32.mrb[3].mxu0 }
 0x529   :  { %v754_v29 = vpack.c.bf16 %v4406_v27, %v4408_v28 }
 0x533   :  { %v3701_v30 = vpop.f32.mrb[4].mxu0 }
 0x534   :  { %v816_v31 = vpop.f32.mrb[5].mxu0 }
 0x535   :  { %v3702_v32 = vpop.f32.mrb[6].mxu0  ;;  %3727 = vmatprep.mubr.msk.f32.mxu1 %vm368_vm1, %v816_v31  ;;  %v4004_v31 = vld [vmem:[%s4804_s3 + $0x40] sm:$0xff]  }
 0x536   :  { %v819_v33 = vpop.f32.mrb[7].mxu0 }
 0x537   :  { %3728 = vmatmul.mubr.msk.f32.vlgmr.msra.gmra.mrb[20].mxu1 %vm368_vm1, %v819_v33  ;;  %v4006_v33 = vld [vmem:[%s4806_s5 + $0x38] sm:$0xff]  }
 0x538   :  { %3922 = vmatpush3.bf16.xpose.msk.msra.mxu1 %vm4321_vm2, %v4356_v44  ;;  %3734 = vmatprep.mubr.msk.f32.mxu1 %vm368_vm1, %v3701_v30  ;;  %v4003_v30 = vld [vmem:[%s4804_s3 + $0x38] sm:$0xff]  }
 0x53f   :  { %3735 = vmatmul.mubr.msk.f32.vlgmr.msra.gmra.mrb[22].mxu1 %vm368_vm1, %v3702_v32  ;;  %v3721_v34 = vpop.f32.mrb[8].mxu0  ;;  %v4005_v32 = vld [vmem:[%s4806_s5 + $0x30] sm:$0xff]  }
 0x540   :  { %v964_v35 = vpop.f32.mrb[9].mxu0 }
 0x541   :  { %v3722_v36 = vpop.f32.mrb[10].mxu0 }
 0x542   :  { %v3927_v37 = vpack.c.bf16 %v3722_v36, %v3721_v34  ;;  %v967_v38 = vpop.f32.mrb[11].mxu0  ;;  %v4007_v34 = vld [vmem:[%s4806_s5 + $0x40] sm:$0xff]  }
 0x543   :  { %v3923_v39 = vpack.c.bf16 %v967_v38, %v964_v35  ;;  %v4008_v35 = vld [vmem:[%s4809_s6 + $0x8] sm:$0xff]   ;;  %v4009_v36 = vld [vmem:[%s4809_s6] sm:$0xff]  }
 0x544   :  { %3928 = vmatprep.subr.bf16.mxu1 %v3927_v37 }
 0x545   :  { %3924 = vmatprep.subr.bf16.mxu0 %v3923_v39  ;;  %3930 = vmatpush3.bf16.msra.mxu1 %v3927_v37 }
 0x546   :  { %3926 = vmatpush3.bf16.msra.mxu0 %v3923_v39  ;;  %3763 = vmatprep.subr.bf16.mxu1 %v4002_v10 }
 0x547   :  { %3751 = vmatprep.subr.bf16.mxu0 %v4008_v35 }
 0x60a   :  { %v3729_v40 = vpop.f32.mrb[20].mxu1 }
 0x60b   :  { %v1154_v41 = vmul.f32 0.25, %v3729_v40  ;;  %v1057_v42 = vpop.f32.mrb[21].mxu1 }
 0x60c   :  { %v1153_v43 = vmul.f32 0.25, %v1057_v42 }
 0x60d   :  { %v1160_v44 = vsel %vm368_vm1, %v1154_v41, -inf }
 0x60e   :  { %1161 = vmax.xlane.f32.xlu1 %v1160_v44  ;;  %v1157_v45 = vsel %vm368_vm1, %v1153_v43, -inf }
 0x60f   :  { %1158 = vmax.xlane.f32.xlu0 %v1157_v45 }
 0x612   :  { %v3736_v46 = vpop.f32.mrb[22].mxu1 }
 0x613   :  { %v1156_v47 = vmul.f32 0.25, %v3736_v46  ;;  %v1144_v48 = vpop.f32.mrb[23].mxu1 }
 0x614   :  { %v1155_v49 = vmul.f32 0.25, %v1144_v48 }
 0x615   :  { %v1166_v50 = vsel %vm368_vm1, %v1156_v47, -inf }
 0x616   :  { %1167 = vmax.xlane.f32.xlu1 %v1166_v50  ;;  %v1163_v51 = vsel %vm368_vm1, %v1155_v49, -inf }
 0x617   :  { %1164 = vmax.xlane.f32.xlu0 %v1163_v51 }
 0x69b   :  { %v1162_v52 = vpop.xlane.xlu1 %1161 }
 0x69c   :  { %v1170_v53 = vsub.f32 %v1154_v41, %v1162_v52  ;;  %v1159_v54 = vpop.xlane.xlu0 %1158 }
 0x69d   :  { %v1169_v55 = vsub.f32 %v1153_v43, %v1159_v54  ;;  %v4010_v43 = vld [vmem:[%s4805_s4 + $0x30] sm:$0xff]  }
 0x69e   :  { %v1175_v56 = vmul.f32 1.442695, %v1170_v53 }
 0x69f   :  { %v1173_v57 = vmul.f32 1.442695, %v1169_v55 }
 0x6a0   :  { %4069 = vpow2.f32 %v1175_v56 }
 0x6a1   :  { %4071 = vpow2.f32 %v1173_v57 }
 0x6a3   :  { %v1168_v58 = vpop.xlane.xlu1 %1167 }
 0x6a4   :  { %v1172_v59 = vsub.f32 %v1156_v47, %v1168_v58  ;;  %v1165_v60 = vpop.xlane.xlu0 %1164  ;;  %v4011_v47 = vld [vmem:[%s4805_s4 + $0x38] sm:$0xff]  }
 0x6a5   :  { %v1171_v61 = vsub.f32 %v1155_v49, %v1165_v60 }
 0x6a6   :  { %v1179_v62 = vmul.f32 1.442695, %v1172_v59 }
 0x6a7   :  { %v1177_v0 = vmul.f32 1.442695, %v1171_v61 }
 0x6a8   :  { %4073 = vpow2.f32 %v1179_v62 }
 0x6a9   :  { %4075 = vpow2.f32 %v1177_v0 }
 0x6aa   :  { %v4070_v1 = vpop.eup %4069 }
 0x6ab   :  { %v4072_v2 = vpop.eup %4071  ;;  %v1184_v4 = vsel %vm368_vm1, %v4070_v1, 0.0 }
 0x6ac   :  { %1185 = vadd.xlane.f32.xlu1 %v1184_v4  ;;  %v1181_v5 = vsel %vm368_vm1, %v4072_v2, 0.0 }
 0x6ad   :  { %1182 = vadd.xlane.f32.xlu0 %v1181_v5 }
 0x6b2   :  { %v4074_v6 = vpop.eup %4073 }
 0x6b3   :  { %v4076_v7 = vpop.eup %4075  ;;  %v1190_v8 = vsel %vm368_vm1, %v4074_v6, 0.0 }
 0x6b4   :  { %1191 = vadd.xlane.f32.xlu1 %v1190_v8  ;;  %v1187_v9 = vsel %vm368_vm1, %v4076_v7, 0.0 }
 0x6b5   :  { %1188 = vadd.xlane.f32.xlu0 %v1187_v9 }
 0x739   :  { %v1186_v11 = vpop.xlane.xlu1 %1185 }
 0x73a   :  { %4077 = vrcp.f32 %v1186_v11  ;;  %v1183_v12 = vpop.xlane.xlu0 %1182 }
 0x73b   :  { %4079 = vrcp.f32 %v1183_v12 }
 0x741   :  { %v1192_v13 = vpop.xlane.xlu1 %1191 }
 0x742   :  { %4081 = vrcp.f32 %v1192_v13  ;;  %v1189_v14 = vpop.xlane.xlu0 %1188 }
 0x743   :  { %4083 = vrcp.f32 %v1189_v14 }
 0x744   :  { %v4078_v15 = vpop.eup %4077 }
 0x745   :  { %v4080_v16 = vpop.eup %4079  ;;  %v1198_v19 = vmul.f32 %v4078_v15, %v4070_v1 }
 0x746   :  { %v1197_v17 = vmul.f32 %v4080_v16, %v4072_v2 }
 0x748   :  { %3741 = vmatprep.mubr.msk.f32.mxu0 %vm368_vm1, %v1197_v17 }
 0x749   :  { %3742 = vmatmul.mubr.msk.f32.vlgmr.msra.gmra.mrb[12].mxu0 %vm368_vm1, %v1198_v19 }
 0x74a   :  { %3752 = vmatpush3.bf16.msra.mxu0 %v4008_v35 }
 0x74b   :  { %3757 = vmatprep.subr.bf16.mxu0 %v4009_v36 }
 0x74c   :  { %v4082_v20 = vpop.eup %4081 }
 0x74d   :  { %v4084_v21 = vpop.eup %4083  ;;  %v1200_v23 = vmul.f32 %v4082_v20, %v4074_v6 }
 0x74e   :  { %v1199_v22 = vmul.f32 %v4084_v21, %v4076_v7 }
 0x750   :  { %3748 = vmatprep.mubr.msk.f32.mxu1 %vm368_vm1, %v1199_v22 }
 0x751   :  { %3749 = vmatmul.mubr.msk.f32.vlgmr.msra.gmra.mrb[24].mxu1 %vm368_vm1, %v1200_v23 }
 0x752   :  { %3764 = vmatpush3.bf16.msra.mxu1 %v4002_v10  ;;  %3769 = vmatprep.mubr.msk.bf16.mxu1 %vm56_vm0, %v4287_v63 }
 0x753   :  { %3765 = vmatprep.subr.bf16.mxu1 %v4003_v30 }
 0x756   :  { %3766 = vmatpush3.bf16.msra.mxu1 %v4003_v30 }
 0x757   :  { %3767 = vmatprep.subr.bf16.mxu1 %v4004_v31 }
 0x75a   :  { %3768 = vmatpush3.bf16.msra.mxu1 %v4004_v31 }
 0x75b   :  { %3783 = vmatprep.subr.bf16.mxu1 %v4005_v32 }
 0x75d   :  { %3770 = vmatmul.mubr.msk.bf16.vlgmr.msra.gmra.mrb[28].mxu1 %vm56_vm0, %v4291_v3 }
 0x75e   :  { %3784 = vmatpush3.bf16.msra.mxu1 %v4005_v32  ;;  %3789 = vmatprep.mubr.msk.bf16.mxu1 %vm56_vm0, %v4287_v63 }
 0x75f   :  { %3785 = vmatprep.subr.bf16.mxu1 %v4006_v33 }
 0x762   :  { %3786 = vmatpush3.bf16.msra.mxu1 %v4006_v33  ;;  %v4013_v33 = vld [vmem:[%s4804_s3 + $0x48] sm:$0xff]  }
 0x763   :  { %3787 = vmatprep.subr.bf16.mxu1 %v4007_v34 }
 0x766   :  { %3788 = vmatpush3.bf16.msra.mxu1 %v4007_v34 }
 0x769   :  { %3790 = vmatmul.mubr.msk.bf16.vlgmr.msra.gmra.mrb[32].mxu1 %vm56_vm0, %v4291_v3 }
 0x81c   :  { %v3743_v37 = vpop.f32.mrb[12].mxu0 }
 0x81d   :  { %v1273_v38 = vpop.f32.mrb[13].mxu0 }
 0x81e   :  { %v1363_v39 = vpack.c.bf16 %v3743_v37, %v1273_v38 }
 0x820   :  { %3753 = vmatprep.mubr.msk.bf16.mxu0 %vm368_vm1, %v1363_v39 }
 0x824   :  { %v3750_v40 = vpop.f32.mrb[24].mxu1 }
 0x825   :  { %v1354_v41 = vpop.f32.mrb[25].mxu1 }
 0x826   :  { %v1364_v42 = vpack.c.bf16 %v3750_v40, %v1354_v41 }
 0x828   :  { %3754 = vmatmul.mubr.msk.bf16.vlgmr.msra.gmra.mrb[16].mxu0 %vm368_vm1, %v1364_v42 }
 0x829   :  { %3758 = vmatpush3.bf16.msra.mxu0 %v4009_v36  ;;  %3759 = vmatprep.mubr.msk.bf16.mxu0 %vm368_vm1, %v753_v26 }
 0x82a   :  { %3773 = vmatprep.subr.bf16.mxu0 %v4010_v43 }
 0x830   :  { %v3771_v44 = vpop.f32.mrb[28].mxu1 }
 0x831   :  { %v1549_v45 = vpop.f32.mrb[29].mxu1  ;;  %3804 = vmatprep.mubr.msk.f32.mxu1 %vm368_vm1, %v3771_v44 }
 0x832   :  { %v3772_v46 = vpop.f32.mrb[30].mxu1 }
 0x833   :  { %v1552_v48 = vpop.f32.mrb[31].mxu1 }
 0x834   :  { %3760 = vmatmul.mubr.msk.bf16.vlgmr.msra.gmra.mrb[16].mxu0 %vm368_vm1, %v754_v29 }
 0x835   :  { %3774 = vmatpush3.bf16.msra.mxu0 %v4010_v43  ;;  %3779 = vmatprep.mubr.msk.bf16.mxu0 %vm56_vm0, %v4287_v63 }
 0x836   :  { %3775 = vmatprep.subr.bf16.mxu0 %v4011_v47 }
 0x839   :  { %3776 = vmatpush3.bf16.msra.mxu0 %v4011_v47  ;;  %v4015_v47 = vld [vmem:[%s4804_s3 + $0x58] sm:$0xff]  }
 0x83a   :  { %3777 = vmatprep.subr.bf16.mxu0 %v4012_v24 }
 0x83c   :  { %v3791_v25 = vpop.f32.mrb[32].mxu1 }
 0x83d   :  { %3778 = vmatpush3.bf16.msra.mxu0 %v4012_v24  ;;  %v1697_v26 = vpop.f32.mrb[33].mxu1  ;;  %v4017_v24 = vld [vmem:[%s4806_s5 + $0x50] sm:$0xff]  }
 0x83e   :  { %v3792_v49 = vpop.f32.mrb[34].mxu1 }
 0x83f   :  { %v3947_v50 = vpack.c.bf16 %v3792_v49, %v3791_v25  ;;  %v1700_v51 = vpop.f32.mrb[35].mxu1  ;;  %v4018_v25 = vld [vmem:[%s4806_s5 + $0x58] sm:$0xff]   ;;  %v4020_v49 = vld [vmem:[%s4805_s4 + $0x48] sm:$0xff]  }
 0x840   :  { %v3943_v27 = vpack.c.bf16 %v1700_v51, %v1697_v26  ;;  %3780 = vmatmul.mubr.msk.bf16.vlgmr.msra.gmra.mrb[20].mxu0 %vm56_vm0, %v4291_v3  ;;  %v4019_v26 = vld [vmem:[%s4809_s6 + $0x10] sm:$0xff]  }
 0x841   :  { %3797 = vmatprep.mubr.msk.f32.mxu0 %vm368_vm1, %v1549_v45 }
 0x913   :  { %v3781_v28 = vpop.f32.mrb[20].mxu0 }
 0x914   :  { %v1623_v29 = vpop.f32.mrb[21].mxu0 }
 0x915   :  { %v3782_v52 = vpop.f32.mrb[22].mxu0 }
 0x916   :  { %v3937_v53 = vpack.c.bf16 %v3782_v52, %v3781_v28  ;;  %v1626_v54 = vpop.f32.mrb[23].mxu0 }
 0x917   :  { %v3931_v55 = vpack.c.bf16 %v1626_v54, %v1623_v29  ;;  %v4022_v54 = vld [vmem:[%s4805_s4 + $0x58] sm:$0xff]  }
 0x918   :  { %3939 = vmatprep.subr.msk.bf16.mxu1 %vm4321_vm2, %v3937_v53 }
 0x919   :  { %3933 = vmatprep.subr.msk.bf16.mxu0 %vm4321_vm2, %v3931_v55  ;;  %3942 = vmatpush3.bf16.xpose.msk.msra.mxu1 %vm4321_vm2, %v3937_v53  ;;  %v4021_v53 = vld [vmem:[%s4805_s4 + $0x50] sm:$0xff]  }
 0x91a   :  { %3936 = vmatpush3.bf16.xpose.msk.msra.mxu0 %vm4321_vm2, %v3931_v55  ;;  %3948 = vmatprep.subr.bf16.mxu1 %v3947_v50 }
 0x91b   :  { %3944 = vmatprep.subr.bf16.mxu0 %v3943_v27 }
 0x920   :  { %3805 = vmatmul.mubr.msk.f32.vlgmr.msra.gmra.mrb[26].mxu1 %vm368_vm1, %v3772_v46  ;;  %v4014_v46 = vld [vmem:[%s4804_s3 + $0x50] sm:$0xff]  }
 0x921   :  { %3798 = vmatmul.mubr.msk.f32.vlgmr.msra.gmra.mrb[14].mxu0 %vm368_vm1, %v1552_v48  ;;  %3950 = vmatpush3.bf16.msra.mxu1 %v3947_v50  ;;  %v4016_v48 = vld [vmem:[%s4806_s5 + $0x48] sm:$0xff]  }
 0x922   :  { %3946 = vmatpush3.bf16.msra.mxu0 %v3943_v27  ;;  %3827 = vmatprep.subr.bf16.mxu1 %v4013_v33 }
 0x923   :  { %3821 = vmatprep.subr.bf16.mxu0 %v4019_v26 }
 0x9f3   :  { %v3806_v56 = vpop.f32.mrb[26].mxu1 }
 0x9f4   :  { %v3799_v57 = vpop.f32.mrb[14].mxu0  ;;  %v1877_v58 = vpop.f32.mrb[27].mxu1  ;;  %v1889_v62 = vmul.f32 0.25, %v3806_v56 }
 0x9f5   :  { %v1887_v59 = vmul.f32 0.25, %v3799_v57  ;;  %v1790_v60 = vpop.f32.mrb[15].mxu0  ;;  %v1888_v1 = vmul.f32 0.25, %v1877_v58 }
 0x9f6   :  { %v1886_v61 = vmul.f32 0.25, %v1790_v60  ;;  %v1899_v4 = vsel %vm368_vm1, %v1889_v62, -inf }
 0x9f7   :  { %v1893_v0 = vsel %vm368_vm1, %v1887_v59, -inf  ;;  %v1896_v5 = vsel %vm368_vm1, %v1888_v1, -inf }
 0x9f8   :  { %1894 = vmax.xlane.f32.xlu1 %v1893_v0  ;;  %v1890_v2 = vsel %vm368_vm1, %v1886_v61, -inf }
 0x9f9   :  { %1891 = vmax.xlane.f32.xlu0 %v1890_v2 }
 0x9fc   :  { %1900 = vmax.xlane.f32.xlu1 %v1899_v4 }
 0x9fd   :  { %1897 = vmax.xlane.f32.xlu0 %v1896_v5 }
 0xa85   :  { %v1895_v6 = vpop.xlane.xlu1 %1894 }
 0xa86   :  { %v1903_v7 = vsub.f32 %v1887_v59, %v1895_v6  ;;  %v1892_v8 = vpop.xlane.xlu0 %1891 }
 0xa87   :  { %v1902_v9 = vsub.f32 %v1886_v61, %v1892_v8 }
 0xa88   :  { %v1908_v10 = vmul.f32 1.442695, %v1903_v7 }
 0xa89   :  { %v1906_v11 = vmul.f32 1.442695, %v1902_v9  ;;  %v1901_v12 = vpop.xlane.xlu1 %1900 }
 0xa8a   :  { %4085 = vpow2.f32 %v1908_v10  ;;  %v1905_v13 = vsub.f32 %v1889_v62, %v1901_v12  ;;  %v1898_v14 = vpop.xlane.xlu0 %1897 }
 0xa8b   :  { %4087 = vpow2.f32 %v1906_v11  ;;  %v1904_v15 = vsub.f32 %v1888_v1, %v1898_v14 }
 0xa8c   :  { %v1912_v16 = vmul.f32 1.442695, %v1905_v13 }
 0xa8d   :  { %v1910_v17 = vmul.f32 1.442695, %v1904_v15 }
 0xa8e   :  { %4089 = vpow2.f32 %v1912_v16 }
 0xa8f   :  { %4091 = vpow2.f32 %v1910_v17 }
 0xa94   :  { %v4086_v19 = vpop.eup %4085 }
 0xa95   :  { %v4088_v20 = vpop.eup %4087  ;;  %v1917_v21 = vsel %vm368_vm1, %v4086_v19, 0.0 }
 0xa96   :  { %1918 = vadd.xlane.f32.xlu1 %v1917_v21  ;;  %v1914_v22 = vsel %vm368_vm1, %v4088_v20, 0.0 }
 0xa97   :  { %1915 = vadd.xlane.f32.xlu0 %v1914_v22 }
 0xa98   :  { %v4090_v23 = vpop.eup %4089 }
 0xa99   :  { %v4092_v30 = vpop.eup %4091  ;;  %v1923_v31 = vsel %vm368_vm1, %v4090_v23, 0.0 }
 0xa9a   :  { %1924 = vadd.xlane.f32.xlu1 %v1923_v31  ;;  %v1920_v32 = vsel %vm368_vm1, %v4092_v30, 0.0 }
 0xa9b   :  { %1921 = vadd.xlane.f32.xlu0 %v1920_v32 }
 0xb23   :  { %v1919_v34 = vpop.xlane.xlu1 %1918 }
 0xb24   :  { %4093 = vrcp.f32 %v1919_v34  ;;  %v1916_v35 = vpop.xlane.xlu0 %1915 }
 0xb25   :  { %4095 = vrcp.f32 %v1916_v35 }
 0xb27   :  { %v1925_v36 = vpop.xlane.xlu1 %1924 }
 0xb28   :  { %4097 = vrcp.f32 %v1925_v36  ;;  %v1922_v37 = vpop.xlane.xlu0 %1921 }
 0xb29   :  { %4099 = vrcp.f32 %v1922_v37 }
 0xb2e   :  { %v4094_v38 = vpop.eup %4093 }
 0xb2f   :  { %v4096_v39 = vpop.eup %4095  ;;  %v1931_v41 = vmul.f32 %v4094_v38, %v4086_v19 }
 0xb30   :  { %v1930_v40 = vmul.f32 %v4096_v39, %v4088_v20 }
 0xb32   :  { %v4098_v42 = vpop.eup %4097  ;;  %3811 = vmatprep.mubr.msk.f32.mxu0 %vm368_vm1, %v1930_v40 }
 0xb33   :  { %v4100_v43 = vpop.eup %4099  ;;  %3812 = vmatmul.mubr.msk.f32.vlgmr.msra.gmra.mrb[24].mxu0 %vm368_vm1, %v1931_v41  ;;  %v1933_v45 = vmul.f32 %v4098_v42, %v4090_v23 }
 0xb34   :  { %v1932_v44 = vmul.f32 %v4100_v43, %v4092_v30  ;;  %3822 = vmatpush3.bf16.msra.mxu0 %v4019_v26 }
 0xb35   :  { %3837 = vmatprep.subr.bf16.mxu0 %v4020_v49 }
 0xb36   :  { %3818 = vmatprep.mubr.msk.f32.mxu1 %vm368_vm1, %v1932_v44 }
 0xb37   :  { %3819 = vmatmul.mubr.msk.f32.vlgmr.msra.gmra.mrb[36].mxu1 %vm368_vm1, %v1933_v45 }
 0xb38   :  { %3828 = vmatpush3.bf16.msra.mxu1 %v4013_v33  ;;  %3833 = vmatprep.mubr.msk.bf16.mxu1 %vm56_vm0, %v4287_v63 }
 0xb39   :  { %3829 = vmatprep.subr.bf16.mxu1 %v4014_v46 }
 0xb3c   :  { %3830 = vmatpush3.bf16.msra.mxu1 %v4014_v46 }
 0xb3d   :  { %3831 = vmatprep.subr.bf16.mxu1 %v4015_v47 }
 0xb40   :  { %3832 = vmatpush3.bf16.msra.mxu1 %v4015_v47 }
 0xb41   :  { %3847 = vmatprep.subr.bf16.mxu1 %v4016_v48 }
 0xb43   :  { %3834 = vmatmul.mubr.msk.bf16.vlgmr.msra.gmra.mrb[40].mxu1 %vm56_vm0, %v4291_v3 }
 0xb44   :  { %3848 = vmatpush3.bf16.msra.mxu1 %v4016_v48  ;;  %3853 = vmatprep.mubr.msk.bf16.mxu1 %vm56_vm0, %v4287_v63 }
 0xb45   :  { %3849 = vmatprep.subr.bf16.mxu1 %v4017_v24 }
 0xb48   :  { %3850 = vmatpush3.bf16.msra.mxu1 %v4017_v24 }
 0xb49   :  { %3851 = vmatprep.subr.bf16.mxu1 %v4018_v25 }
 0xb4c   :  { %3852 = vmatpush3.bf16.msra.mxu1 %v4018_v25 }
 0xb4f   :  { %3854 = vmatmul.mubr.msk.bf16.vlgmr.msra.gmra.mrb[44].mxu1 %vm56_vm0, %v4291_v3 }
 0xc06   :  { %v3813_v50 = vpop.f32.mrb[24].mxu0 }
 0xc07   :  { %v2006_v51 = vpop.f32.mrb[25].mxu0 }
 0xc08   :  { %v2096_v27 = vpack.c.bf16 %v3813_v50, %v2006_v51 }
 0xc0a   :  { %v3820_v28 = vpop.f32.mrb[36].mxu1  ;;  %3823 = vmatprep.mubr.msk.bf16.mxu0 %vm368_vm1, %v2096_v27 }
 0xc0b   :  { %v2087_v29 = vpop.f32.mrb[37].mxu1 }
 0xc0c   :  { %v2097_v52 = vpack.c.bf16 %v3820_v28, %v2087_v29  ;;  %v4023_v29 = vld [vmem:[%s4809_s6 + $0x18] sm:$0xff]  }
 0xc0e   :  { %3824 = vmatmul.mubr.msk.bf16.vlgmr.msra.gmra.mrb[16].mxu0 %vm368_vm1, %v2097_v52 }
 0xc0f   :  { %3838 = vmatpush3.bf16.msra.mxu0 %v4020_v49  ;;  %3843 = vmatprep.mubr.msk.bf16.mxu0 %vm56_vm0, %v4287_v63 }
 0xc10   :  { %3839 = vmatprep.subr.bf16.mxu0 %v4021_v53 }
 0xc13   :  { %3840 = vmatpush3.bf16.msra.mxu0 %v4021_v53 }
 0xc14   :  { %3841 = vmatprep.subr.bf16.mxu0 %v4022_v54 }
 0xc16   :  { %v3835_v55 = vpop.f32.mrb[40].mxu1 }
 0xc17   :  { %v2225_v56 = vpop.f32.mrb[41].mxu1  ;;  %3842 = vmatpush3.bf16.msra.mxu0 %v4022_v54 }
 0xc18   :  { %v3836_v57 = vpop.f32.mrb[42].mxu1 }
 0xc19   :  { %v2228_v58 = vpop.f32.mrb[43].mxu1 }
 0xc1a   :  { %3844 = vmatmul.mubr.msk.bf16.vlgmr.msra.gmra.mrb[28].mxu0 %vm56_vm0, %v4291_v3 }
 0xc1b   :  { %3861 = vmatprep.mubr.msk.f32.mxu0 %vm368_vm1, %v2225_v56 }
 0xc22   :  { %v3855_v59 = vpop.f32.mrb[44].mxu1 }
 0xc23   :  { %v2373_v60 = vpop.f32.mrb[45].mxu1 }
 0xc24   :  { %v3856_v63 = vpop.f32.mrb[46].mxu1 }
 0xc25   :  { %v3967_v61 = vpack.c.bf16 %v3856_v63, %v3855_v59  ;;  %v2376_v62 = vpop.f32.mrb[47].mxu1  ;;  %v3473_v59 = vld [vmem:[%s4810_s7] ss:$0 sm:$0xff]  ;;  %v4141_v63 = vld [vmem:[%s4803_s14 + $0x10] sm:$0xff] }
 0xc26   :  { %v3963_v0 = vpack.c.bf16 %v2376_v62, %v2373_v60  ;;  %v4142_v62 = vld [vmem:[%s4803_s14] sm:$0xff] }
 0xc28   :  { %3964 = vmatprep.subr.bf16.mxu1 %v3963_v0 }
 0xc29   :  { %3966 = vmatpush3.bf16.msra.mxu1 %v3963_v0 }
 0xced   :  { %v3845_v1 = vpop.f32.mrb[28].mxu0 }
 0xcee   :  { %v2299_v2 = vpop.f32.mrb[29].mxu0 }
 0xcef   :  { %v3846_v4 = vpop.f32.mrb[30].mxu0 }
 0xcf0   :  { %v3957_v5 = vpack.c.bf16 %v3846_v4, %v3845_v1  ;;  %v2302_v6 = vpop.f32.mrb[31].mxu0 }
 0xcf1   :  { %v3951_v7 = vpack.c.bf16 %v2302_v6, %v2299_v2 }
 0xcf3   :  { %3953 = vmatprep.subr.msk.bf16.mxu0 %vm4321_vm2, %v3951_v7 }
 0xcf4   :  { %3956 = vmatpush3.bf16.xpose.msk.msra.mxu0 %vm4321_vm2, %v3951_v7  ;;  %v4144_v7 = vld [vmem:[%s4803_s14 + $0x8] sm:$0xff] }
 0xcf5   :  { %3959 = vmatprep.subr.msk.bf16.mxu0 %vm4321_vm2, %v3957_v5 }
 0xcfb   :  { %3862 = vmatmul.mubr.msk.f32.vlgmr.msra.gmra.mrb[26].mxu0 %vm368_vm1, %v2228_v58 }
 0xcfc   :  { %3962 = vmatpush3.bf16.xpose.msk.msra.mxu0 %vm4321_vm2, %v3957_v5  ;;  %3868 = vmatprep.mubr.msk.f32.mxu0 %vm368_vm1, %v3835_v55  ;;  %v4143_v5 = vld [vmem:[%s4803_s14 + $0x18] sm:$0xff] }
 0xcfd   :  { %3968 = vmatprep.subr.bf16.mxu0 %v3967_v61 }
 0xd03   :  { %3869 = vmatmul.mubr.msk.f32.vlgmr.msra.gmra.mrb[32].mxu0 %vm368_vm1, %v3836_v57 }
 0xd04   :  { %3970 = vmatpush3.bf16.msra.mxu0 %v3967_v61 }
 0xd05   :  { %3885 = vmatprep.subr.bf16.mxu0 %v4023_v29 }
 0xdce   :  { %v3863_v3 = vpop.f32.mrb[26].mxu0 }
 0xdcf   :  { %v2563_v8 = vmul.f32 0.25, %v3863_v3  ;;  %v2466_v9 = vpop.f32.mrb[27].mxu0 }
 0xdd0   :  { %v2562_v10 = vmul.f32 0.25, %v2466_v9 }
 0xdd1   :  { %v2569_v11 = vsel %vm368_vm1, %v2563_v8, -inf }
 0xdd2   :  { %2570 = vmax.xlane.f32.xlu1 %v2569_v11  ;;  %v2566_v12 = vsel %vm368_vm1, %v2562_v10, -inf }
 0xdd3   :  { %2567 = vmax.xlane.f32.xlu0 %v2566_v12 }
 0xdd6   :  { %v3870_v13 = vpop.f32.mrb[32].mxu0 }
 0xdd7   :  { %v2565_v14 = vmul.f32 0.25, %v3870_v13  ;;  %v2553_v18 = vpop.f32.mrb[33].mxu0 }
 0xdd8   :  { %v2564_v15 = vmul.f32 0.25, %v2553_v18 }
 0xdd9   :  { %v2575_v16 = vsel %vm368_vm1, %v2565_v14, -inf }
 0xdda   :  { %2576 = vmax.xlane.f32.xlu1 %v2575_v16  ;;  %v2572_v17 = vsel %vm368_vm1, %v2564_v15, -inf }
 0xddb   :  { %2573 = vmax.xlane.f32.xlu0 %v2572_v17 }
 0xe5f   :  { %v2571_v19 = vpop.xlane.xlu1 %2570 }
 0xe60   :  { %v2579_v20 = vsub.f32 %v2563_v8, %v2571_v19  ;;  %v2568_v21 = vpop.xlane.xlu0 %2567 }
 0xe61   :  { %v2578_v22 = vsub.f32 %v2562_v10, %v2568_v21 }
 0xe62   :  { %v2584_v23 = vmul.f32 1.442695, %v2579_v20 }
 0xe63   :  { %v2582_v30 = vmul.f32 1.442695, %v2578_v22 }
 0xe64   :  { %4101 = vpow2.f32 %v2584_v23 }
 0xe65   :  { %4103 = vpow2.f32 %v2582_v30 }
 0xe67   :  { %v2577_v31 = vpop.xlane.xlu1 %2576 }
 0xe68   :  { %v2581_v32 = vsub.f32 %v2565_v14, %v2577_v31  ;;  %v2574_v33 = vpop.xlane.xlu0 %2573 }
 0xe69   :  { %v2580_v34 = vsub.f32 %v2564_v15, %v2574_v33 }
 0xe6a   :  { %v2588_v35 = vmul.f32 1.442695, %v2581_v32 }
 0xe6b   :  { %v2586_v36 = vmul.f32 1.442695, %v2580_v34 }
 0xe6c   :  { %4105 = vpow2.f32 %v2588_v35 }
 0xe6d   :  { %4107 = vpow2.f32 %v2586_v36 }
 0xe6e   :  { %v4102_v37 = vpop.eup %4101 }
 0xe6f   :  { %v4104_v38 = vpop.eup %4103  ;;  %v2593_v39 = vsel %vm368_vm1, %v4102_v37, 0.0 }
 0xe70   :  { %2594 = vadd.xlane.f32.xlu1 %v2593_v39  ;;  %v2590_v40 = vsel %vm368_vm1, %v4104_v38, 0.0 }
 0xe71   :  { %2591 = vadd.xlane.f32.xlu0 %v2590_v40 }
 0xe76   :  { %v4106_v41 = vpop.eup %4105 }
 0xe77   :  { %v4108_v42 = vpop.eup %4107  ;;  %v2599_v43 = vsel %vm368_vm1, %v4106_v41, 0.0 }
 0xe78   :  { %2600 = vadd.xlane.f32.xlu1 %v2599_v43  ;;  %v2596_v44 = vsel %vm368_vm1, %v4108_v42, 0.0  ;;  %v4029_v43 = vld [vmem:[%s4811_s10 + $0x14] ss:$8 sps:$4 sm:$0xff]  }
 0xe79   :  { %2597 = vadd.xlane.f32.xlu0 %v2596_v44  ;;  %v4027_v44 = vld [vmem:[%s4811_s10 + $0x10] ss:$8 sps:$4 sm:$0xff]  }
 0xefd   :  { %v2595_v45 = vpop.xlane.xlu1 %2594 }
 0xefe   :  { %4109 = vrcp.f32 %v2595_v45  ;;  %v2592_v46 = vpop.xlane.xlu0 %2591  ;;  %v4032_v45 = vld [vmem:[%s4811_s10 + $0x24] ss:$8 sps:$4 sm:$0xff]  }
 0xeff   :  { %4111 = vrcp.f32 %v2592_v46  ;;  %v4030_v46 = vld [vmem:[%s4811_s10 + $0x20] ss:$8 sps:$4 sm:$0xff]  }
 0xf05   :  { %v2601_v47 = vpop.xlane.xlu1 %2600 }
 0xf06   :  { %4113 = vrcp.f32 %v2601_v47  ;;  %v2598_v48 = vpop.xlane.xlu0 %2597  ;;  %v4145_v47 = vmov 0  }
 0xf07   :  { %4115 = vrcp.f32 %v2598_v48  ;;  %v4033_v48 = vld [vmem:[%s4812_s12] sm:$0xff]  }
 0xf08   :  { %v4110_v24 = vpop.eup %4109 }
 0xf09   :  { %v4112_v25 = vpop.eup %4111  ;;  %v2607_v49 = vmul.f32 %v4110_v24, %v4102_v37  ;;  %v4034_v24 = vld [vmem:[%s4812_s12 + $0x8] sm:$0xff]  }
 0xf0a   :  { %v2606_v26 = vmul.f32 %v4112_v25, %v4104_v38  ;;  %v4035_v25 = vld [vmem:[%s4812_s12 + $0x10] sm:$0xff]  }
 0xf0c   :  { %3875 = vmatprep.mubr.msk.f32.mxu1 %vm368_vm1, %v2606_v26 }
 0xf0d   :  { %3876 = vmatmul.mubr.msk.f32.vlgmr.msra.gmra.mrb[38].mxu1 %vm368_vm1, %v2607_v49 }
 0xf0e   :  { %3019 = vmatprep.mubr.bf16.mxu1 %v4145_v47 }
 0xf10   :  { %v4114_v50 = vpop.eup %4113 }
 0xf11   :  { %v4116_v51 = vpop.eup %4115  ;;  %v2609_v28 = vmul.f32 %v4114_v50, %v4106_v41  ;;  %v4026_v41 = vld [vmem:[%s4811_s10 + $0x4] ss:$8 sps:$4 sm:$0xff]  }
 0xf12   :  { %v2608_v27 = vmul.f32 %v4116_v51, %v4108_v42  ;;  %v4024_v42 = vld [vmem:[%s4811_s10] ss:$8 sps:$4 sm:$0xff]   ;;  %2987 = vmatprep.subr.bf16.mxu1 %v4026_v41 }
 0xf13   :  { %2988 = vmatpush1.bf16.msra.mxu1 %v4024_v42 }
 0xf14   :  { %3882 = vmatprep.mubr.msk.f32.mxu0 %vm368_vm1, %v2608_v27  ;;  %2989 = vmatprep.subr.bf16.mxu1 %v4029_v43 }
 0xf15   :  { %3883 = vmatmul.mubr.msk.f32.vlgmr.msra.gmra.mrb[34].mxu0 %vm368_vm1, %v2609_v28 }
 0xf16   :  { %3886 = vmatpush3.bf16.msra.mxu0 %v4023_v29 }
 0xf17   :  { %2990 = vmatpush1.bf16.msra.mxu1 %v4027_v44  ;;  %3219 = vmatprep.subr.bf16.mxu0 %v4145_v47 }
 0xf18   :  { %2991 = vmatprep.subr.bf16.mxu1 %v4032_v45 }
 0xf1b   :  { %2992 = vmatpush1.bf16.msra.mxu1 %v4030_v46 }
 0xfe0   :  { %v3877_v52 = vpop.f32.mrb[38].mxu1 }
 0xfe1   :  { %v2682_v53 = vpop.f32.mrb[39].mxu1 }
 0xfe2   :  { %v2772_v54 = vpack.c.bf16 %v3877_v52, %v2682_v53 }
 0xfe4   :  { %3887 = vmatprep.mubr.msk.bf16.mxu0 %vm368_vm1, %v2772_v54 }
 0xfe8   :  { %v3884_v55 = vpop.f32.mrb[34].mxu0 }
 0xfe9   :  { %v2763_v56 = vpop.f32.mrb[35].mxu0 }
 0xfea   :  { %v2773_v57 = vpack.c.bf16 %v3884_v55, %v2763_v56 }
 0xfec   :  { %3888 = vmatmul.mubr.msk.bf16.vlgmr.msra.gmra.mrb[16].mxu0 %vm368_vm1, %v2773_v57 }
 0xfed   :  { %3220 = vmatpush1.bf16.msra.mxu0 %v4033_v48 }
 0xfee   :  { %3221 = vmatprep.subr.bf16.mxu0 %v4145_v47 }
 0xff1   :  { %3222 = vmatpush1.bf16.msra.mxu0 %v4034_v24 }
 0xff2   :  { %3223 = vmatprep.subr.bf16.mxu0 %v4145_v47 }
 0xff5   :  { %3224 = vmatpush1.bf16.msra.mxu0 %v4035_v25 }
 0xff6   :  { %3225 = vmatprep.subr.bf16.mxu0 %v4145_v47 }
0x10bf   :  { %v3889_v58 = vpop.f32.mrb[16].mxu0 }
0x10c0   :  { %v2823_v60 = vpop.f32.mrb[17].mxu0  ;;  %v2844_v61 = vadd.f32 %v4141_v63, %v3889_v58  ;;  %v3474_v58 = vld [vmem:[%s4813_s8] ss:$0 sm:$0xff] }
0x10c1   :  { %v2842_v0 = vadd.f32 %v4142_v62, %v2823_v60  ;;  %v3890_v1 = vpop.f32.mrb[18].mxu0 }
0x10c2   :  { %v2826_v2 = vpop.f32.mrb[19].mxu0  ;;  %v2845_v6 = vadd.f32 %v4143_v5, %v3890_v1  ;;  %v4600_v8 = vadd.f32 %v3473_v59, %v2844_v61 }
0x10c3   :  { %v4592_v4 = vadd.f32 %v3473_v59, %v2842_v0  ;;  %v2843_v3 = vadd.f32 %v4144_v7, %v2826_v2  ;;  %v3475_v0 = vld [vmem:[%s4814_s9] ss:$0 sm:$0xff] }
0x10c4   :  { %v4606_v11 = vadd.f32 %v3473_v59, %v2845_v6  ;;  %v2865_v13 = vsel %vm56_vm0, %v4600_v8, 0.0 }
0x10c5   :  { %v4602_v9 = vadd.f32 %v3473_v59, %v2843_v3  ;;  %v2859_v10 = vsel %vm56_vm0, %v4592_v4, 0.0 }
0x10c6   :  { %2860 = vadd.xlane.f32.xlu0 %v2859_v10  ;;  %v2868_v14 = vsel %vm56_vm0, %v4606_v11, 0.0 }
0x10c7   :  { %v2862_v12 = vsel %vm56_vm0, %v4602_v9, 0.0 }
0x10c8   :  { %2863 = vadd.xlane.f32.xlu1 %v2862_v12 }
0x10ca   :  { %2866 = vadd.xlane.f32.xlu0 %v2865_v13 }
0x10cc   :  { %2869 = vadd.xlane.f32.xlu1 %v2868_v14 }
0x1153   :  { %v2861_v18 = vpop.xlane.xlu0 %2860 }
0x1154   :  { %v2871_v15 = vmul.f32 0.020833334, %v2861_v18 }
0x1155   :  { %v2864_v16 = vpop.xlane.xlu1 %2863 }
0x1156   :  { %v4615_v17 = vsub.f32 %v4592_v4, %v2871_v15  ;;  %v2872_v19 = vmul.f32 0.020833334, %v2864_v16  ;;  %v4036_v16 = vld [vmem:[%s4812_s12 + $0x18] sm:$0xff]  }
0x1157   :  { %v2867_v20 = vpop.xlane.xlu0 %2866  ;;  %3226 = vmatpush1.bf16.msra.mxu0 %v4036_v16 }
0x1158   :  { %v4618_v21 = vsub.f32 %v4602_v9, %v2872_v19  ;;  %v2873_v22 = vmul.f32 0.020833334, %v2867_v20  ;;  %v2879_v23 = vmul.f32 %v4615_v17, %v4615_v17  ;;  %3227 = vmatprep.subr.bf16.mxu0 %v4145_v47  ;;  %v4038_v19 = vld [vmem:[%s4812_s12 + $0x28] sm:$0xff]   ;;  %v4039_v20 = vld [vmem:[%s4812_s12 + $0x30] sm:$0xff]  }
0x1159   :  { %v2870_v30 = vpop.xlane.xlu1 %2869 }
0x115a   :  { %v4623_v31 = vsub.f32 %v4600_v8, %v2873_v22  ;;  %v2874_v32 = vmul.f32 0.020833334, %v2870_v30  ;;  %v2883_v33 = vsel %vm56_vm0, %v2879_v23, 0.0  ;;  %v2880_v34 = vmul.f32 %v4618_v21, %v4618_v21  ;;  %v4041_v22 = vld [vmem:[%s4812_s12 + $0x40] sm:$0xff]   ;;  %v4042_v23 = vld [vmem:[%s4812_s12 + $0x48] sm:$0xff]   ;;  %v4043_v30 = vld [vmem:[%s4812_s12 + $0x50] sm:$0xff]  }
0x115b   :  { %2884 = vadd.xlane.f32.xlu0 %v2883_v33 }
0x115c   :  { %v4629_v35 = vsub.f32 %v4606_v11, %v2874_v32  ;;  %v2886_v36 = vsel %vm56_vm0, %v2880_v34, 0.0  ;;  %v2881_v37 = vmul.f32 %v4623_v31, %v4623_v31  ;;  %v2941_v32 = vlaneseq }
0x115d   :  { %2887 = vadd.xlane.f32.xlu1 %v2886_v36 }
0x115e   :  { %v2889_v38 = vsel %vm56_vm0, %v2881_v37, 0.0  ;;  %v2882_v39 = vmul.f32 %v4629_v35, %v4629_v35  ;;  %v2942_v33 = vshrl.u32 %v2941_v32, 7 }
0x115f   :  { %2890 = vadd.xlane.f32.xlu0 %v2889_v38 }
0x1160   :  { %v2892_v40 = vsel %vm56_vm0, %v2882_v39, 0.0  ;;  %v2943_v34 = vsub.s32 0, %v2942_v33  ;;  %v2947_v36 = vsub.s32 1, %v2942_v33 }
0x1161   :  { %2893 = vadd.xlane.f32.xlu1 %v2892_v40 }
0x11e8   :  { %v2885_v26 = vpop.xlane.xlu0 %2884 }
0x11e9   :  { %v2895_v49 = vmul.f32 0.020833334, %v2885_v26 }
0x11ea   :  { %v2888_v50 = vpop.xlane.xlu1 %2887 }
0x11eb   :  { %v2899_v51 = vadd.f32 1e-05, %v2895_v49  ;;  %v2896_v27 = vmul.f32 0.020833334, %v2888_v50 }
0x11ec   :  { %v2891_v28 = vpop.xlane.xlu0 %2890 }
0x11ed   :  { %4117 = vrsqrt.f32 %v2899_v51  ;;  %v2900_v29 = vadd.f32 1e-05, %v2896_v27  ;;  %v2897_v52 = vmul.f32 0.020833334, %v2891_v28 }
0x11ee   :  { %v2894_v53 = vpop.xlane.xlu1 %2893 }
0x11ef   :  { %4119 = vrsqrt.f32 %v2900_v29  ;;  %v2901_v54 = vadd.f32 1e-05, %v2897_v52  ;;  %v2898_v55 = vmul.f32 0.020833334, %v2894_v53 }
0x11f1   :  { %4121 = vrsqrt.f32 %v2901_v54  ;;  %v2902_v56 = vadd.f32 1e-05, %v2898_v55 }
0x11f3   :  { %4123 = vrsqrt.f32 %v2902_v56 }
0x11f7   :  { %v4118_v57 = vpop.eup %4117 }
0x11f8   :  { %v2907_v59 = vmul.f32 %v4118_v57, %v4615_v17  ;;  %v4037_v17 = vld [vmem:[%s4812_s12 + $0x20] sm:$0xff]  }
0x11f9   :  { %v4120_v60 = vpop.eup %4119  ;;  %3228 = vmatpush1.bf16.msra.mxu0 %v4037_v17 }
0x11fa   :  { %v2917_v63 = vmul.f32 %v3474_v58, %v2907_v59  ;;  %v2908_v61 = vmul.f32 %v4120_v60, %v4618_v21  ;;  %3229 = vmatprep.subr.bf16.mxu0 %v4145_v47  ;;  %v4040_v21 = vld [vmem:[%s4812_s12 + $0x38] sm:$0xff]  }
0x11fb   :  { %v4122_v62 = vpop.eup %4121 }
0x11fc   :  { %v2918_v1 = vmul.f32 %v3474_v58, %v2908_v61  ;;  %v2909_v5 = vmul.f32 %v4122_v62, %v4623_v31  ;;  %v2927_v7 = vadd.f32 %v3475_v0, %v2917_v63  ;;  %v4044_v31 = vld [vmem:[%s4812_s12 + $0x58] sm:$0xff]  }
0x11fd   :  { %v4124_v2 = vpop.eup %4123  ;;  %3230 = vmatpush1.bf16.msra.mxu0 %v4038_v19 }
0x11fe   :  { %v2910_v6 = vmul.f32 %v4124_v2, %v4629_v35  ;;  %v2928_v3 = vadd.f32 %v3475_v0, %v2918_v1  ;;  %v2919_v13 = vmul.f32 %v3474_v58, %v2909_v5  ;;  %3231 = vmatprep.subr.bf16.mxu0 %v4145_v47  ;;  %v2939_v35 = vld [vmem:[%s4815_s11] sm:$0x3] }
0x11ff   :  { %v2944_v37 = vrot.slane %v2939_v35, %v2943_v34  ;;  %v2948_v38 = vrot.slane %v2939_v35, %v2947_v36 }
0x1200   :  { %v2931_v10 = vpack.c.bf16 %v2928_v3, %v2927_v7  ;;  %v2920_v12 = vmul.f32 %v3474_v58, %v2910_v6  ;;  %v2929_v18 = vadd.f32 %v3475_v0, %v2919_v13 }
0x1201   :  { %3232 = vmatpush1.bf16.msra.mxu0 %v4039_v20 }
0x1202   :  { %3482 = vmatmul.mubr.msk.bf16.vlgmr.msra.gmra.mrb[48].mxu1 %vm56_vm0, %v2931_v10  ;;  %v2930_v14 = vadd.f32 %v3475_v0, %v2920_v12  ;;  %3233 = vmatprep.subr.bf16.mxu0 %v4145_v47 }
0x1203   :  { %3029 = vmatprep.mubr.bf16.mxu1 %v4145_v47 }
0x1204   :  { %v2932_v15 = vpack.c.bf16 %v2930_v14, %v2929_v18 }
0x1205   :  { %3234 = vmatpush1.bf16.msra.mxu0 %v4040_v21 }
0x1206   :  { %3235 = vmatprep.subr.bf16.mxu0 %v4145_v47 }
0x1209   :  { %3236 = vmatpush1.bf16.msra.mxu0 %v4041_v22 }
0x120a   :  { %3483 = vmatmul.mubr.msk.bf16.gmra.mrb[52].mxu1 %vm56_vm0, %v2932_v15  ;;  %3237 = vmatprep.subr.bf16.mxu0 %v4145_v47 }
0x120d   :  { %3238 = vmatpush1.bf16.msra.mxu0 %v4042_v23 }
0x120e   :  { %3239 = vmatprep.subr.bf16.mxu0 %v4145_v47 }
0x1211   :  { %3240 = vmatpush1.bf16.msra.mxu0 %v4043_v30 }
0x1212   :  { %3241 = vmatprep.subr.bf16.mxu0 %v4145_v47 }
0x1215   :  { %3242 = vmatpush1.bf16.msra.mxu0 %v4044_v31 }
0x12d5   :  { %v3021_v39 = vpop.f32.mrb[48].mxu1 }
0x12d6   :  { %v4721_v40 = vadd.f32 %v3021_v39, %v2944_v37  ;;  %v3023_v41 = vpop.f32.mrb[49].mxu1 }
0x12d7   :  { %v4723_v42 = vadd.f32 %v3023_v41, %v2948_v38  ;;  %v3025_v43 = vpop.f32.mrb[50].mxu1 }
0x12d8   :  { %v3040_v44 = vmul.f32 %v4721_v40, %v4721_v40  ;;  %v4727_v45 = vadd.f32 %v3025_v43, %v2944_v37  ;;  %v3027_v46 = vpop.f32.mrb[51].mxu1 }
0x12d9   :  { %v3041_v47 = vmul.f32 %v4723_v42, %v4723_v42  ;;  %v4731_v48 = vadd.f32 %v3027_v46, %v2948_v38 }
0x12da   :  { %v3048_v24 = vmul.f32 %v3040_v44, %v4721_v40  ;;  %v3042_v25 = vmul.f32 %v4727_v45, %v4727_v45 }
0x12db   :  { %v3049_v26 = vmul.f32 %v3041_v47, %v4723_v42  ;;  %v3043_v49 = vmul.f32 %v4731_v48, %v4731_v48 }
0x12dc   :  { %v3056_v50 = vmul.f32 0.044715, %v3048_v24  ;;  %v3050_v51 = vmul.f32 %v3042_v25, %v4727_v45 }
0x12dd   :  { %v3057_v27 = vmul.f32 0.044715, %v3049_v26  ;;  %v3051_v28 = vmul.f32 %v3043_v49, %v4731_v48  ;;  %v3031_v29 = vpop.f32.mrb[52].mxu1 }
0x12de   :  { %v3064_v52 = vadd.f32 %v3056_v50, %v4721_v40  ;;  %v3058_v53 = vmul.f32 0.044715, %v3050_v51  ;;  %v4742_v54 = vadd.f32 %v3031_v29, %v2944_v37  ;;  %v3033_v55 = vpop.f32.mrb[53].mxu1 }
0x12df   :  { %v3065_v56 = vadd.f32 %v3057_v27, %v4723_v42  ;;  %v3059_v57 = vmul.f32 0.044715, %v3051_v28  ;;  %v4745_v58 = vadd.f32 %v3033_v55, %v2948_v38  ;;  %v3035_v59 = vpop.f32.mrb[54].mxu1 }
0x12e0   :  { %v3072_v60 = vmul.f32 0.7978846, %v3064_v52  ;;  %v3066_v63 = vadd.f32 %v3058_v53, %v4727_v45  ;;  %v3044_v61 = vmul.f32 %v4742_v54, %v4742_v54  ;;  %v4750_v62 = vadd.f32 %v3035_v59, %v2944_v37  ;;  %v3037_v0 = vpop.f32.mrb[55].mxu1 }
0x12e1   :  { %v3073_v1 = vmul.f32 0.7978846, %v3065_v56  ;;  %v3067_v2 = vadd.f32 %v3059_v57, %v4731_v48  ;;  %v3045_v5 = vmul.f32 %v4745_v58, %v4745_v58  ;;  %v4755_v6 = vadd.f32 %v3037_v0, %v2948_v38 }
0x12e2   :  { %4125 = vtanh.f32 %v3072_v60  ;;  %v3074_v7 = vmul.f32 0.7978846, %v3066_v63  ;;  %v3052_v3 = vmul.f32 %v3044_v61, %v4742_v54  ;;  %v3046_v10 = vmul.f32 %v4750_v62, %v4750_v62 }
0x12e3   :  { %4127 = vtanh.f32 %v3073_v1  ;;  %v3075_v12 = vmul.f32 0.7978846, %v3067_v2  ;;  %v3053_v13 = vmul.f32 %v3045_v5, %v4745_v58  ;;  %v3047_v14 = vmul.f32 %v4755_v6, %v4755_v6 }
0x12e4   :  { %4129 = vtanh.f32 %v3074_v7  ;;  %v3060_v18 = vmul.f32 0.044715, %v3052_v3  ;;  %v3054_v15 = vmul.f32 %v3046_v10, %v4750_v62  ;;  %v3498_v3 = vld [vmem:[%s4816_s13] ss:$0 sm:$0xff] }
0x12e5   :  { %4131 = vtanh.f32 %v3075_v12  ;;  %v3061_v16 = vmul.f32 0.044715, %v3053_v13  ;;  %v3055_v17 = vmul.f32 %v3047_v14, %v4755_v6 }
0x12e6   :  { %v3068_v19 = vadd.f32 %v3060_v18, %v4742_v54  ;;  %v3062_v20 = vmul.f32 0.044715, %v3054_v15 }
0x12e7   :  { %v3069_v21 = vadd.f32 %v3061_v16, %v4745_v58  ;;  %v3063_v22 = vmul.f32 0.044715, %v3055_v17 }
0x12e8   :  { %v3076_v23 = vmul.f32 0.7978846, %v3068_v19  ;;  %v3070_v30 = vadd.f32 %v3062_v20, %v4750_v62 }
0x12e9   :  { %v3077_v31 = vmul.f32 0.7978846, %v3069_v21  ;;  %v3071_v32 = vadd.f32 %v3063_v22, %v4755_v6 }
0x12ea   :  { %4133 = vtanh.f32 %v3076_v23  ;;  %v3078_v33 = vmul.f32 0.7978846, %v3070_v30 }
0x12eb   :  { %4135 = vtanh.f32 %v3077_v31  ;;  %v3079_v34 = vmul.f32 0.7978846, %v3071_v32 }
0x12ec   :  { %v4126_v35 = vpop.eup %4125  ;;  %4137 = vtanh.f32 %v3078_v33 }
0x12ed   :  { %v4128_v36 = vpop.eup %4127  ;;  %v3088_v37 = vadd.f32 1.0, %v4126_v35  ;;  %4139 = vtanh.f32 %v3079_v34 }
0x12ee   :  { %v4130_v38 = vpop.eup %4129  ;;  %v3089_v39 = vadd.f32 1.0, %v4128_v36 }
0x12ef   :  { %v4132_v41 = vpop.eup %4131  ;;  %v3096_v43 = vmul.f32 0.5, %v3088_v37  ;;  %v3090_v44 = vadd.f32 1.0, %v4130_v38 }
0x12f0   :  { %v3097_v46 = vmul.f32 0.5, %v3089_v39  ;;  %v3091_v47 = vadd.f32 1.0, %v4132_v41 }
0x12f1   :  { %v3098_v24 = vmul.f32 0.5, %v3090_v44  ;;  %v3104_v26 = vmul.f32 %v3096_v43, %v4721_v40 }
0x12f2   :  { %v3099_v25 = vmul.f32 0.5, %v3091_v47  ;;  %v3105_v51 = vmul.f32 %v3097_v46, %v4723_v42 }
0x12f3   :  { %v3106_v49 = vmul.f32 %v3098_v24, %v4727_v45 }
0x12f4   :  { %v4134_v50 = vpop.eup %4133  ;;  %v3107_v27 = vmul.f32 %v3099_v25, %v4731_v48 }
0x12f5   :  { %v4136_v28 = vpop.eup %4135  ;;  %v3112_v29 = vpack.c.bf16 %v3106_v49, %v3104_v26  ;;  %v3092_v52 = vadd.f32 1.0, %v4134_v50 }
0x12f6   :  { %v4138_v53 = vpop.eup %4137  ;;  %v3093_v55 = vadd.f32 1.0, %v4136_v28  ;;  %v3113_v56 = vpack.c.bf16 %v3107_v27, %v3105_v51 }
0x12f7   :  { %v4140_v57 = vpop.eup %4139  ;;  %v3094_v59 = vadd.f32 1.0, %v4138_v53  ;;  %v3100_v60 = vmul.f32 0.5, %v3092_v52 }
0x12f8   :  { %v3101_v63 = vmul.f32 0.5, %v3093_v55  ;;  %v3095_v61 = vadd.f32 1.0, %v4140_v57  ;;  %3496 = vmatprep.mubr.msk.bf16.mxu0 %vm3212_vm3, %v3113_v56 }
0x12f9   :  { %3252 = vmatmul.mubr.bf16.vlgmr.msra.gmra.mrb[36].mxu0 %v3112_v29  ;;  %v3102_v40 = vmul.f32 0.5, %v3094_v59  ;;  %v3108_v42 = vmul.f32 %v3100_v60, %v4742_v54 }
0x12fa   :  { %v3103_v45 = vmul.f32 0.5, %v3095_v61  ;;  %v3109_v0 = vmul.f32 %v3101_v63, %v4745_v58 }
0x12fb   :  { %v3110_v48 = vmul.f32 %v3102_v40, %v4750_v62 }
0x12fc   :  { %v3111_v1 = vmul.f32 %v3103_v45, %v4755_v6 }
0x12fd   :  { %v3114_v2 = vpack.c.bf16 %v3110_v48, %v3108_v42 }
0x12fe   :  { %v3115_v5 = vpack.c.bf16 %v3111_v1, %v3109_v0 }
0x1300   :  { %3497 = vmatprep.mubr.msk.bf16.mxu0 %vm3212_vm3, %v3115_v5 }
0x1301   :  { %3260 = vmatmul.mubr.bf16.gmra.mrb[40].mxu0 %v3114_v2 }
0x13cc   :  { %v3253_v7 = vpop.f32.mrb[36].mxu0 }
0x13cd   :  { %v3268_v10 = vadd.f32 %v3253_v7, %v4592_v4  ;;  %v3255_v12 = vpop.f32.mrb[37].mxu0 }
0x13ce   :  { %v3256_v54 = vpop.f32.mrb[38].mxu0 }
0x13cf   :  { %v3279_v13 = vadd.f32 %v3498_v3, %v3268_v10  ;;  %v3269_v62 = vadd.f32 %v3256_v54, %v4602_v9  ;;  %v3258_v58 = vpop.f32.mrb[39].mxu0 }
0x13d1   :  { %3283 = vst.msk [vmem:[%s4803_s14] sm:$0xff] %vm56_vm0, %v3279_v13  ;;  %v3280_v6 = vadd.f32 %v3498_v3, %v3269_v62 }
0x13d3   :  { %3284 = vst.msk [vmem:[%s4803_s14 + $0x8] sm:$0xff] %vm56_vm0, %v3280_v6 }
0x13d4   :  { %v3261_v14 = vpop.f32.mrb[40].mxu0 }
0x13d5   :  { %v3270_v4 = vadd.f32 %v3261_v14, %v4600_v8  ;;  %v3263_v18 = vpop.f32.mrb[41].mxu0 }
0x13d6   :  { %v3264_v15 = vpop.f32.mrb[42].mxu0 }
0x13d7   :  { %v3281_v16 = vadd.f32 %v3498_v3, %v3270_v4  ;;  %v3271_v9 = vadd.f32 %v3264_v15, %v4606_v11  ;;  %v3266_v17 = vpop.f32.mrb[43].mxu0 }
0x13d9   :  { %3285 = vst.msk [vmem:[%s4803_s14 + $0x10] sm:$0xff] %vm56_vm0, %v3281_v16  ;;  %v3282_v19 = vadd.f32 %v3498_v3, %v3271_v9 }
0x13db   :  { %3286 = vst.msk [vmem:[%s4803_s14 + $0x18] sm:$0xff] %vm56_vm0, %v3282_v19 }

</bundles_post_ra>
